<compile_context>
chip_gen: v5e
topology: v5e:2x2
jax: 0.10.0
libtpu: 0.0.40
codegen_flags: <defaults>
</compile_context>

<pallas_src>
import numpy as np
import jax
import jax.numpy as jnp
from jax.experimental import pallas as pl
from jax.experimental.pallas import tpu as pltpu

EPS = 1e-5
BN_SCALE = 1.0 / float(np.sqrt(1.0 + EPS))   # eval-mode BN with default params


def _round_up(x, m):
    return (x + m - 1) // m * m


def _pad_axis(a, size, axis):
    pad = size - a.shape[axis]
    if pad <= 0:
        return a
    widths = [(0, 0)] * a.ndim
    widths[axis] = (0, pad)
    return jnp.pad(a, widths)


# ---------------------------------------------------------------------------
# Backbone kernel: 3 dynamic circular conv layers + BN(eval) + ReLU + FC head
# ---------------------------------------------------------------------------
def _conv_layer(x, flt, shift_ref, xs_ref):
    """One dynamic circular conv layer (C = F), BN(eval) folded into flt, + ReLU.

    x:        (Bt, C, L) f32 activation
    flt:      (Bt, F, 9*C) bf16 per-sample filters, column index = tap*C + c
    shift_ref:(9, L, L) bf16 one-hot circular-shift matrices (resident)
    xs_ref:   VMEM scratch (Bt, 9*C, L) f32 for the shifted, stacked activation
    """
    Bt, C, L = x.shape
    KK = shift_ref.shape[0]
    xb = x.reshape(Bt * C, L).astype(jnp.bfloat16)
    for t in range(KK):
        # circular shift for tap t as an MXU matmul (one-hot -> exact selection)
        xs_ref[:, t * C:(t + 1) * C, :] = jnp.dot(
            xb, shift_ref[t], preferred_element_type=jnp.float32
        ).reshape(Bt, C, L)
    xs = xs_ref[...].astype(jnp.bfloat16)                       # (Bt, 9C, L)
    out = jax.lax.dot_general(flt, xs, (((2,), (1,)), ((0,), (0,))),
                              preferred_element_type=jnp.float32)  # (Bt, F, L)
    return jnp.maximum(out, 0.0)


def backbone_kernel(shift_ref, x0_ref, f1_ref, f2_ref, f3_ref,
                    fcw_ref, fcb_ref, h_ref, xs_ref):
    # shift_ref: (9, L, L) bf16   constant across grid (loaded once)
    # x0_ref:    (Bt, L) f32      chequer-permuted input, C = 1 (BN0 folded into f1)
    # f1_ref:    (Bt, 9*F) f32    layer-1 filters, col = t*F + f (BN0^2*BN1 folded)
    # f2_ref:    (Bt, F, 9*F) bf16 layer-2 filters, col = t*C + c (BN2 folded)
    # f3_ref:    (Bt, F, 9*F) bf16 layer-3 filters (BN3 folded)
    # fcw_ref:   (F, L, D) bf16   fc weight reshaped (BNfn folded)
    # fcb_ref:   (1, D) f32       fc bias (BNfn folded)
    # h_ref:     (Bt, D) f32      output hidden features (post ReLU)
    # xs_ref:    (Bt, 9*F, L) f32 VMEM scratch
    Bt, L = x0_ref.shape
    KK = shift_ref.shape[0]
    F_ = f2_ref.shape[1]
    D = fcb_ref.shape[1]

    # ---- layer 1 (C = 1): per-tap shift matmul + VPU broadcast accumulate ----
    x0b = x0_ref[...].astype(jnp.bfloat16)                      # (Bt, L)
    f1 = f1_ref[...]                                            # (Bt, 9*F)
    acc = jnp.zeros((Bt, F_, L), jnp.float32)
    for t in range(KK):
        xs1 = jnp.dot(x0b, shift_ref[t],
                      preferred_element_type=jnp.float32)       # (Bt, L)
        acc = acc + f1[:, t * F_:(t + 1) * F_, None] * xs1[:, None, :]
    x = jnp.maximum(acc, 0.0)                                   # (Bt, F, L)

    # ---- layers 2 & 3 (C = F): K = 72 batched MXU contractions, stay on-chip ----
    x = _conv_layer(x, f2_ref[...], shift_ref, xs_ref)
    x = _conv_layer(x, f3_ref[...], shift_ref, xs_ref)

    # ---- FC + BN1d(eval) + ReLU (flatten order (f, h, w) like torch) ----
    h = jnp.zeros((Bt, D), jnp.float32) + fcb_ref[...]
    for f in range(F_):
        h = h + jnp.dot(x[:, f, :].astype(jnp.bfloat16), fcw_ref[f],
                        preferred_element_type=jnp.float32)
    h_ref[...] = jnp.maximum(h, 0.0)


def backbone(x0, f1, f2, f3, fc_w, fc_b, shift, *, b_tile):
    Bp, L = x0.shape
    F_ = f2.shape[1]
    D = fc_b.shape[1]
    grid = (Bp // b_tile,)
    return pl.pallas_call(
        backbone_kernel,
        out_shape=jax.ShapeDtypeStruct((Bp, D), jnp.float32),
        grid=grid,
        in_specs=[
            pl.BlockSpec((9, L, L), lambda b: (0, 0, 0)),        # shift mats (resident)
            pl.BlockSpec((b_tile, L), lambda b: (b, 0)),
            pl.BlockSpec((b_tile, 9 * F_), lambda b: (b, 0)),
            pl.BlockSpec((b_tile, F_, 9 * F_), lambda b: (b, 0, 0)),
            pl.BlockSpec((b_tile, F_, 9 * F_), lambda b: (b, 0, 0)),
            pl.BlockSpec((F_, L, D), lambda b: (0, 0, 0)),       # fc weight (resident)
            pl.BlockSpec((1, D), lambda b: (0, 0)),
        ],
        out_specs=pl.BlockSpec((b_tile, D), lambda b: (b, 0)),
        scratch_shapes=[pltpu.VMEM((b_tile, 9 * F_, L), jnp.float32)],
        compiler_params=pltpu.CompilerParams(
            dimension_semantics=("parallel",),
            vmem_limit_bytes=32 * 1024 * 1024),
    )(shift, x0, f1, f2, f3, fc_w, fc_b)


# ---------------------------------------------------------------------------
# Score kernel: sigmoid(h @ neg_emb^T + bias), batched over samples and K
# ---------------------------------------------------------------------------
def score_kernel(h_ref, neg_ref, nb_ref, out_ref):
    # h_ref: (Bs, 1, D) f32; neg_ref: (Bs, D, Kt) bf16; nb/out: (Bs, Kt) f32
    h = h_ref[...].astype(jnp.bfloat16)
    s = jax.lax.dot_general(h, neg_ref[...],
                            (((2,), (1,)), ((0,), (0,))),
                            preferred_element_type=jnp.float32)   # (Bs, 1, Kt)
    out_ref[...] = jax.nn.sigmoid(s[:, 0, :] + nb_ref[...])


def score(h, neg_t, neg_bias, *, bs_tile, k_tile):
    Bp, _, D = h.shape
    Kp = neg_t.shape[2]
    grid = (Bp // bs_tile, Kp // k_tile)
    return pl.pallas_call(
        score_kernel,
        out_shape=jax.ShapeDtypeStruct((Bp, Kp), jnp.float32),
        grid=grid,
        in_specs=[
            pl.BlockSpec((bs_tile, 1, D), lambda b, kk: (b, 0, 0)),
            pl.BlockSpec((bs_tile, D, k_tile), lambda b, kk: (b, 0, kk)),
            pl.BlockSpec((bs_tile, k_tile), lambda b, kk: (b, kk)),
        ],
        out_specs=pl.BlockSpec((bs_tile, k_tile), lambda b, kk: (b, kk)),
        compiler_params=pltpu.CompilerParams(
            dimension_semantics=("parallel", "parallel"),
            vmem_limit_bytes=32 * 1024 * 1024),
    )(h, neg_t, neg_bias)


# ---------------------------------------------------------------------------
# JAX glue (embeddings, tiny RNN, filter generation, BN folding, layout)
# ---------------------------------------------------------------------------
def make_shift_mats(H, W, k):
    """One-hot matrices S[t] with (x_flat @ S[t])[l] = x[(oh+kh-p)%H, (ow+kw-p)%W]."""
    L = H * W
    p = k // 2
    oh = np.arange(H)[:, None]
    ow = np.arange(W)[None, :]
    mats = []
    for kh in range(k):
        for kw in range(k):
            src = ((oh + kh - p) % H) * W + ((ow + kw - p) % W)   # (H, W)
            m = np.zeros((L, L), np.float32)
            m[src.reshape(-1), np.arange(L)] = 1.0
            mats.append(m)
    return jnp.asarray(np.stack(mats))                            # (k*k, L, L)


def make_params(key, cfg):
    D = cfg['embed_dim']; F_ = cfg['num_filt']; k = cfg['ker_sz']
    keys = jax.random.split(key, 12)
    p = {}
    p['ent_embed'] = jax.random.normal(keys[0], (cfg['num_ent'], D)) * 0.1
    p['rel_embed'] = jax.random.normal(keys[1], (cfg['num_rel'] * 2, D)) * 0.1
    p['year_embed'] = jax.random.normal(keys[2], (cfg['n_year'], D)) * 0.1
    p['month_embed'] = jax.random.normal(keys[3], (cfg['n_month'], D)) * 0.1
    p['day_embed'] = jax.random.normal(keys[4], (cfg['n_day'], D)) * 0.1
    p['bias'] = jnp.zeros((cfg['num_ent'],), jnp.float32)       # matches torch zeros init
    # single-layer tanh RNN (time encoder)
    p['rnn_w_ih'] = jax.random.normal(keys[5], (D, D)) * 0.1
    p['rnn_w_hh'] = jax.random.normal(keys[6], (D, D)) * 0.1
    p['rnn_b_ih'] = jnp.zeros((D,), jnp.float32)
    p['rnn_b_hh'] = jnp.zeros((D,), jnp.float32)
    # per-layer filter generators
    p['g1_w'] = jax.random.normal(keys[7], (D, F_ * 1 * k * k)) * 0.05
    p['g1_b'] = jnp.zeros((F_ * 1 * k * k,), jnp.float32)
    p['g2_w'] = jax.random.normal(keys[8], (D, F_ * F_ * k * k)) * 0.05
    p['g2_b'] = jnp.zeros((F_ * F_ * k * k,), jnp.float32)
    p['g3_w'] = jax.random.normal(keys[9], (D, F_ * F_ * k * k)) * 0.05
    p['g3_b'] = jnp.zeros((F_ * F_ * k * k,), jnp.float32)
    flat_sz = cfg['k_h'] * 2 * cfg['k_w'] * F_
    p['fc_w'] = jax.random.normal(keys[10], (flat_sz, D)) * 0.05
    p['fc_b'] = jnp.zeros((D,), jnp.float32)
    p['chequer_perm'] = jax.random.permutation(keys[11], 2 * D)
    p['shift_mats'] = make_shift_mats(2 * cfg['k_w'], cfg['k_h'], k).astype(jnp.bfloat16)
    return p


def sane_forward(params, cfg, sub, rel, year, month, day, neg_ents):
    D = cfg['embed_dim']; F_ = cfg['num_filt']; k = cfg['ker_sz']
    H, W = 2 * cfg['k_w'], cfg['k_h']
    L = H * W
    KK = k * k
    B = sub.shape[0]
    s = BN_SCALE

    h_emb = params['ent_embed'][sub]
    r_emb = params['rel_embed'][rel]
    y_emb = params['year_embed'][year]
    m_emb = params['month_embed'][month]
    d_emb = params['day_embed'][day]

    # tanh RNN over the (year, month, day) sequence (batch_first, h0 = 0)
    hcur = jnp.zeros((B, D), jnp.float32)
    outs = []
    for e in (y_emb, m_emb, d_emb):
        hcur = jnp.tanh(e @ params['rnn_w_ih'].T + params['rnn_b_ih']
                        + hcur @ params['rnn_w_hh'].T + params['rnn_b_hh'])
        outs.append(hcur)
    y_t, m_t, d_t = outs

    # per-sample filters, lane-dense layouts, eval-BN scales folded in
    # f1: (B, 9*F)  column index = t*F + f           (layer 1, C = 1)
    f1 = ((y_t @ params['g1_w'] + params['g1_b'])
          .reshape(B, F_, KK).transpose(0, 2, 1).reshape(B, KK * F_)) * (s * s)
    # f2/f3: (B, F, 9*F)  column index = t*C + c     (layers 2/3, C = F)
    f2 = ((m_t @ params['g2_w'] + params['g2_b'])
          .reshape(B, F_, F_, k, k).transpose(0, 1, 3, 4, 2)
          .reshape(B, F_, KK * F_)) * s
    f3 = ((d_t @ params['g3_w'] + params['g3_b'])
          .reshape(B, F_, F_, k, k).transpose(0, 1, 3, 4, 2)
          .reshape(B, F_, KK * F_)) * s

    # chequer permutation of [h; r], flattened row-major over (H=2*k_w, W=k_h);
    # BN0(eval) is folded into f1, so x0 is the raw permuted vector.
    comb = jnp.concatenate([h_emb, r_emb], axis=1)                      # (B, 2D)
    x0 = comb[:, params['chequer_perm']].astype(jnp.float32)            # (B, L)

    fc_w = (params['fc_w'] * s).reshape(F_, L, D).astype(jnp.bfloat16)  # BNfn folded
    fc_b = (params['fc_b'] * s).reshape(1, D).astype(jnp.float32)

    # ---- backbone: pad batch to the tile, single fused kernel ----
    b_tile = min(128, _round_up(B, 8))
    Bp = _round_up(B, b_tile)
    h_feat = backbone(
        _pad_axis(x0, Bp, 0),
        _pad_axis(f1.astype(jnp.float32), Bp, 0),
        _pad_axis(f2.astype(jnp.bfloat16), Bp, 0),
        _pad_axis(f3.astype(jnp.bfloat16), Bp, 0),
        fc_w, fc_b, params['shift_mats'], b_tile=b_tile)[:B]            # (B, D)

    # ---- scoring: per-sample negatives streamed lane-dense as (B, D, Kpad) bf16
    K = neg_ents.shape[1]
    k_tile = min(1024, _round_up(K, 128))
    Kp = _round_up(K, k_tile)
    bs_tile = min(64, _round_up(B, 8))
    Bp2 = _round_up(B, bs_tile)
    neg_t = jnp.swapaxes(params['ent_embed'][neg_ents], 1, 2).astype(jnp.bfloat16)
    neg_t = _pad_axis(_pad_axis(neg_t, Kp, 2), Bp2, 0)                  # (Bp2, D, Kp)
    neg_b = _pad_axis(
        _pad_axis(params['bias'][neg_ents].astype(jnp.float32), Kp, 1), Bp2, 0)
    h_in = _pad_axis(h_feat.reshape(B, 1, D), Bp2, 0)                   # (Bp2, 1, D)
    pred = score(h_in, neg_t, neg_b, bs_tile=bs_tile, k_tile=k_tile)
    return pred[:B, :K]


if __name__ == "__main__":
    cfg = dict(num_ent=50, num_rel=10, n_year=5, n_month=12, n_day=31,
               embed_dim=32, k_w=8, k_h=4, num_filt=8, ker_sz=3)
    key = jax.random.PRNGKey(0)
    pkey, ikey = jax.random.split(key)
    params = make_params(pkey, cfg)

    B, K = 2, 16
    ks = jax.random.split(ikey, 6)
    sub = jax.random.randint(ks[0], (B,), 0, cfg['num_ent'])
    rel = jax.random.randint(ks[1], (B,), 0, cfg['num_rel'] * 2)
    year = jax.random.randint(ks[2], (B,), 0, cfg['n_year'])
    month = jax.random.randint(ks[3], (B,), 0, cfg['n_month'])
    day = jax.random.randint(ks[4], (B,), 0, cfg['n_day'])
    neg_ents = jax.random.randint(ks[5], (B, K), 0, cfg['num_ent'])

    pred = sane_forward(params, cfg, sub, rel, year, month, day, neg_ents)
    jax.block_until_ready(pred)
    assert pred.shape == (B, K) and bool(jnp.all(jnp.isfinite(pred)))
    print("KERNEL_OK")
</pallas_src>

<mosaic_0001>
module attributes {stable_mosaic.version = 11 : i64} {
  func.func @backbone_kernel(%arg0: i32, %arg1: memref<9x64x64xbf16, #tpu.memory_space<vmem>>, %arg2: memref<8x64xf32, #tpu.memory_space<vmem>>, %arg3: memref<8x72xf32, #tpu.memory_space<vmem>>, %arg4: memref<8x8x72xbf16, #tpu.memory_space<vmem>>, %arg5: memref<8x8x72xbf16, #tpu.memory_space<vmem>>, %arg6: memref<8x64x32xbf16, #tpu.memory_space<vmem>>, %arg7: memref<1x32xf32, #tpu.memory_space<vmem>>, %arg8: memref<8x32xf32, #tpu.memory_space<vmem>>, %arg9: memref<8x72x64xf32, #tpu.memory_space<vmem>>) attributes {dimension_semantics = [#tpu.dimension_semantics<parallel>], iteration_bounds = array<i64: 1>, scalar_prefetch = 0 : i64, scratch_operands = 1 : i64, tpu.core_type = #tpu.core_type<tc>, window_params = [{pipeline_mode = #tpu.pipeline_mode<synchronous>, transform_indices = @transform_0, window_bounds = array<i64: 9, 64, 64>}, {transform_indices = @transform_1, window_bounds = array<i64: 8, 64>}, {transform_indices = @transform_2, window_bounds = array<i64: 8, 72>}, {transform_indices = @transform_3, window_bounds = array<i64: 8, 8, 72>}, {transform_indices = @transform_4, window_bounds = array<i64: 8, 8, 72>}, {pipeline_mode = #tpu.pipeline_mode<synchronous>, transform_indices = @transform_5, window_bounds = array<i64: 8, 64, 32>}, {pipeline_mode = #tpu.pipeline_mode<synchronous>, transform_indices = @transform_6, window_bounds = array<i64: 1, 32>}, {transform_indices = @transform_7, window_bounds = array<i64: 8, 32>}]} {
    %c0 = arith.constant 0 : index
    %c0_0 = arith.constant 0 : index
    %0 = vector.load %arg2[%c0, %c0_0] : memref<8x64xf32, #tpu.memory_space<vmem>>, vector<8x64xf32>
    %1 = arith.truncf %0 : vector<8x64xf32> to vector<8x64xbf16>
    %c0_1 = arith.constant 0 : index
    %c0_2 = arith.constant 0 : index
    %2 = vector.load %arg3[%c0_1, %c0_2] : memref<8x72xf32, #tpu.memory_space<vmem>>, vector<8x72xf32>
    %cst = arith.constant 0.000000e+00 : f32
    %3 = vector.broadcast %cst : f32 to vector<8x8x64xf32>
    %c0_3 = arith.constant 0 : index
    %c0_4 = arith.constant 0 : index
    %c0_5 = arith.constant 0 : index
    %4 = vector.load %arg1[%c0_3, %c0_4, %c0_5] : memref<9x64x64xbf16, #tpu.memory_space<vmem>>, vector<1x64x64xbf16>
    %5 = vector.shape_cast %4 : vector<1x64x64xbf16> to vector<64x64xbf16>
    %cst_6 = arith.constant dense<0.000000e+00> : vector<8x64xf32>
    %6 = tpu.matmul %1, %5, %cst_6 {dimension_numbers = #tpu.dot_dimension_numbers<[1], [0], [0], [1], [0, 0, 1, 1], [], []>} : vector<8x64xbf16>, vector<64x64xbf16>, vector<8x64xf32> -> vector<8x64xf32>
    %7 = vector.extract_strided_slice %2 {offsets = [0, 0], sizes = [8, 8], strides = [1, 1]} : vector<8x72xf32> to vector<8x8xf32>
    %8 = vector.shape_cast %7 : vector<8x8xf32> to vector<8x8x1xf32>
    %9 = vector.shape_cast %6 : vector<8x64xf32> to vector<8x1x64xf32>
    %10 = vector.broadcast %8 : vector<8x8x1xf32> to vector<8x8x64xf32>
    %11 = vector.broadcast %9 : vector<8x1x64xf32> to vector<8x8x64xf32>
    %12 = arith.mulf %10, %11 : vector<8x8x64xf32>
    %13 = arith.addf %3, %12 : vector<8x8x64xf32>
    %c1 = arith.constant 1 : index
    %c0_7 = arith.constant 0 : index
    %c0_8 = arith.constant 0 : index
    %14 = vector.load %arg1[%c1, %c0_7, %c0_8] : memref<9x64x64xbf16, #tpu.memory_space<vmem>>, vector<1x64x64xbf16>
    %15 = vector.shape_cast %14 : vector<1x64x64xbf16> to vector<64x64xbf16>
    %cst_9 = arith.constant dense<0.000000e+00> : vector<8x64xf32>
    %16 = tpu.matmul %1, %15, %cst_9 {dimension_numbers = #tpu.dot_dimension_numbers<[1], [0], [0], [1], [0, 0, 1, 1], [], []>} : vector<8x64xbf16>, vector<64x64xbf16>, vector<8x64xf32> -> vector<8x64xf32>
    %17 = vector.extract_strided_slice %2 {offsets = [0, 8], sizes = [8, 8], strides = [1, 1]} : vector<8x72xf32> to vector<8x8xf32>
    %18 = vector.shape_cast %17 : vector<8x8xf32> to vector<8x8x1xf32>
    %19 = vector.shape_cast %16 : vector<8x64xf32> to vector<8x1x64xf32>
    %20 = vector.broadcast %18 : vector<8x8x1xf32> to vector<8x8x64xf32>
    %21 = vector.broadcast %19 : vector<8x1x64xf32> to vector<8x8x64xf32>
    %22 = arith.mulf %20, %21 : vector<8x8x64xf32>
    %23 = arith.addf %13, %22 : vector<8x8x64xf32>
    %c2 = arith.constant 2 : index
    %c0_10 = arith.constant 0 : index
    %c0_11 = arith.constant 0 : index
    %24 = vector.load %arg1[%c2, %c0_10, %c0_11] : memref<9x64x64xbf16, #tpu.memory_space<vmem>>, vector<1x64x64xbf16>
    %25 = vector.shape_cast %24 : vector<1x64x64xbf16> to vector<64x64xbf16>
    %cst_12 = arith.constant dense<0.000000e+00> : vector<8x64xf32>
    %26 = tpu.matmul %1, %25, %cst_12 {dimension_numbers = #tpu.dot_dimension_numbers<[1], [0], [0], [1], [0, 0, 1, 1], [], []>} : vector<8x64xbf16>, vector<64x64xbf16>, vector<8x64xf32> -> vector<8x64xf32>
    %27 = vector.extract_strided_slice %2 {offsets = [0, 16], sizes = [8, 8], strides = [1, 1]} : vector<8x72xf32> to vector<8x8xf32>
    %28 = vector.shape_cast %27 : vector<8x8xf32> to vector<8x8x1xf32>
    %29 = vector.shape_cast %26 : vector<8x64xf32> to vector<8x1x64xf32>
    %30 = vector.broadcast %28 : vector<8x8x1xf32> to vector<8x8x64xf32>
    %31 = vector.broadcast %29 : vector<8x1x64xf32> to vector<8x8x64xf32>
    %32 = arith.mulf %30, %31 : vector<8x8x64xf32>
    %33 = arith.addf %23, %32 : vector<8x8x64xf32>
    %c3 = arith.constant 3 : index
    %c0_13 = arith.constant 0 : index
    %c0_14 = arith.constant 0 : index
    %34 = vector.load %arg1[%c3, %c0_13, %c0_14] : memref<9x64x64xbf16, #tpu.memory_space<vmem>>, vector<1x64x64xbf16>
    %35 = vector.shape_cast %34 : vector<1x64x64xbf16> to vector<64x64xbf16>
    %cst_15 = arith.constant dense<0.000000e+00> : vector<8x64xf32>
    %36 = tpu.matmul %1, %35, %cst_15 {dimension_numbers = #tpu.dot_dimension_numbers<[1], [0], [0], [1], [0, 0, 1, 1], [], []>} : vector<8x64xbf16>, vector<64x64xbf16>, vector<8x64xf32> -> vector<8x64xf32>
    %37 = vector.extract_strided_slice %2 {offsets = [0, 24], sizes = [8, 8], strides = [1, 1]} : vector<8x72xf32> to vector<8x8xf32>
    %38 = vector.shape_cast %37 : vector<8x8xf32> to vector<8x8x1xf32>
    %39 = vector.shape_cast %36 : vector<8x64xf32> to vector<8x1x64xf32>
    %40 = vector.broadcast %38 : vector<8x8x1xf32> to vector<8x8x64xf32>
    %41 = vector.broadcast %39 : vector<8x1x64xf32> to vector<8x8x64xf32>
    %42 = arith.mulf %40, %41 : vector<8x8x64xf32>
    %43 = arith.addf %33, %42 : vector<8x8x64xf32>
    %c4 = arith.constant 4 : index
    %c0_16 = arith.constant 0 : index
    %c0_17 = arith.constant 0 : index
    %44 = vector.load %arg1[%c4, %c0_16, %c0_17] : memref<9x64x64xbf16, #tpu.memory_space<vmem>>, vector<1x64x64xbf16>
    %45 = vector.shape_cast %44 : vector<1x64x64xbf16> to vector<64x64xbf16>
    %cst_18 = arith.constant dense<0.000000e+00> : vector<8x64xf32>
    %46 = tpu.matmul %1, %45, %cst_18 {dimension_numbers = #tpu.dot_dimension_numbers<[1], [0], [0], [1], [0, 0, 1, 1], [], []>} : vector<8x64xbf16>, vector<64x64xbf16>, vector<8x64xf32> -> vector<8x64xf32>
    %47 = vector.extract_strided_slice %2 {offsets = [0, 32], sizes = [8, 8], strides = [1, 1]} : vector<8x72xf32> to vector<8x8xf32>
    %48 = vector.shape_cast %47 : vector<8x8xf32> to vector<8x8x1xf32>
    %49 = vector.shape_cast %46 : vector<8x64xf32> to vector<8x1x64xf32>
    %50 = vector.broadcast %48 : vector<8x8x1xf32> to vector<8x8x64xf32>
    %51 = vector.broadcast %49 : vector<8x1x64xf32> to vector<8x8x64xf32>
    %52 = arith.mulf %50, %51 : vector<8x8x64xf32>
    %53 = arith.addf %43, %52 : vector<8x8x64xf32>
    %c5 = arith.constant 5 : index
    %c0_19 = arith.constant 0 : index
    %c0_20 = arith.constant 0 : index
    %54 = vector.load %arg1[%c5, %c0_19, %c0_20] : memref<9x64x64xbf16, #tpu.memory_space<vmem>>, vector<1x64x64xbf16>
    %55 = vector.shape_cast %54 : vector<1x64x64xbf16> to vector<64x64xbf16>
    %cst_21 = arith.constant dense<0.000000e+00> : vector<8x64xf32>
    %56 = tpu.matmul %1, %55, %cst_21 {dimension_numbers = #tpu.dot_dimension_numbers<[1], [0], [0], [1], [0, 0, 1, 1], [], []>} : vector<8x64xbf16>, vector<64x64xbf16>, vector<8x64xf32> -> vector<8x64xf32>
    %57 = vector.extract_strided_slice %2 {offsets = [0, 40], sizes = [8, 8], strides = [1, 1]} : vector<8x72xf32> to vector<8x8xf32>
    %58 = vector.shape_cast %57 : vector<8x8xf32> to vector<8x8x1xf32>
    %59 = vector.shape_cast %56 : vector<8x64xf32> to vector<8x1x64xf32>
    %60 = vector.broadcast %58 : vector<8x8x1xf32> to vector<8x8x64xf32>
    %61 = vector.broadcast %59 : vector<8x1x64xf32> to vector<8x8x64xf32>
    %62 = arith.mulf %60, %61 : vector<8x8x64xf32>
    %63 = arith.addf %53, %62 : vector<8x8x64xf32>
    %c6 = arith.constant 6 : index
    %c0_22 = arith.constant 0 : index
    %c0_23 = arith.constant 0 : index
    %64 = vector.load %arg1[%c6, %c0_22, %c0_23] : memref<9x64x64xbf16, #tpu.memory_space<vmem>>, vector<1x64x64xbf16>
    %65 = vector.shape_cast %64 : vector<1x64x64xbf16> to vector<64x64xbf16>
    %cst_24 = arith.constant dense<0.000000e+00> : vector<8x64xf32>
    %66 = tpu.matmul %1, %65, %cst_24 {dimension_numbers = #tpu.dot_dimension_numbers<[1], [0], [0], [1], [0, 0, 1, 1], [], []>} : vector<8x64xbf16>, vector<64x64xbf16>, vector<8x64xf32> -> vector<8x64xf32>
    %67 = vector.extract_strided_slice %2 {offsets = [0, 48], sizes = [8, 8], strides = [1, 1]} : vector<8x72xf32> to vector<8x8xf32>
    %68 = vector.shape_cast %67 : vector<8x8xf32> to vector<8x8x1xf32>
    %69 = vector.shape_cast %66 : vector<8x64xf32> to vector<8x1x64xf32>
    %70 = vector.broadcast %68 : vector<8x8x1xf32> to vector<8x8x64xf32>
    %71 = vector.broadcast %69 : vector<8x1x64xf32> to vector<8x8x64xf32>
    %72 = arith.mulf %70, %71 : vector<8x8x64xf32>
    %73 = arith.addf %63, %72 : vector<8x8x64xf32>
    %c7 = arith.constant 7 : index
    %c0_25 = arith.constant 0 : index
    %c0_26 = arith.constant 0 : index
    %74 = vector.load %arg1[%c7, %c0_25, %c0_26] : memref<9x64x64xbf16, #tpu.memory_space<vmem>>, vector<1x64x64xbf16>
    %75 = vector.shape_cast %74 : vector<1x64x64xbf16> to vector<64x64xbf16>
    %cst_27 = arith.constant dense<0.000000e+00> : vector<8x64xf32>
    %76 = tpu.matmul %1, %75, %cst_27 {dimension_numbers = #tpu.dot_dimension_numbers<[1], [0], [0], [1], [0, 0, 1, 1], [], []>} : vector<8x64xbf16>, vector<64x64xbf16>, vector<8x64xf32> -> vector<8x64xf32>
    %77 = vector.extract_strided_slice %2 {offsets = [0, 56], sizes = [8, 8], strides = [1, 1]} : vector<8x72xf32> to vector<8x8xf32>
    %78 = vector.shape_cast %77 : vector<8x8xf32> to vector<8x8x1xf32>
    %79 = vector.shape_cast %76 : vector<8x64xf32> to vector<8x1x64xf32>
    %80 = vector.broadcast %78 : vector<8x8x1xf32> to vector<8x8x64xf32>
    %81 = vector.broadcast %79 : vector<8x1x64xf32> to vector<8x8x64xf32>
    %82 = arith.mulf %80, %81 : vector<8x8x64xf32>
    %83 = arith.addf %73, %82 : vector<8x8x64xf32>
    %c8 = arith.constant 8 : index
    %c0_28 = arith.constant 0 : index
    %c0_29 = arith.constant 0 : index
    %84 = vector.load %arg1[%c8, %c0_28, %c0_29] : memref<9x64x64xbf16, #tpu.memory_space<vmem>>, vector<1x64x64xbf16>
    %85 = vector.shape_cast %84 : vector<1x64x64xbf16> to vector<64x64xbf16>
    %cst_30 = arith.constant dense<0.000000e+00> : vector<8x64xf32>
    %86 = tpu.matmul %1, %85, %cst_30 {dimension_numbers = #tpu.dot_dimension_numbers<[1], [0], [0], [1], [0, 0, 1, 1], [], []>} : vector<8x64xbf16>, vector<64x64xbf16>, vector<8x64xf32> -> vector<8x64xf32>
    %87 = vector.extract_strided_slice %2 {offsets = [0, 64], sizes = [8, 8], strides = [1, 1]} : vector<8x72xf32> to vector<8x8xf32>
    %88 = vector.shape_cast %87 : vector<8x8xf32> to vector<8x8x1xf32>
    %89 = vector.shape_cast %86 : vector<8x64xf32> to vector<8x1x64xf32>
    %90 = vector.broadcast %88 : vector<8x8x1xf32> to vector<8x8x64xf32>
    %91 = vector.broadcast %89 : vector<8x1x64xf32> to vector<8x8x64xf32>
    %92 = arith.mulf %90, %91 : vector<8x8x64xf32>
    %93 = arith.addf %83, %92 : vector<8x8x64xf32>
    %cst_31 = arith.constant 0.000000e+00 : f32
    %94 = vector.broadcast %cst_31 : f32 to vector<8x8x64xf32>
    %95 = arith.maximumf %93, %94 : vector<8x8x64xf32>
    %c0_32 = arith.constant 0 : index
    %c0_33 = arith.constant 0 : index
    %c0_34 = arith.constant 0 : index
    %96 = vector.load %arg4[%c0_32, %c0_33, %c0_34] : memref<8x8x72xbf16, #tpu.memory_space<vmem>>, vector<8x8x72xbf16>
    %97 = vector.shape_cast %95 : vector<8x8x64xf32> to vector<64x64xf32>
    %98 = arith.truncf %97 : vector<64x64xf32> to vector<64x64xbf16>
    %c0_35 = arith.constant 0 : index
    %c0_36 = arith.constant 0 : index
    %c0_37 = arith.constant 0 : index
    %99 = vector.load %arg1[%c0_35, %c0_36, %c0_37] : memref<9x64x64xbf16, #tpu.memory_space<vmem>>, vector<1x64x64xbf16>
    %100 = vector.shape_cast %99 : vector<1x64x64xbf16> to vector<64x64xbf16>
    %cst_38 = arith.constant dense<0.000000e+00> : vector<64x64xf32>
    %101 = tpu.matmul %98, %100, %cst_38 {dimension_numbers = #tpu.dot_dimension_numbers<[1], [0], [0], [1], [0, 0, 1, 1], [], []>} : vector<64x64xbf16>, vector<64x64xbf16>, vector<64x64xf32> -> vector<64x64xf32>
    %102 = vector.shape_cast %101 : vector<64x64xf32> to vector<8x8x64xf32>
    %c0_39 = arith.constant 0 : index
    %c0_40 = arith.constant 0 : index
    %c0_41 = arith.constant 0 : index
    %103 = vector.load %arg9[%c0_39, %c0_40, %c0_41] : memref<8x72x64xf32, #tpu.memory_space<vmem>>, vector<8x8x64xf32>
    tpu.vector_store %arg9[%c0_39, %c0_40, %c0_41], %102 {strides = array<i32>} : memref<8x72x64xf32, #tpu.memory_space<vmem>>, vector<8x8x64xf32>,
    %c1_42 = arith.constant 1 : index
    %c0_43 = arith.constant 0 : index
    %c0_44 = arith.constant 0 : index
    %104 = vector.load %arg1[%c1_42, %c0_43, %c0_44] : memref<9x64x64xbf16, #tpu.memory_space<vmem>>, vector<1x64x64xbf16>
    %105 = vector.shape_cast %104 : vector<1x64x64xbf16> to vector<64x64xbf16>
    %cst_45 = arith.constant dense<0.000000e+00> : vector<64x64xf32>
    %106 = tpu.matmul %98, %105, %cst_45 {dimension_numbers = #tpu.dot_dimension_numbers<[1], [0], [0], [1], [0, 0, 1, 1], [], []>} : vector<64x64xbf16>, vector<64x64xbf16>, vector<64x64xf32> -> vector<64x64xf32>
    %107 = vector.shape_cast %106 : vector<64x64xf32> to vector<8x8x64xf32>
    %c0_46 = arith.constant 0 : index
    %c8_47 = arith.constant 8 : index
    %c0_48 = arith.constant 0 : index
    %108 = vector.load %arg9[%c0_46, %c8_47, %c0_48] : memref<8x72x64xf32, #tpu.memory_space<vmem>>, vector<8x8x64xf32>
    tpu.vector_store %arg9[%c0_46, %c8_47, %c0_48], %107 {strides = array<i32>} : memref<8x72x64xf32, #tpu.memory_space<vmem>>, vector<8x8x64xf32>,
    %c2_49 = arith.constant 2 : index
    %c0_50 = arith.constant 0 : index
    %c0_51 = arith.constant 0 : index
    %109 = vector.load %arg1[%c2_49, %c0_50, %c0_51] : memref<9x64x64xbf16, #tpu.memory_space<vmem>>, vector<1x64x64xbf16>
    %110 = vector.shape_cast %109 : vector<1x64x64xbf16> to vector<64x64xbf16>
    %cst_52 = arith.constant dense<0.000000e+00> : vector<64x64xf32>
    %111 = tpu.matmul %98, %110, %cst_52 {dimension_numbers = #tpu.dot_dimension_numbers<[1], [0], [0], [1], [0, 0, 1, 1], [], []>} : vector<64x64xbf16>, vector<64x64xbf16>, vector<64x64xf32> -> vector<64x64xf32>
    %112 = vector.shape_cast %111 : vector<64x64xf32> to vector<8x8x64xf32>
    %c0_53 = arith.constant 0 : index
    %c16 = arith.constant 16 : index
    %c0_54 = arith.constant 0 : index
    %113 = vector.load %arg9[%c0_53, %c16, %c0_54] : memref<8x72x64xf32, #tpu.memory_space<vmem>>, vector<8x8x64xf32>
    tpu.vector_store %arg9[%c0_53, %c16, %c0_54], %112 {strides = array<i32>} : memref<8x72x64xf32, #tpu.memory_space<vmem>>, vector<8x8x64xf32>,
    %c3_55 = arith.constant 3 : index
    %c0_56 = arith.constant 0 : index
    %c0_57 = arith.constant 0 : index
    %114 = vector.load %arg1[%c3_55, %c0_56, %c0_57] : memref<9x64x64xbf16, #tpu.memory_space<vmem>>, vector<1x64x64xbf16>
    %115 = vector.shape_cast %114 : vector<1x64x64xbf16> to vector<64x64xbf16>
    %cst_58 = arith.constant dense<0.000000e+00> : vector<64x64xf32>
    %116 = tpu.matmul %98, %115, %cst_58 {dimension_numbers = #tpu.dot_dimension_numbers<[1], [0], [0], [1], [0, 0, 1, 1], [], []>} : vector<64x64xbf16>, vector<64x64xbf16>, vector<64x64xf32> -> vector<64x64xf32>
    %117 = vector.shape_cast %116 : vector<64x64xf32> to vector<8x8x64xf32>
    %c0_59 = arith.constant 0 : index
    %c24 = arith.constant 24 : index
    %c0_60 = arith.constant 0 : index
    %118 = vector.load %arg9[%c0_59, %c24, %c0_60] : memref<8x72x64xf32, #tpu.memory_space<vmem>>, vector<8x8x64xf32>
    tpu.vector_store %arg9[%c0_59, %c24, %c0_60], %117 {strides = array<i32>} : memref<8x72x64xf32, #tpu.memory_space<vmem>>, vector<8x8x64xf32>,
    %c4_61 = arith.constant 4 : index
    %c0_62 = arith.constant 0 : index
    %c0_63 = arith.constant 0 : index
    %119 = vector.load %arg1[%c4_61, %c0_62, %c0_63] : memref<9x64x64xbf16, #tpu.memory_space<vmem>>, vector<1x64x64xbf16>
    %120 = vector.shape_cast %119 : vector<1x64x64xbf16> to vector<64x64xbf16>
    %cst_64 = arith.constant dense<0.000000e+00> : vector<64x64xf32>
    %121 = tpu.matmul %98, %120, %cst_64 {dimension_numbers = #tpu.dot_dimension_numbers<[1], [0], [0], [1], [0, 0, 1, 1], [], []>} : vector<64x64xbf16>, vector<64x64xbf16>, vector<64x64xf32> -> vector<64x64xf32>
    %122 = vector.shape_cast %121 : vector<64x64xf32> to vector<8x8x64xf32>
    %c0_65 = arith.constant 0 : index
    %c32 = arith.constant 32 : index
    %c0_66 = arith.constant 0 : index
    %123 = vector.load %arg9[%c0_65, %c32, %c0_66] : memref<8x72x64xf32, #tpu.memory_space<vmem>>, vector<8x8x64xf32>
    tpu.vector_store %arg9[%c0_65, %c32, %c0_66], %122 {strides = array<i32>} : memref<8x72x64xf32, #tpu.memory_space<vmem>>, vector<8x8x64xf32>,
    %c5_67 = arith.constant 5 : index
    %c0_68 = arith.constant 0 : index
    %c0_69 = arith.constant 0 : index
    %124 = vector.load %arg1[%c5_67, %c0_68, %c0_69] : memref<9x64x64xbf16, #tpu.memory_space<vmem>>, vector<1x64x64xbf16>
    %125 = vector.shape_cast %124 : vector<1x64x64xbf16> to vector<64x64xbf16>
    %cst_70 = arith.constant dense<0.000000e+00> : vector<64x64xf32>
    %126 = tpu.matmul %98, %125, %cst_70 {dimension_numbers = #tpu.dot_dimension_numbers<[1], [0], [0], [1], [0, 0, 1, 1], [], []>} : vector<64x64xbf16>, vector<64x64xbf16>, vector<64x64xf32> -> vector<64x64xf32>
    %127 = vector.shape_cast %126 : vector<64x64xf32> to vector<8x8x64xf32>
    %c0_71 = arith.constant 0 : index
    %c40 = arith.constant 40 : index
    %c0_72 = arith.constant 0 : index
    %128 = vector.load %arg9[%c0_71, %c40, %c0_72] : memref<8x72x64xf32, #tpu.memory_space<vmem>>, vector<8x8x64xf32>
    tpu.vector_store %arg9[%c0_71, %c40, %c0_72], %127 {strides = array<i32>} : memref<8x72x64xf32, #tpu.memory_space<vmem>>, vector<8x8x64xf32>,
    %c6_73 = arith.constant 6 : index
    %c0_74 = arith.constant 0 : index
    %c0_75 = arith.constant 0 : index
    %129 = vector.load %arg1[%c6_73, %c0_74, %c0_75] : memref<9x64x64xbf16, #tpu.memory_space<vmem>>, vector<1x64x64xbf16>
    %130 = vector.shape_cast %129 : vector<1x64x64xbf16> to vector<64x64xbf16>
    %cst_76 = arith.constant dense<0.000000e+00> : vector<64x64xf32>
    %131 = tpu.matmul %98, %130, %cst_76 {dimension_numbers = #tpu.dot_dimension_numbers<[1], [0], [0], [1], [0, 0, 1, 1], [], []>} : vector<64x64xbf16>, vector<64x64xbf16>, vector<64x64xf32> -> vector<64x64xf32>
    %132 = vector.shape_cast %131 : vector<64x64xf32> to vector<8x8x64xf32>
    %c0_77 = arith.constant 0 : index
    %c48 = arith.constant 48 : index
    %c0_78 = arith.constant 0 : index
    %133 = vector.load %arg9[%c0_77, %c48, %c0_78] : memref<8x72x64xf32, #tpu.memory_space<vmem>>, vector<8x8x64xf32>
    tpu.vector_store %arg9[%c0_77, %c48, %c0_78], %132 {strides = array<i32>} : memref<8x72x64xf32, #tpu.memory_space<vmem>>, vector<8x8x64xf32>,
    %c7_79 = arith.constant 7 : index
    %c0_80 = arith.constant 0 : index
    %c0_81 = arith.constant 0 : index
    %134 = vector.load %arg1[%c7_79, %c0_80, %c0_81] : memref<9x64x64xbf16, #tpu.memory_space<vmem>>, vector<1x64x64xbf16>
    %135 = vector.shape_cast %134 : vector<1x64x64xbf16> to vector<64x64xbf16>
    %cst_82 = arith.constant dense<0.000000e+00> : vector<64x64xf32>
    %136 = tpu.matmul %98, %135, %cst_82 {dimension_numbers = #tpu.dot_dimension_numbers<[1], [0], [0], [1], [0, 0, 1, 1], [], []>} : vector<64x64xbf16>, vector<64x64xbf16>, vector<64x64xf32> -> vector<64x64xf32>
    %137 = vector.shape_cast %136 : vector<64x64xf32> to vector<8x8x64xf32>
    %c0_83 = arith.constant 0 : index
    %c56 = arith.constant 56 : index
    %c0_84 = arith.constant 0 : index
    %138 = vector.load %arg9[%c0_83, %c56, %c0_84] : memref<8x72x64xf32, #tpu.memory_space<vmem>>, vector<8x8x64xf32>
    tpu.vector_store %arg9[%c0_83, %c56, %c0_84], %137 {strides = array<i32>} : memref<8x72x64xf32, #tpu.memory_space<vmem>>, vector<8x8x64xf32>,
    %c8_85 = arith.constant 8 : index
    %c0_86 = arith.constant 0 : index
    %c0_87 = arith.constant 0 : index
    %139 = vector.load %arg1[%c8_85, %c0_86, %c0_87] : memref<9x64x64xbf16, #tpu.memory_space<vmem>>, vector<1x64x64xbf16>
    %140 = vector.shape_cast %139 : vector<1x64x64xbf16> to vector<64x64xbf16>
    %cst_88 = arith.constant dense<0.000000e+00> : vector<64x64xf32>
    %141 = tpu.matmul %98, %140, %cst_88 {dimension_numbers = #tpu.dot_dimension_numbers<[1], [0], [0], [1], [0, 0, 1, 1], [], []>} : vector<64x64xbf16>, vector<64x64xbf16>, vector<64x64xf32> -> vector<64x64xf32>
    %142 = vector.shape_cast %141 : vector<64x64xf32> to vector<8x8x64xf32>
    %c0_89 = arith.constant 0 : index
    %c64 = arith.constant 64 : index
    %c0_90 = arith.constant 0 : index
    %143 = vector.load %arg9[%c0_89, %c64, %c0_90] : memref<8x72x64xf32, #tpu.memory_space<vmem>>, vector<8x8x64xf32>
    tpu.vector_store %arg9[%c0_89, %c64, %c0_90], %142 {strides = array<i32>} : memref<8x72x64xf32, #tpu.memory_space<vmem>>, vector<8x8x64xf32>,
    %c0_91 = arith.constant 0 : index
    %c0_92 = arith.constant 0 : index
    %c0_93 = arith.constant 0 : index
    %144 = vector.load %arg9[%c0_91, %c0_92, %c0_93] : memref<8x72x64xf32, #tpu.memory_space<vmem>>, vector<8x72x64xf32>
    %145 = arith.truncf %144 : vector<8x72x64xf32> to vector<8x72x64xbf16>
    %cst_94 = arith.constant dense<0.000000e+00> : vector<8x8x64xf32>
    %146 = tpu.matmul %96, %145, %cst_94 {dimension_numbers = #tpu.dot_dimension_numbers<[2], [1], [1], [2], [0, 0, 0, 1, 1, 2], [0], [0]>} : vector<8x8x72xbf16>, vector<8x72x64xbf16>, vector<8x8x64xf32> -> vector<8x8x64xf32>
    %cst_95 = arith.constant 0.000000e+00 : f32
    %147 = vector.broadcast %cst_95 : f32 to vector<8x8x64xf32>
    %148 = arith.maximumf %146, %147 : vector<8x8x64xf32>
    %c0_96 = arith.constant 0 : index
    %c0_97 = arith.constant 0 : index
    %c0_98 = arith.constant 0 : index
    %149 = vector.load %arg5[%c0_96, %c0_97, %c0_98] : memref<8x8x72xbf16, #tpu.memory_space<vmem>>, vector<8x8x72xbf16>
    %150 = vector.shape_cast %148 : vector<8x8x64xf32> to vector<64x64xf32>
    %151 = arith.truncf %150 : vector<64x64xf32> to vector<64x64xbf16>
    %c0_99 = arith.constant 0 : index
    %c0_100 = arith.constant 0 : index
    %c0_101 = arith.constant 0 : index
    %152 = vector.load %arg1[%c0_99, %c0_100, %c0_101] : memref<9x64x64xbf16, #tpu.memory_space<vmem>>, vector<1x64x64xbf16>
    %153 = vector.shape_cast %152 : vector<1x64x64xbf16> to vector<64x64xbf16>
    %cst_102 = arith.constant dense<0.000000e+00> : vector<64x64xf32>
    %154 = tpu.matmul %151, %153, %cst_102 {dimension_numbers = #tpu.dot_dimension_numbers<[1], [0], [0], [1], [0, 0, 1, 1], [], []>} : vector<64x64xbf16>, vector<64x64xbf16>, vector<64x64xf32> -> vector<64x64xf32>
    %155 = vector.shape_cast %154 : vector<64x64xf32> to vector<8x8x64xf32>
    %c0_103 = arith.constant 0 : index
    %c0_104 = arith.constant 0 : index
    %c0_105 = arith.constant 0 : index
    %156 = vector.load %arg9[%c0_103, %c0_104, %c0_105] : memref<8x72x64xf32, #tpu.memory_space<vmem>>, vector<8x8x64xf32>
    tpu.vector_store %arg9[%c0_103, %c0_104, %c0_105], %155 {strides = array<i32>} : memref<8x72x64xf32, #tpu.memory_space<vmem>>, vector<8x8x64xf32>,
    %c1_106 = arith.constant 1 : index
    %c0_107 = arith.constant 0 : index
    %c0_108 = arith.constant 0 : index
    %157 = vector.load %arg1[%c1_106, %c0_107, %c0_108] : memref<9x64x64xbf16, #tpu.memory_space<vmem>>, vector<1x64x64xbf16>
    %158 = vector.shape_cast %157 : vector<1x64x64xbf16> to vector<64x64xbf16>
    %cst_109 = arith.constant dense<0.000000e+00> : vector<64x64xf32>
    %159 = tpu.matmul %151, %158, %cst_109 {dimension_numbers = #tpu.dot_dimension_numbers<[1], [0], [0], [1], [0, 0, 1, 1], [], []>} : vector<64x64xbf16>, vector<64x64xbf16>, vector<64x64xf32> -> vector<64x64xf32>
    %160 = vector.shape_cast %159 : vector<64x64xf32> to vector<8x8x64xf32>
    %c0_110 = arith.constant 0 : index
    %c8_111 = arith.constant 8 : index
    %c0_112 = arith.constant 0 : index
    %161 = vector.load %arg9[%c0_110, %c8_111, %c0_112] : memref<8x72x64xf32, #tpu.memory_space<vmem>>, vector<8x8x64xf32>
    tpu.vector_store %arg9[%c0_110, %c8_111, %c0_112], %160 {strides = array<i32>} : memref<8x72x64xf32, #tpu.memory_space<vmem>>, vector<8x8x64xf32>,
    %c2_113 = arith.constant 2 : index
    %c0_114 = arith.constant 0 : index
    %c0_115 = arith.constant 0 : index
    %162 = vector.load %arg1[%c2_113, %c0_114, %c0_115] : memref<9x64x64xbf16, #tpu.memory_space<vmem>>, vector<1x64x64xbf16>
    %163 = vector.shape_cast %162 : vector<1x64x64xbf16> to vector<64x64xbf16>
    %cst_116 = arith.constant dense<0.000000e+00> : vector<64x64xf32>
    %164 = tpu.matmul %151, %163, %cst_116 {dimension_numbers = #tpu.dot_dimension_numbers<[1], [0], [0], [1], [0, 0, 1, 1], [], []>} : vector<64x64xbf16>, vector<64x64xbf16>, vector<64x64xf32> -> vector<64x64xf32>
    %165 = vector.shape_cast %164 : vector<64x64xf32> to vector<8x8x64xf32>
    %c0_117 = arith.constant 0 : index
    %c16_118 = arith.constant 16 : index
    %c0_119 = arith.constant 0 : index
    %166 = vector.load %arg9[%c0_117, %c16_118, %c0_119] : memref<8x72x64xf32, #tpu.memory_space<vmem>>, vector<8x8x64xf32>
    tpu.vector_store %arg9[%c0_117, %c16_118, %c0_119], %165 {strides = array<i32>} : memref<8x72x64xf32, #tpu.memory_space<vmem>>, vector<8x8x64xf32>,
    %c3_120 = arith.constant 3 : index
    %c0_121 = arith.constant 0 : index
    %c0_122 = arith.constant 0 : index
    %167 = vector.load %arg1[%c3_120, %c0_121, %c0_122] : memref<9x64x64xbf16, #tpu.memory_space<vmem>>, vector<1x64x64xbf16>
    %168 = vector.shape_cast %167 : vector<1x64x64xbf16> to vector<64x64xbf16>
    %cst_123 = arith.constant dense<0.000000e+00> : vector<64x64xf32>
    %169 = tpu.matmul %151, %168, %cst_123 {dimension_numbers = #tpu.dot_dimension_numbers<[1], [0], [0], [1], [0, 0, 1, 1], [], []>} : vector<64x64xbf16>, vector<64x64xbf16>, vector<64x64xf32> -> vector<64x64xf32>
    %170 = vector.shape_cast %169 : vector<64x64xf32> to vector<8x8x64xf32>
    %c0_124 = arith.constant 0 : index
    %c24_125 = arith.constant 24 : index
    %c0_126 = arith.constant 0 : index
    %171 = vector.load %arg9[%c0_124, %c24_125, %c0_126] : memref<8x72x64xf32, #tpu.memory_space<vmem>>, vector<8x8x64xf32>
    tpu.vector_store %arg9[%c0_124, %c24_125, %c0_126], %170 {strides = array<i32>} : memref<8x72x64xf32, #tpu.memory_space<vmem>>, vector<8x8x64xf32>,
    %c4_127 = arith.constant 4 : index
    %c0_128 = arith.constant 0 : index
    %c0_129 = arith.constant 0 : index
    %172 = vector.load %arg1[%c4_127, %c0_128, %c0_129] : memref<9x64x64xbf16, #tpu.memory_space<vmem>>, vector<1x64x64xbf16>
    %173 = vector.shape_cast %172 : vector<1x64x64xbf16> to vector<64x64xbf16>
    %cst_130 = arith.constant dense<0.000000e+00> : vector<64x64xf32>
    %174 = tpu.matmul %151, %173, %cst_130 {dimension_numbers = #tpu.dot_dimension_numbers<[1], [0], [0], [1], [0, 0, 1, 1], [], []>} : vector<64x64xbf16>, vector<64x64xbf16>, vector<64x64xf32> -> vector<64x64xf32>
    %175 = vector.shape_cast %174 : vector<64x64xf32> to vector<8x8x64xf32>
    %c0_131 = arith.constant 0 : index
    %c32_132 = arith.constant 32 : index
    %c0_133 = arith.constant 0 : index
    %176 = vector.load %arg9[%c0_131, %c32_132, %c0_133] : memref<8x72x64xf32, #tpu.memory_space<vmem>>, vector<8x8x64xf32>
    tpu.vector_store %arg9[%c0_131, %c32_132, %c0_133], %175 {strides = array<i32>} : memref<8x72x64xf32, #tpu.memory_space<vmem>>, vector<8x8x64xf32>,
    %c5_134 = arith.constant 5 : index
    %c0_135 = arith.constant 0 : index
    %c0_136 = arith.constant 0 : index
    %177 = vector.load %arg1[%c5_134, %c0_135, %c0_136] : memref<9x64x64xbf16, #tpu.memory_space<vmem>>, vector<1x64x64xbf16>
    %178 = vector.shape_cast %177 : vector<1x64x64xbf16> to vector<64x64xbf16>
    %cst_137 = arith.constant dense<0.000000e+00> : vector<64x64xf32>
    %179 = tpu.matmul %151, %178, %cst_137 {dimension_numbers = #tpu.dot_dimension_numbers<[1], [0], [0], [1], [0, 0, 1, 1], [], []>} : vector<64x64xbf16>, vector<64x64xbf16>, vector<64x64xf32> -> vector<64x64xf32>
    %180 = vector.shape_cast %179 : vector<64x64xf32> to vector<8x8x64xf32>
    %c0_138 = arith.constant 0 : index
    %c40_139 = arith.constant 40 : index
    %c0_140 = arith.constant 0 : index
    %181 = vector.load %arg9[%c0_138, %c40_139, %c0_140] : memref<8x72x64xf32, #tpu.memory_space<vmem>>, vector<8x8x64xf32>
    tpu.vector_store %arg9[%c0_138, %c40_139, %c0_140], %180 {strides = array<i32>} : memref<8x72x64xf32, #tpu.memory_space<vmem>>, vector<8x8x64xf32>,
    %c6_141 = arith.constant 6 : index
    %c0_142 = arith.constant 0 : index
    %c0_143 = arith.constant 0 : index
    %182 = vector.load %arg1[%c6_141, %c0_142, %c0_143] : memref<9x64x64xbf16, #tpu.memory_space<vmem>>, vector<1x64x64xbf16>
    %183 = vector.shape_cast %182 : vector<1x64x64xbf16> to vector<64x64xbf16>
    %cst_144 = arith.constant dense<0.000000e+00> : vector<64x64xf32>
    %184 = tpu.matmul %151, %183, %cst_144 {dimension_numbers = #tpu.dot_dimension_numbers<[1], [0], [0], [1], [0, 0, 1, 1], [], []>} : vector<64x64xbf16>, vector<64x64xbf16>, vector<64x64xf32> -> vector<64x64xf32>
    %185 = vector.shape_cast %184 : vector<64x64xf32> to vector<8x8x64xf32>
    %c0_145 = arith.constant 0 : index
    %c48_146 = arith.constant 48 : index
    %c0_147 = arith.constant 0 : index
    %186 = vector.load %arg9[%c0_145, %c48_146, %c0_147] : memref<8x72x64xf32, #tpu.memory_space<vmem>>, vector<8x8x64xf32>
    tpu.vector_store %arg9[%c0_145, %c48_146, %c0_147], %185 {strides = array<i32>} : memref<8x72x64xf32, #tpu.memory_space<vmem>>, vector<8x8x64xf32>,
    %c7_148 = arith.constant 7 : index
    %c0_149 = arith.constant 0 : index
    %c0_150 = arith.constant 0 : index
    %187 = vector.load %arg1[%c7_148, %c0_149, %c0_150] : memref<9x64x64xbf16, #tpu.memory_space<vmem>>, vector<1x64x64xbf16>
    %188 = vector.shape_cast %187 : vector<1x64x64xbf16> to vector<64x64xbf16>
    %cst_151 = arith.constant dense<0.000000e+00> : vector<64x64xf32>
    %189 = tpu.matmul %151, %188, %cst_151 {dimension_numbers = #tpu.dot_dimension_numbers<[1], [0], [0], [1], [0, 0, 1, 1], [], []>} : vector<64x64xbf16>, vector<64x64xbf16>, vector<64x64xf32> -> vector<64x64xf32>
    %190 = vector.shape_cast %189 : vector<64x64xf32> to vector<8x8x64xf32>
    %c0_152 = arith.constant 0 : index
    %c56_153 = arith.constant 56 : index
    %c0_154 = arith.constant 0 : index
    %191 = vector.load %arg9[%c0_152, %c56_153, %c0_154] : memref<8x72x64xf32, #tpu.memory_space<vmem>>, vector<8x8x64xf32>
    tpu.vector_store %arg9[%c0_152, %c56_153, %c0_154], %190 {strides = array<i32>} : memref<8x72x64xf32, #tpu.memory_space<vmem>>, vector<8x8x64xf32>,
    %c8_155 = arith.constant 8 : index
    %c0_156 = arith.constant 0 : index
    %c0_157 = arith.constant 0 : index
    %192 = vector.load %arg1[%c8_155, %c0_156, %c0_157] : memref<9x64x64xbf16, #tpu.memory_space<vmem>>, vector<1x64x64xbf16>
    %193 = vector.shape_cast %192 : vector<1x64x64xbf16> to vector<64x64xbf16>
    %cst_158 = arith.constant dense<0.000000e+00> : vector<64x64xf32>
    %194 = tpu.matmul %151, %193, %cst_158 {dimension_numbers = #tpu.dot_dimension_numbers<[1], [0], [0], [1], [0, 0, 1, 1], [], []>} : vector<64x64xbf16>, vector<64x64xbf16>, vector<64x64xf32> -> vector<64x64xf32>
    %195 = vector.shape_cast %194 : vector<64x64xf32> to vector<8x8x64xf32>
    %c0_159 = arith.constant 0 : index
    %c64_160 = arith.constant 64 : index
    %c0_161 = arith.constant 0 : index
    %196 = vector.load %arg9[%c0_159, %c64_160, %c0_161] : memref<8x72x64xf32, #tpu.memory_space<vmem>>, vector<8x8x64xf32>
    tpu.vector_store %arg9[%c0_159, %c64_160, %c0_161], %195 {strides = array<i32>} : memref<8x72x64xf32, #tpu.memory_space<vmem>>, vector<8x8x64xf32>,
    %c0_162 = arith.constant 0 : index
    %c0_163 = arith.constant 0 : index
    %c0_164 = arith.constant 0 : index
    %197 = vector.load %arg9[%c0_162, %c0_163, %c0_164] : memref<8x72x64xf32, #tpu.memory_space<vmem>>, vector<8x72x64xf32>
    %198 = arith.truncf %197 : vector<8x72x64xf32> to vector<8x72x64xbf16>
    %cst_165 = arith.constant dense<0.000000e+00> : vector<8x8x64xf32>
    %199 = tpu.matmul %149, %198, %cst_165 {dimension_numbers = #tpu.dot_dimension_numbers<[2], [1], [1], [2], [0, 0, 0, 1, 1, 2], [0], [0]>} : vector<8x8x72xbf16>, vector<8x72x64xbf16>, vector<8x8x64xf32> -> vector<8x8x64xf32>
    %cst_166 = arith.constant 0.000000e+00 : f32
    %200 = vector.broadcast %cst_166 : f32 to vector<8x8x64xf32>
    %201 = arith.maximumf %199, %200 : vector<8x8x64xf32>
    %cst_167 = arith.constant 0.000000e+00 : f32
    %202 = vector.broadcast %cst_167 : f32 to vector<8x32xf32>
    %c0_168 = arith.constant 0 : index
    %c0_169 = arith.constant 0 : index
    %203 = vector.load %arg7[%c0_168, %c0_169] : memref<1x32xf32, #tpu.memory_space<vmem>>, vector<1x32xf32>
    %204 = vector.broadcast %203 : vector<1x32xf32> to vector<8x32xf32>
    %205 = arith.addf %202, %204 : vector<8x32xf32>
    %206 = vector.extract_strided_slice %201 {offsets = [0, 0, 0], sizes = [8, 1, 64], strides = [1, 1, 1]} : vector<8x8x64xf32> to vector<8x1x64xf32>
    %207 = vector.shape_cast %206 : vector<8x1x64xf32> to vector<8x64xf32>
    %208 = arith.truncf %207 : vector<8x64xf32> to vector<8x64xbf16>
    %c0_170 = arith.constant 0 : index
    %c0_171 = arith.constant 0 : index
    %c0_172 = arith.constant 0 : index
    %209 = vector.load %arg6[%c0_170, %c0_171, %c0_172] : memref<8x64x32xbf16, #tpu.memory_space<vmem>>, vector<1x64x32xbf16>
    %210 = vector.shape_cast %209 : vector<1x64x32xbf16> to vector<64x32xbf16>
    %cst_173 = arith.constant dense<0.000000e+00> : vector<8x32xf32>
    %211 = tpu.matmul %208, %210, %cst_173 {dimension_numbers = #tpu.dot_dimension_numbers<[1], [0], [0], [1], [0, 0, 1, 1], [], []>} : vector<8x64xbf16>, vector<64x32xbf16>, vector<8x32xf32> -> vector<8x32xf32>
    %212 = arith.addf %205, %211 : vector<8x32xf32>
    %213 = vector.extract_strided_slice %201 {offsets = [0, 1, 0], sizes = [8, 1, 64], strides = [1, 1, 1]} : vector<8x8x64xf32> to vector<8x1x64xf32>
    %214 = vector.shape_cast %213 : vector<8x1x64xf32> to vector<8x64xf32>
    %215 = arith.truncf %214 : vector<8x64xf32> to vector<8x64xbf16>
    %c1_174 = arith.constant 1 : index
    %c0_175 = arith.constant 0 : index
    %c0_176 = arith.constant 0 : index
    %216 = vector.load %arg6[%c1_174, %c0_175, %c0_176] : memref<8x64x32xbf16, #tpu.memory_space<vmem>>, vector<1x64x32xbf16>
    %217 = vector.shape_cast %216 : vector<1x64x32xbf16> to vector<64x32xbf16>
    %cst_177 = arith.constant dense<0.000000e+00> : vector<8x32xf32>
    %218 = tpu.matmul %215, %217, %cst_177 {dimension_numbers = #tpu.dot_dimension_numbers<[1], [0], [0], [1], [0, 0, 1, 1], [], []>} : vector<8x64xbf16>, vector<64x32xbf16>, vector<8x32xf32> -> vector<8x32xf32>
    %219 = arith.addf %212, %218 : vector<8x32xf32>
    %220 = vector.extract_strided_slice %201 {offsets = [0, 2, 0], sizes = [8, 1, 64], strides = [1, 1, 1]} : vector<8x8x64xf32> to vector<8x1x64xf32>
    %221 = vector.shape_cast %220 : vector<8x1x64xf32> to vector<8x64xf32>
    %222 = arith.truncf %221 : vector<8x64xf32> to vector<8x64xbf16>
    %c2_178 = arith.constant 2 : index
    %c0_179 = arith.constant 0 : index
    %c0_180 = arith.constant 0 : index
    %223 = vector.load %arg6[%c2_178, %c0_179, %c0_180] : memref<8x64x32xbf16, #tpu.memory_space<vmem>>, vector<1x64x32xbf16>
    %224 = vector.shape_cast %223 : vector<1x64x32xbf16> to vector<64x32xbf16>
    %cst_181 = arith.constant dense<0.000000e+00> : vector<8x32xf32>
    %225 = tpu.matmul %222, %224, %cst_181 {dimension_numbers = #tpu.dot_dimension_numbers<[1], [0], [0], [1], [0, 0, 1, 1], [], []>} : vector<8x64xbf16>, vector<64x32xbf16>, vector<8x32xf32> -> vector<8x32xf32>
    %226 = arith.addf %219, %225 : vector<8x32xf32>
    %227 = vector.extract_strided_slice %201 {offsets = [0, 3, 0], sizes = [8, 1, 64], strides = [1, 1, 1]} : vector<8x8x64xf32> to vector<8x1x64xf32>
    %228 = vector.shape_cast %227 : vector<8x1x64xf32> to vector<8x64xf32>
    %229 = arith.truncf %228 : vector<8x64xf32> to vector<8x64xbf16>
    %c3_182 = arith.constant 3 : index
    %c0_183 = arith.constant 0 : index
    %c0_184 = arith.constant 0 : index
    %230 = vector.load %arg6[%c3_182, %c0_183, %c0_184] : memref<8x64x32xbf16, #tpu.memory_space<vmem>>, vector<1x64x32xbf16>
    %231 = vector.shape_cast %230 : vector<1x64x32xbf16> to vector<64x32xbf16>
    %cst_185 = arith.constant dense<0.000000e+00> : vector<8x32xf32>
    %232 = tpu.matmul %229, %231, %cst_185 {dimension_numbers = #tpu.dot_dimension_numbers<[1], [0], [0], [1], [0, 0, 1, 1], [], []>} : vector<8x64xbf16>, vector<64x32xbf16>, vector<8x32xf32> -> vector<8x32xf32>
    %233 = arith.addf %226, %232 : vector<8x32xf32>
    %234 = vector.extract_strided_slice %201 {offsets = [0, 4, 0], sizes = [8, 1, 64], strides = [1, 1, 1]} : vector<8x8x64xf32> to vector<8x1x64xf32>
    %235 = vector.shape_cast %234 : vector<8x1x64xf32> to vector<8x64xf32>
    %236 = arith.truncf %235 : vector<8x64xf32> to vector<8x64xbf16>
    %c4_186 = arith.constant 4 : index
    %c0_187 = arith.constant 0 : index
    %c0_188 = arith.constant 0 : index
    %237 = vector.load %arg6[%c4_186, %c0_187, %c0_188] : memref<8x64x32xbf16, #tpu.memory_space<vmem>>, vector<1x64x32xbf16>
    %238 = vector.shape_cast %237 : vector<1x64x32xbf16> to vector<64x32xbf16>
    %cst_189 = arith.constant dense<0.000000e+00> : vector<8x32xf32>
    %239 = tpu.matmul %236, %238, %cst_189 {dimension_numbers = #tpu.dot_dimension_numbers<[1], [0], [0], [1], [0, 0, 1, 1], [], []>} : vector<8x64xbf16>, vector<64x32xbf16>, vector<8x32xf32> -> vector<8x32xf32>
    %240 = arith.addf %233, %239 : vector<8x32xf32>
    %241 = vector.extract_strided_slice %201 {offsets = [0, 5, 0], sizes = [8, 1, 64], strides = [1, 1, 1]} : vector<8x8x64xf32> to vector<8x1x64xf32>
    %242 = vector.shape_cast %241 : vector<8x1x64xf32> to vector<8x64xf32>
    %243 = arith.truncf %242 : vector<8x64xf32> to vector<8x64xbf16>
    %c5_190 = arith.constant 5 : index
    %c0_191 = arith.constant 0 : index
    %c0_192 = arith.constant 0 : index
    %244 = vector.load %arg6[%c5_190, %c0_191, %c0_192] : memref<8x64x32xbf16, #tpu.memory_space<vmem>>, vector<1x64x32xbf16>
    %245 = vector.shape_cast %244 : vector<1x64x32xbf16> to vector<64x32xbf16>
    %cst_193 = arith.constant dense<0.000000e+00> : vector<8x32xf32>
    %246 = tpu.matmul %243, %245, %cst_193 {dimension_numbers = #tpu.dot_dimension_numbers<[1], [0], [0], [1], [0, 0, 1, 1], [], []>} : vector<8x64xbf16>, vector<64x32xbf16>, vector<8x32xf32> -> vector<8x32xf32>
    %247 = arith.addf %240, %246 : vector<8x32xf32>
    %248 = vector.extract_strided_slice %201 {offsets = [0, 6, 0], sizes = [8, 1, 64], strides = [1, 1, 1]} : vector<8x8x64xf32> to vector<8x1x64xf32>
    %249 = vector.shape_cast %248 : vector<8x1x64xf32> to vector<8x64xf32>
    %250 = arith.truncf %249 : vector<8x64xf32> to vector<8x64xbf16>
    %c6_194 = arith.constant 6 : index
    %c0_195 = arith.constant 0 : index
    %c0_196 = arith.constant 0 : index
    %251 = vector.load %arg6[%c6_194, %c0_195, %c0_196] : memref<8x64x32xbf16, #tpu.memory_space<vmem>>, vector<1x64x32xbf16>
    %252 = vector.shape_cast %251 : vector<1x64x32xbf16> to vector<64x32xbf16>
    %cst_197 = arith.constant dense<0.000000e+00> : vector<8x32xf32>
    %253 = tpu.matmul %250, %252, %cst_197 {dimension_numbers = #tpu.dot_dimension_numbers<[1], [0], [0], [1], [0, 0, 1, 1], [], []>} : vector<8x64xbf16>, vector<64x32xbf16>, vector<8x32xf32> -> vector<8x32xf32>
    %254 = arith.addf %247, %253 : vector<8x32xf32>
    %255 = vector.extract_strided_slice %201 {offsets = [0, 7, 0], sizes = [8, 1, 64], strides = [1, 1, 1]} : vector<8x8x64xf32> to vector<8x1x64xf32>
    %256 = vector.shape_cast %255 : vector<8x1x64xf32> to vector<8x64xf32>
    %257 = arith.truncf %256 : vector<8x64xf32> to vector<8x64xbf16>
    %c7_198 = arith.constant 7 : index
    %c0_199 = arith.constant 0 : index
    %c0_200 = arith.constant 0 : index
    %258 = vector.load %arg6[%c7_198, %c0_199, %c0_200] : memref<8x64x32xbf16, #tpu.memory_space<vmem>>, vector<1x64x32xbf16>
    %259 = vector.shape_cast %258 : vector<1x64x32xbf16> to vector<64x32xbf16>
    %cst_201 = arith.constant dense<0.000000e+00> : vector<8x32xf32>
    %260 = tpu.matmul %257, %259, %cst_201 {dimension_numbers = #tpu.dot_dimension_numbers<[1], [0], [0], [1], [0, 0, 1, 1], [], []>} : vector<8x64xbf16>, vector<64x32xbf16>, vector<8x32xf32> -> vector<8x32xf32>
    %261 = arith.addf %254, %260 : vector<8x32xf32>
    %cst_202 = arith.constant 0.000000e+00 : f32
    %262 = vector.broadcast %cst_202 : f32 to vector<8x32xf32>
    %263 = arith.maximumf %261, %262 : vector<8x32xf32>
    %c0_203 = arith.constant 0 : index
    %c0_204 = arith.constant 0 : index
    %264 = vector.load %arg8[%c0_203, %c0_204] : memref<8x32xf32, #tpu.memory_space<vmem>>, vector<8x32xf32>
    tpu.vector_store %arg8[%c0_203, %c0_204], %263 {strides = array<i32>} : memref<8x32xf32, #tpu.memory_space<vmem>>, vector<8x32xf32>,
    return
  }
  func.func @transform_0(%arg0: i32) -> (i32, i32, i32) {
    %c0_i32 = arith.constant 0 : i32
    %c0_i32_0 = arith.constant 0 : i32
    %c0_i32_1 = arith.constant 0 : i32
    %c0_i32_2 = arith.constant 0 : i32
    return %c0_i32, %c0_i32_0, %c0_i32_1 : i32, i32, i32
  }
  func.func @transform_1(%arg0: i32) -> (i32, i32) {
    %c0_i32 = arith.constant 0 : i32
    %c0_i32_0 = arith.constant 0 : i32
    return %arg0, %c0_i32 : i32, i32
  }
  func.func @transform_2(%arg0: i32) -> (i32, i32) {
    %c0_i32 = arith.constant 0 : i32
    %c0_i32_0 = arith.constant 0 : i32
    return %arg0, %c0_i32 : i32, i32
  }
  func.func @transform_3(%arg0: i32) -> (i32, i32, i32) {
    %c0_i32 = arith.constant 0 : i32
    %c0_i32_0 = arith.constant 0 : i32
    %c0_i32_1 = arith.constant 0 : i32
    return %arg0, %c0_i32, %c0_i32_0 : i32, i32, i32
  }
  func.func @transform_4(%arg0: i32) -> (i32, i32, i32) {
    %c0_i32 = arith.constant 0 : i32
    %c0_i32_0 = arith.constant 0 : i32
    %c0_i32_1 = arith.constant 0 : i32
    return %arg0, %c0_i32, %c0_i32_0 : i32, i32, i32
  }
  func.func @transform_5(%arg0: i32) -> (i32, i32, i32) {
    %c0_i32 = arith.constant 0 : i32
    %c0_i32_0 = arith.constant 0 : i32
    %c0_i32_1 = arith.constant 0 : i32
    %c0_i32_2 = arith.constant 0 : i32
    return %c0_i32, %c0_i32_0, %c0_i32_1 : i32, i32, i32
  }
  func.func @transform_6(%arg0: i32) -> (i32, i32) {
    %c0_i32 = arith.constant 0 : i32
    %c0_i32_0 = arith.constant 0 : i32
    %c0_i32_1 = arith.constant 0 : i32
    return %c0_i32, %c0_i32_0 : i32, i32
  }
  func.func @transform_7(%arg0: i32) -> (i32, i32) {
    %c0_i32 = arith.constant 0 : i32
    %c0_i32_0 = arith.constant 0 : i32
    return %arg0, %c0_i32 : i32, i32
  }
}

</mosaic_0001>

<bundles_post_ra>
// kernel: tpu_custom_call.1
= control target key start
LH: loop header
LB: loop body
LE: loop exit
PB: predicated region body
PF: predicated region fallthrough
CT: control target
= control target key end

     0   :  { %v81_v3 = vlaneseq  ;;  %s6606_s0 = inlined_call_operand.vmem [shape: bf16[9,64,64], index: 0, kind: input, shape index: {}]   ;;  %s6607_s1 = inlined_call_operand.vmem [shape: f32[8,64], index: 1, kind: input, shape index: {}]   ;;  %s6608_s2 = inlined_call_operand.vmem [shape: f32[8,72], index: 2, kind: input, shape index: {}]   ;;  %s6609_s3 = inlined_call_operand.vmem [shape: bf16[8,8,72], index: 3, kind: input, shape index: {}]   ;;  %s6610_s4 = inlined_call_operand.vmem [shape: bf16[8,8,72], index: 4, kind: input, shape index: {}]   ;;  %s6611_s5 = inlined_call_operand.vmem [shape: bf16[8,64,32], index: 5, kind: input, shape index: {}]   ;;  %s6612_s6 = inlined_call_operand.vmem [shape: f32[1,32], index: 6, kind: input, shape index: {}]   ;;  %s6613_s7 = inlined_call_operand.hbm [shape: f32[8,32], index: 7, kind: output, shape index: {}]  }
   0x1   :  { %v5301_v0 = vld [vmem:[%s6606_s0 + $0x18] sm:$0xff]  ;;  %v5318_v6 = vld [vmem:[%s6606_s0 + $0x10] sm:$0xff]  ;;  %v5345_v13 = vld [vmem:[%s6606_s0 + $0x8] sm:$0xff] }
   0x2   :  { %v5034_v1 = vld [vmem:[%s6606_s0 + $0x38] sm:$0xff]  ;;  %71 = vmatpush.bf16.msra.mxu0 %v5301_v0  ;;  %v5313_v5 = vshrl.u32 %v81_v3, 7  ;;  %v5033_v10 = vld [vmem:[%s6606_s0 + $0x30] sm:$0xff]  ;;  %v5350_v14 = vld [vmem:[%s6608_s2] sm:$0xff] }
   0x3   :  { %v5038_v2 = vld [vmem:[%s6606_s0 + $0x58] sm:$0xff]  ;;  %213 = vmatpush.bf16.msra.mxu1 %v5034_v1  ;;  %v5037_v11 = vld [vmem:[%s6606_s0 + $0x50] sm:$0xff]  ;;  %v5032_v15 = vld [vmem:[%s6606_s0 + $0x28] sm:$0xff]  ;;  %v5362_v18 = vperm.slane %v5350_v14, 0 }
   0x4   :  { %v5042_v4 = vld [vmem:[%s6606_s0 + $0x78] sm:$0xff]  ;;  %347 = vmatpush.bf16.msra.mxu2 %v5038_v2  ;;  %v5321_v7 = vadd.s32 24, %v5313_v5  ;;  %v5324_v8 = vadd.s32 16, %v5313_v5  ;;  %v5327_v9 = vadd.s32 8, %v5313_v5  ;;  %v5041_v12 = vld [vmem:[%s6606_s0 + $0x70] sm:$0xff]  ;;  %v5036_v16 = vld [vmem:[%s6606_s0 + $0x48] sm:$0xff] }
   0x5   :  { %481 = vmatpush.bf16.msra.mxu3 %v5042_v4  ;;  %v5040_v17 = vld [vmem:[%s6606_s0 + $0x68] sm:$0xff] }
   0x6   :  { %5166 = vset.pattern.permute.xlu0 %v5321_v7  ;;  %5165 = vset.pattern.permute.xlu2 %v5324_v8 }
   0x7   :  { %5164 = vset.pattern.permute.xlu1 %v5327_v9  ;;  %72 = vmatpush.bf16.msra.mxu0 %v5318_v6 }
   0x8   :  { %214 = vmatpush.bf16.msra.mxu1 %v5033_v10  ;;  %348 = vmatpush.bf16.msra.mxu2 %v5037_v11 }
   0x9   :  { %482 = vmatpush.bf16.msra.mxu3 %v5041_v12 }
   0xa   :  { %12 = vsyncpa [#allocation4], 0  ;;  %v5368_v19 = vld [vmem:[%s6606_s0] sm:$0xff]  ;;  %v5046_v24 = vld [vmem:[%s6606_s0 + $0x98] sm:$0xff]  ;;  %vm63_vm0 = vcmask 523264   ;;  %v5406_v30 = vadd.s32 64, %v5313_v5 }
   0xb   :  { %73 = vmatpush.bf16.msra.mxu0 %v5345_v13  ;;  %v28_v20 = vld [vmem:[%s6607_s1] sm:$0xff]  ;;  %v5050_v26 = vld [vmem:[%s6606_s0 + $0xb8] sm:$0xff]  ;;  %v5045_v28 = vld [vmem:[%s6606_s0 + $0x90] sm:$0xff]  ;;  %v5409_v31 = vperm.slane %v5350_v14, 1  ;;  %v5445_v40 = vadd.s32 32, %v5313_v5  ;;  %v5486_v48 = vperm.slane %v5350_v14, 2 }
   0xc   :  { %215 = vmatpush.bf16.msra.mxu1 %v5032_v15  ;;  %349 = vmatpush.bf16.msra.mxu2 %v5036_v16  ;;  %v5031_v21 = vld [vmem:[%s6606_s0 + $0x20] sm:$0xff]  ;;  %v5387_v25 = vpack.c.bf16 %v28_v20, %v28_v20  ;;  %v5054_v27 = vld [vmem:[%s6606_s0 + $0xd8] sm:$0xff]  ;;  %v5049_v32 = vld [vmem:[%s6606_s0 + $0xb0] sm:$0xff]  ;;  %v5489_v49 = vadd.s32 40, %v5313_v5  ;;  %v5496_v50 = vadd.s32 48, %v5313_v5  ;;  %v5504_v51 = vperm.slane %v5350_v14, 3 }
   0xd   :  { %v5035_v22 = vld [vmem:[%s6606_s0 + $0x40] sm:$0xff]  ;;  %483 = vmatpush.bf16.msra.mxu3 %v5040_v17  ;;  %v5058_v29 = vld [vmem:[%s6606_s0 + $0xf8] sm:$0xff]  ;;  %v5053_v33 = vld [vmem:[%s6606_s0 + $0xd0] sm:$0xff]  ;;  %v5513_v52 = vadd.s32 56, %v5313_v5  ;;  %v5522_v53 = vperm.slane %v5350_v14, 4  ;;  %v5531_v54 = vperm.slane %v5350_v14, 5 }
   0xe   :  { %v5039_v23 = vld [vmem:[%s6606_s0 + $0x60] sm:$0xff]  ;;  %494 = vperm.xlu0 %5166, %v5362_v18   ;;  %360 = vperm.xlu2 %5165, %v5362_v18   ;;  %v5044_v34 = vld [vmem:[%s6606_s0 + $0x88] sm:$0xff]  ;;  %v5057_v36 = vld [vmem:[%s6606_s0 + $0xf0] sm:$0xff]  ;;  %vm2044_vm1 = vcmask 1043456   ;;  %vm2040_vm2 = vcmask 588800   ;;  %vm3594_vm3 = vcmask 1041409  }
   0xf   :  { %226 = vperm.xlu1 %5164, %v5362_v18   ;;  %74 = vmatpush.bf16.msra.mxu0 %v5368_v19  ;;  %v5048_v35 = vld [vmem:[%s6606_s0 + $0xa8] sm:$0xff]  ;;  %v5043_v38 = vld [vmem:[%s6606_s0 + $0x80] sm:$0xff]  ;;  %v5062_v44 = vld [vmem:[%s6606_s0 + $0x118] sm:$0xff]  ;;  %vm3597_vm4 = vcmask 1042434   ;;  %vm3600_vm5 = vcmask 1043459   ;;  %vm3603_vm6 = vcmask 1044484  }
  0x10   :  { %216 = vmatpush.bf16.msra.mxu1 %v5031_v21  ;;  %350 = vmatpush.bf16.msra.mxu2 %v5035_v22  ;;  %v5052_v37 = vld [vmem:[%s6606_s0 + $0xc8] sm:$0xff]  ;;  %v5047_v41 = vld [vmem:[%s6606_s0 + $0xa0] sm:$0xff]  ;;  %v5061_v45 = vld [vmem:[%s6606_s0 + $0x110] sm:$0xff]  ;;  %vm3606_vm7 = vcmask 1045509   ;;  %vm3609_vm8 = vcmask 1046534   ;;  %vm3612_vm9 = vcmask 1047559  }
  0x11   :  { %484 = vmatpush.bf16.msra.mxu3 %v5039_v23  ;;  %v5056_v39 = vld [vmem:[%s6606_s0 + $0xe8] sm:$0xff]  ;;  %v5051_v42 = vld [vmem:[%s6606_s0 + $0xc0] sm:$0xff]  ;;  %v5066_v22 = vld [vmem:[%s6606_s0 + $0x38] sm:$0xff]  ;;  %vm4112_vm10 = vcmask 261120  }
  0x12   :  { %4146 = vmatmul.msk.bf16.vlgmr.msra.gmra.mxu0 %vm63_vm0, %v5387_v25  ;;  %v5055_v43 = vld [vmem:[%s6606_s0 + $0xe0] sm:$0xff]  ;;  %v5060_v46 = vld [vmem:[%s6606_s0 + $0x108] sm:$0xff]  ;;  %v5070_v23 = vld [vmem:[%s6606_s0 + $0x58] sm:$0xff] }
  0x13   :  { %615 = vmatpush.bf16.msrb.mxu0 %v5046_v24  ;;  %4171 = vmatmul.msk.bf16.vlgmr.msra.gmra.mxu1 %vm63_vm0, %v5387_v25  ;;  %v5059_v47 = vld [vmem:[%s6606_s0 + $0x100] sm:$0xff]  ;;  %v5074_v24 = vld [vmem:[%s6606_s0 + $0x78] sm:$0xff] }
  0x14   :  { %749 = vmatpush.bf16.msrb.mxu1 %v5050_v26  ;;  %4196 = vmatmul.msk.bf16.vlgmr.msra.gmra.mxu2 %vm63_vm0, %v5387_v25 }
  0x15   :  { %4221 = vmatmul.msk.bf16.vlgmr.msra.gmra.mxu3 %vm63_vm0, %v5387_v25  ;;  %883 = vmatpush.bf16.msrb.mxu2 %v5054_v27 }
  0x16   :  { %1017 = vmatpush.bf16.msrb.mxu3 %v5058_v29  ;;  %5175 = vset.pattern.permute.xlu0 %v5406_v30 }
  0x17   :  { %616 = vmatpush.bf16.msrb.mxu0 %v5045_v28  ;;  %366 = vperm.xlu2 %5165, %v5409_v31  }
  0x18   :  { %232 = vperm.xlu1 %5164, %v5409_v31   ;;  %750 = vmatpush.bf16.msrb.mxu1 %v5049_v32  ;;  %v5069_v32 = vld [vmem:[%s6606_s0 + $0x50] sm:$0xff] }
  0x19   :  { %884 = vmatpush.bf16.msrb.mxu2 %v5053_v33  ;;  %v5073_v33 = vld [vmem:[%s6606_s0 + $0x70] sm:$0xff] }
  0x1a   :  { %1018 = vmatpush.bf16.msrb.mxu3 %v5057_v36 }
  0x1b   :  { %617 = vmatpush.bf16.msrb.mxu0 %v5044_v34 }
  0x1c   :  { %751 = vmatpush.bf16.msrb.mxu1 %v5048_v35 }
  0x1d   :  { %885 = vmatpush.bf16.msrb.mxu2 %v5052_v37 }
  0x1e   :  { %1019 = vmatpush.bf16.msrb.mxu3 %v5056_v39  ;;  %1164 = vperm.xlu0 %5175, %v5362_v18   ;;  %v5068_v39 = vld [vmem:[%s6606_s0 + $0x48] sm:$0xff] }
  0x1f   :  { %618 = vmatpush.bf16.msrb.mxu0 %v5043_v38  ;;  %5168 = vset.pattern.permute.xlu2 %v5445_v40  ;;  %v5064_v38 = vld [vmem:[%s6606_s0 + $0x28] sm:$0xff] }
  0x20   :  { %5167 = vset.pattern.permute.xlu1 %v5321_v7  ;;  %752 = vmatpush.bf16.msrb.mxu1 %v5047_v41  ;;  %v5072_v41 = vld [vmem:[%s6606_s0 + $0x68] sm:$0xff] }
  0x21   :  { %886 = vmatpush.bf16.msrb.mxu2 %v5051_v42 }
  0x22   :  { %1020 = vmatpush.bf16.msrb.mxu3 %v5055_v43  ;;  %4246 = vmatmul.msk.bf16.vlgmr.msrb.gmra.mxu0 %vm63_vm0, %v5387_v25 }
  0x23   :  { %1151 = vmatpush.bf16.msra.mxu0 %v5062_v44  ;;  %4271 = vmatmul.msk.bf16.vlgmr.msrb.gmra.mxu1 %vm63_vm0, %v5387_v25 }
  0x24   :  { %1284 = vmatpush.bf16.msra.mxu1 %v5301_v0  ;;  %4296 = vmatmul.msk.bf16.vlgmr.msrb.gmra.mxu2 %vm63_vm0, %v5387_v25 }
  0x25   :  { %4321 = vmatmul.msk.bf16.vlgmr.msrb.gmra.mxu3 %vm63_vm0, %v5387_v25  ;;  %1353 = vmatpush.bf16.msra.mxu2 %v5066_v22 }
  0x26   :  { %5184 = vset.pattern.permute.xlu0 %v5445_v40  ;;  %1422 = vmatpush.bf16.msra.mxu3 %v5070_v23 }
  0x27   :  { %1152 = vmatpush.bf16.msra.mxu0 %v5061_v45  ;;  %628 = vperm.xlu2 %5168, %v5362_v18  }
  0x28   :  { %1285 = vmatpush.bf16.msra.mxu1 %v5318_v6  ;;  %500 = vperm.xlu1 %5167, %v5409_v31  }
  0x2a   :  { %1423 = vmatpush.bf16.msra.mxu3 %v5069_v32 }
  0x2b   :  { %1153 = vmatpush.bf16.msra.mxu0 %v5060_v46 }
  0x2c   :  { %1286 = vmatpush.bf16.msra.mxu1 %v5345_v13 }
  0x2e   :  { %640 = vperm.xlu0 %5184, %v5486_v48   ;;  %1424 = vmatpush.bf16.msra.mxu3 %v5068_v39 }
  0x2f   :  { %1154 = vmatpush.bf16.msra.mxu0 %v5059_v47  ;;  %5170 = vset.pattern.permute.xlu2 %v5489_v49 }
  0x30   :  { %1287 = vmatpush.bf16.msra.mxu1 %v5368_v19  ;;  %5169 = vset.pattern.permute.xlu1 %v5445_v40 }
  0x32   :  { %4346 = vmatmul.msk.bf16.vlgmr.msra.gmra.mxu0 %vm63_vm0, %v5387_v25 }
  0x33   :  { %1491 = vmatpush.bf16.msrb.mxu0 %v5074_v24 }
  0x36   :  { %5189 = vset.pattern.permute.xlu0 %v5496_v50 }
  0x37   :  { %762 = vperm.xlu2 %5170, %v5362_v18   ;;  %1492 = vmatpush.bf16.msrb.mxu0 %v5073_v33 }
  0x38   :  { %634 = vperm.xlu1 %5169, %v5409_v31  }
  0x3b   :  { %1493 = vmatpush.bf16.msrb.mxu0 %v5072_v41 }
  0x3e   :  { %914 = vperm.xlu0 %5189, %v5504_v51  }
  0x3f   :  { %5172 = vset.pattern.permute.xlu2 %v5496_v50 }
  0x40   :  { %5171 = vset.pattern.permute.xlu1 %v5496_v50 }
  0x46   :  { %5190 = vset.pattern.permute.xlu0 %v5313_v5 }
  0x47   :  { %902 = vperm.xlu2 %5172, %v5409_v31  }
  0x48   :  { %896 = vperm.xlu1 %5171, %v5362_v18  }
  0x4e   :  { %85 = vperm.xlu0 %5190, %v5362_v18  }
  0x4f   :  { %5174 = vset.pattern.permute.xlu2 %v5513_v52 }
  0x50   :  { %5173 = vset.pattern.permute.xlu1 %v5513_v52 }
  0x56   :  { %92 = vperm.xlu0 %5190, %v5409_v31  }
  0x57   :  { %1036 = vperm.xlu2 %5174, %v5409_v31  }
  0x58   :  { %1030 = vperm.xlu1 %5173, %v5362_v18  }
  0x5e   :  { %113 = vperm.xlu0 %5190, %v5522_v53  }
  0x5f   :  { %5177 = vset.pattern.permute.xlu2 %v5313_v5 }
  0x60   :  { %5176 = vset.pattern.permute.xlu1 %v5406_v30 }
  0x66   :  { %5199 = vset.pattern.permute.xlu0 %v5324_v8 }
  0x67   :  { %99 = vperm.xlu2 %5177, %v5486_v48  }
  0x68   :  { %1170 = vperm.xlu1 %5176, %v5409_v31   ;;  %v361_v19 = vpop.permute.xlu2 %360 }
  0x6e   :  { %390 = vperm.xlu0 %5199, %v5531_v54  }
  0x6f   :  { %5179 = vset.pattern.permute.xlu2 %v5327_v9 }
  0x70   :  { %5178 = vset.pattern.permute.xlu1 %v5313_v5 }
  0x71   :  { %v367_v25 = vpop.permute.xlu2 %366 }
  0x76   :  { %5200 = vset.pattern.permute.xlu0 %v5489_v49 }
  0x77   :  { %238 = vperm.xlu2 %5179, %v5486_v48  }
  0x78   :  { %106 = vperm.xlu1 %5178, %v5504_v51  }
  0x7e   :  { %768 = vperm.xlu0 %5200, %v5409_v31   ;;  %v5065_v31 = vld [vmem:[%s6606_s0 + $0x30] sm:$0xff] }
  0x7f   :  { %5181 = vset.pattern.permute.xlu2 %v5324_v8  ;;  %1354 = vmatpush.bf16.msra.mxu2 %v5065_v31 }
  0x80   :  { %5180 = vset.pattern.permute.xlu1 %v5324_v8  ;;  %v5566_v1 = vpop.permute.xlu0 %494 }
  0x81   :  { %v227_v18 = vpop.permute.xlu1 %226  ;;  %v629_v42 = vpop.permute.xlu2 %628 }
  0x83   :  { %1355 = vmatpush.bf16.msra.mxu2 %v5064_v38 }
  0x86   :  { %786 = vperm.xlu0 %5200, %v5522_v53  }
  0x87   :  { %378 = vperm.xlu2 %5181, %v5504_v51  }
  0x88   :  { %372 = vperm.xlu1 %5180, %v5486_v48  }
  0x8a   :  { %v233_v21 = vpop.permute.xlu1 %232 }
  0x8e   :  { %5209 = vset.pattern.permute.xlu0 %v5513_v52 }
  0x8f   :  { %5183 = vset.pattern.permute.xlu2 %v5321_v7  ;;  %v5548_v55 = vpop.f32.mrf.mxu0 }
  0x90   :  { %5182 = vset.pattern.permute.xlu1 %v5321_v7  ;;  %v5550_v56 = vpop.f32.mrf.mxu1  ;;  %v5575_v10 = vpop.permute.xlu0 %1164  ;;  %v144_v26 = vperm.slane %v5548_v55, 0  ;;  %v137_v37 = vrot.slane %v5548_v55, 1 }
  0x91   :  { %v278_v29 = vperm.slane %v5550_v56, 0  ;;  %v271_v45 = vrot.slane %v5550_v56, 1 }
  0x93   :  { %v294_v35 = vmul.f32 %v278_v29, %v227_v18  ;;  %v763_v18 = vpop.permute.xlu2 %762 }
  0x96   :  { %1060 = vperm.xlu0 %5209, %v5531_v54  }
  0x97   :  { %v5552_v57 = vpop.f32.mrf.mxu2  ;;  %512 = vperm.xlu2 %5183, %v5504_v51   ;;  %v78_v59 = vpop.f32.mrf.mxu0 }
  0x98   :  { %v5556_v58 = vpop.f32.mrf.mxu3  ;;  %506 = vperm.xlu1 %5182, %v5486_v48   ;;  %v220_v60 = vpop.f32.mrf.mxu1  ;;  %v412_v36 = vperm.slane %v5552_v57, 0  ;;  %v5063_v59 = vld [vmem:[%s6606_s0 + $0x20] sm:$0xff] }
  0x99   :  { %v546_v43 = vperm.slane %v5556_v58, 0  ;;  %v5067_v60 = vld [vmem:[%s6606_s0 + $0x40] sm:$0xff]  ;;  %1356 = vmatpush.bf16.msra.mxu2 %v5063_v59 }
  0x9a   :  { %v5603_v27 = vpop.permute.xlu1 %500  ;;  %1425 = vmatpush.bf16.msra.mxu3 %v5067_v60 }
  0x9e   :  { %5210 = vset.pattern.permute.xlu0 %v5327_v9 }
  0x9f   :  { %5186 = vset.pattern.permute.xlu2 %v5489_v49  ;;  %v354_v61 = vpop.f32.mrf.mxu2  ;;  %v5562_v62 = vpop.f32.mrf.mxu0 }
  0xa0   :  { %5185 = vset.pattern.permute.xlu1 %v5445_v40  ;;  %v488_v63 = vpop.f32.mrf.mxu3  ;;  %v5564_v0 = vpop.f32.mrf.mxu1  ;;  %v5071_v61 = vld [vmem:[%s6606_s0 + $0x60] sm:$0xff] }
  0xa1   :  { %v5581_v15 = vpop.permute.xlu0 %640  ;;  %v562_v63 = vmul.f32 %v546_v43, %v5566_v1  ;;  %1494 = vmatpush.bf16.msrb.mxu0 %v5071_v61  ;;  %v814_v1 = vperm.slane %v5564_v0, 0  ;;  %v903_v38 = vpop.permute.xlu2 %902 }
  0xa6   :  { %244 = vperm.xlu0 %5210, %v5504_v51  }
  0xa7   :  { %774 = vperm.xlu2 %5186, %v5486_v48   ;;  %v5570_v2 = vpop.f32.mrf.mxu2  ;;  %v622_v3 = vpop.f32.mrf.mxu0 }
  0xa8   :  { %646 = vperm.xlu1 %5185, %v5504_v51   ;;  %v5573_v4 = vpop.f32.mrf.mxu3  ;;  %v756_v6 = vpop.f32.mrf.mxu1  ;;  %v941_v39 = vrot.slane %v5570_v2, 1 }
  0xa9   :  { %v279_v6 = vperm.slane %v271_v45, 0  ;;  %v1082_v45 = vperm.slane %v5573_v4, 0 }
  0xaa   :  { %v635_v46 = vpop.permute.xlu1 %634  ;;  %v949_v60 = vperm.slane %v941_v39, 0 }
  0xab   :  { %v295_v22 = vmul.f32 %v279_v6, %v233_v21  ;;  %v948_v21 = vperm.slane %v5570_v2, 0 }
  0xaf   :  { %5188 = vset.pattern.permute.xlu2 %v5496_v50  ;;  %v890_v11 = vpop.f32.mrf.mxu2  ;;  %v5579_v12 = vpop.f32.mrf.mxu0 }
  0xb0   :  { %5187 = vset.pattern.permute.xlu1 %v5489_v49  ;;  %v1024_v13 = vpop.f32.mrf.mxu3  ;;  %v5587_v17 = vpop.permute.xlu0 %914  ;;  %v405_v11 = vrot.slane %v5552_v57, 1 }
  0xb2   :  { %v413_v23 = vperm.slane %v405_v11, 0 }
  0xb4   :  { %v429_v33 = vmul.f32 %v413_v23, %v367_v25 }
  0xb7   :  { %908 = vperm.xlu2 %5188, %v5486_v48   ;;  %v1158_v16 = vpop.f32.mrf.mxu0 }
  0xb8   :  { %780 = vperm.xlu1 %5187, %v5504_v51   ;;  %v680_v16 = vperm.slane %v5562_v62, 0 }
  0xba   :  { %v897_v24 = vpop.permute.xlu1 %896  ;;  %v696_v29 = vmul.f32 %v680_v16, %v629_v42 }
  0xbb   :  { %v964_v25 = vmul.f32 %v948_v21, %v897_v24 }
  0xbf   :  { %5192 = vset.pattern.permute.xlu2 %v5513_v52 }
  0xc0   :  { %5191 = vset.pattern.permute.xlu1 %v5513_v52  ;;  %v86_v20 = vpop.permute.xlu0 %85 }
  0xc1   :  { %v160_v34 = vmul.f32 %v144_v26, %v86_v20 }
  0xc3   :  { %v302_v44 = vadd.f32 %v294_v35, %v160_v34  ;;  %v830_v35 = vmul.f32 %v814_v1, %v763_v18 }
  0xc7   :  { %1048 = vperm.xlu2 %5192, %v5504_v51  }
  0xc8   :  { %1042 = vperm.xlu1 %5191, %v5486_v48   ;;  %v93_v28 = vpop.permute.xlu0 %92 }
  0xcf   :  { %5194 = vset.pattern.permute.xlu2 %v5406_v30 }
  0xd0   :  { %5193 = vset.pattern.permute.xlu1 %v5406_v30  ;;  %v5630_v47 = vpop.permute.xlu0 %113 }
  0xd7   :  { %1182 = vperm.xlu2 %5194, %v5504_v51   ;;  %v145_v51 = vperm.slane %v137_v37, 0  ;;  %v807_v37 = vrot.slane %v5564_v0, 1 }
  0xd8   :  { %1176 = vperm.xlu1 %5193, %v5486_v48   ;;  %v428_v48 = vmul.f32 %v412_v36, %v361_v19  ;;  %v539_v19 = vrot.slane %v5556_v58, 1 }
  0xd9   :  { %v161_v13 = vmul.f32 %v145_v51, %v93_v28  ;;  %v673_v28 = vrot.slane %v5562_v62, 1  ;;  %v815_v59 = vperm.slane %v807_v37, 0 }
  0xda   :  { %v436_v3 = vadd.f32 %v428_v48, %v302_v44  ;;  %v547_v32 = vperm.slane %v539_v19, 0  ;;  %v1031_v44 = vpop.permute.xlu1 %1030  ;;  %v1075_v48 = vrot.slane %v5573_v4, 1  ;;  %v965_v19 = vmul.f32 %v949_v60, %v903_v38 }
  0xdb   :  { %v303_v26 = vadd.f32 %v295_v22, %v161_v13  ;;  %v681_v42 = vperm.slane %v673_v28, 0  ;;  %v1098_v11 = vmul.f32 %v1082_v45, %v1031_v44  ;;  %v273_v45 = vrot.slane %v5550_v56, 3 }
  0xdc   :  { %v570_v20 = vadd.f32 %v562_v63, %v436_v3  ;;  %v563_v41 = vmul.f32 %v547_v32, %v5603_v27  ;;  %v1209_v3 = vrot.slane %v5579_v12, 1  ;;  %v1216_v27 = vperm.slane %v5579_v12, 0 }
  0xdd   :  { %v437_v36 = vadd.f32 %v429_v33, %v303_v26  ;;  %v697_v61 = vmul.f32 %v681_v42, %v635_v46  ;;  %v1083_v13 = vperm.slane %v1075_v48, 0  ;;  %v139_v48 = vrot.slane %v5548_v55, 3 }
  0xde   :  { %v704_v34 = vadd.f32 %v696_v29, %v570_v20  ;;  %v1037_v20 = vpop.permute.xlu2 %1036  ;;  %v1217_v23 = vperm.slane %v1209_v3, 0  ;;  %v1232_v1 = vmul.f32 %v1216_v27, %v5575_v10  ;;  %v138_v3 = vrot.slane %v5548_v55, 2 }
  0xdf   :  { %5196 = vset.pattern.permute.xlu2 %v5327_v9  ;;  %v571_v51 = vadd.f32 %v563_v41, %v437_v36  ;;  %v1099_v26 = vmul.f32 %v1083_v13, %v1037_v20  ;;  %v272_v27 = vrot.slane %v5550_v56, 2 }
  0xe0   :  { %5195 = vset.pattern.permute.xlu1 %v5313_v5  ;;  %v5649_v31 = vpop.permute.xlu0 %390  ;;  %v838_v43 = vadd.f32 %v830_v35, %v704_v34 }
  0xe1   :  { %v705_v16 = vadd.f32 %v697_v61, %v571_v51  ;;  %v147_v61 = vperm.slane %v139_v48, 0  ;;  %v943_v48 = vrot.slane %v5570_v2, 3 }
  0xe2   :  { %v972_v63 = vadd.f32 %v964_v25, %v838_v43  ;;  %v1171_v46 = vpop.permute.xlu1 %1170 }
  0xe3   :  { %v1233_v32 = vmul.f32 %v1217_v23, %v1171_v46  ;;  %v280_v23 = vperm.slane %v272_v27, 0 }
  0xe4   :  { %v1106_v22 = vadd.f32 %v1098_v11, %v972_v63  ;;  %v407_v63 = vrot.slane %v5552_v57, 3  ;;  %v406_v11 = vrot.slane %v5552_v57, 2 }
  0xe6   :  { %v1240_v33 = vadd.f32 %v1232_v1, %v1106_v22  ;;  %v100_v10 = vpop.permute.xlu2 %99  ;;  %v146_v22 = vperm.slane %v138_v3, 0  ;;  %v414_v46 = vperm.slane %v406_v11, 0  ;;  %v808_v3 = vrot.slane %v5564_v0, 2 }
  0xe7   :  { %250 = vperm.xlu2 %5196, %v5522_v53  }
  0xe8   :  { %120 = vperm.xlu1 %5195, %v5531_v54   ;;  %v1248_v35 = vmax.f32 %v1240_v33, 0.0  ;;  %v809_v33 = vrot.slane %v5564_v0, 3 }
  0xea   :  { %v107_v41 = vpop.permute.xlu1 %106 }
  0xeb   :  { %v163_v13 = vmul.f32 %v147_v61, %v107_v41  ;;  %v817_v61 = vperm.slane %v809_v33, 0 }
  0xee   :  { %v239_v37 = vpop.permute.xlu2 %238 }
  0xef   :  { %5198 = vset.pattern.permute.xlu2 %v5324_v8 }
  0xf0   :  { %5197 = vset.pattern.permute.xlu1 %v5327_v9  ;;  %v769_v6 = vpop.permute.xlu0 %768 }
  0xf1   :  { %v831_v18 = vmul.f32 %v815_v59, %v769_v6  ;;  %v281_v59 = vperm.slane %v273_v45, 0 }
  0xf3   :  { %v839_v24 = vadd.f32 %v831_v18, %v705_v16  ;;  %v415_v16 = vperm.slane %v407_v63, 0  ;;  %v541_v18 = vrot.slane %v5556_v58, 3 }
  0xf5   :  { %v973_v29 = vadd.f32 %v965_v19, %v839_v24  ;;  %v540_v24 = vrot.slane %v5556_v58, 2 }
  0xf6   :  { %v379_v38 = vpop.permute.xlu2 %378 }
  0xf7   :  { %384 = vperm.xlu2 %5198, %v5522_v53   ;;  %v1107_v28 = vadd.f32 %v1099_v26, %v973_v29  ;;  %v5705_v26 = vperm.slane %v5350_v14, 6  ;;  %v431_v29 = vmul.f32 %v415_v16, %v379_v38  ;;  %v548_v41 = vperm.slane %v540_v24, 0 }
  0xf8   :  { %256 = vperm.xlu1 %5197, %v5531_v54   ;;  %v5683_v39 = vpop.permute.xlu0 %786  ;;  %v942_v16 = vrot.slane %v5570_v2, 2 }
  0xf9   :  { %v1241_v34 = vadd.f32 %v1233_v32, %v1107_v28  ;;  %v549_v32 = vperm.slane %v541_v18, 0  ;;  %v675_v28 = vrot.slane %v5562_v62, 3  ;;  %262 = vperm.xlu0 %5210, %v5705_v26  }
  0xfa   :  { %v373_v43 = vpop.permute.xlu1 %372 }
  0xfb   :  { %v1249_v21 = vmax.f32 %v1241_v34, 0.0  ;;  %v674_v34 = vrot.slane %v5562_v62, 2  ;;  %v430_v38 = vmul.f32 %v414_v46, %v373_v43  ;;  %v816_v43 = vperm.slane %v808_v3, 0 }
  0xfd   :  { %v5666_v36 = vpack.c.bf16 %v1249_v21, %v1248_v35  ;;  %v162_v35 = vmul.f32 %v146_v22, %v100_v10  ;;  %v296_v21 = vmul.f32 %v280_v23, %v239_v37  ;;  %v682_v63 = vperm.slane %v674_v34, 0 }
  0xfe   :  { %v513_v42 = vpop.permute.xlu2 %512  ;;  %v1077_v23 = vrot.slane %v5573_v4, 3 }
  0xff   :  { %5202 = vset.pattern.permute.xlu2 %v5321_v7  ;;  %4347 = vmatmul.msk.bf16.vlgmr.msra.gmra.mxu1 %vm63_vm0, %v5666_v36  ;;  %v304_v11 = vadd.f32 %v296_v21, %v162_v35 }
 0x100   :  { %5201 = vset.pattern.permute.xlu1 %v5321_v7  ;;  %4375 = vmatmul.msk.bf16.vlgmr.msra.gmra.mxu2 %vm63_vm0, %v5666_v36 }
 0x101   :  { %4403 = vmatmul.msk.bf16.vlgmr.msra.gmra.mxu3 %vm63_vm0, %v5666_v36  ;;  %4431 = vmatmul.msk.bf16.vlgmr.msrb.gmra.mxu0 %vm63_vm0, %v5666_v36  ;;  %v438_v18 = vadd.f32 %v430_v38, %v304_v11  ;;  %v5727_v38 = vperm.slane %v5350_v14, 7 }
 0x102   :  { %5219 = vset.pattern.permute.xlu0 %v5321_v7 }
 0x106   :  { %v5692_v25 = vpop.permute.xlu2 %774 }
 0x107   :  { %524 = vperm.xlu2 %5202, %v5531_v54  }
 0x108   :  { %518 = vperm.xlu1 %5201, %v5522_v53   ;;  %v5688_v44 = vpop.permute.xlu0 %1060 }
 0x10a   :  { %v507_v51 = vpop.permute.xlu1 %506  ;;  %536 = vperm.xlu0 %5219, %v5727_v38  }
 0x10b   :  { %v564_v10 = vmul.f32 %v548_v41, %v507_v51  ;;  %v1076_v51 = vrot.slane %v5573_v4, 2 }
 0x10d   :  { %v1084_v41 = vperm.slane %v1076_v51, 0 }
 0x10f   :  { %5204 = vset.pattern.permute.xlu2 %v5445_v40 }
 0x110   :  { %5203 = vset.pattern.permute.xlu1 %v5445_v40 }
 0x111   :  { %v909_v19 = vpop.permute.xlu2 %908 }
 0x112   :  { %5224 = vset.pattern.permute.xlu0 %v5496_v50 }
 0x117   :  { %658 = vperm.xlu2 %5204, %v5531_v54  }
 0x118   :  { %652 = vperm.xlu1 %5203, %v5522_v53   ;;  %v245_v60 = vpop.permute.xlu0 %244 }
 0x119   :  { %v297_v6 = vmul.f32 %v281_v59, %v245_v60  ;;  %v565_v59 = vmul.f32 %v549_v32, %v513_v42  ;;  %v683_v60 = vperm.slane %v675_v28, 0  ;;  %v698_v42 = vmul.f32 %v682_v63, %v5581_v15 }
 0x11a   :  { %v647_v20 = vpop.permute.xlu1 %646  ;;  %v950_v32 = vperm.slane %v942_v16, 0  ;;  %v1085_v28 = vperm.slane %v1077_v23, 0  ;;  %v832_v15 = vmul.f32 %v816_v43, %v5692_v25  ;;  %932 = vperm.xlu0 %5224, %v5705_v26  }
 0x11b   :  { %v305_v1 = vadd.f32 %v297_v6, %v163_v13  ;;  %v951_v13 = vperm.slane %v943_v48, 0  ;;  %v699_v22 = vmul.f32 %v683_v60, %v647_v20 }
 0x11d   :  { %v439_v45 = vadd.f32 %v431_v29, %v305_v1  ;;  %v572_v1 = vadd.f32 %v564_v10, %v438_v18  ;;  %v1211_v29 = vrot.slane %v5579_v12, 3  ;;  %v967_v20 = vmul.f32 %v951_v13, %v5587_v17 }
 0x11f   :  { %5206 = vset.pattern.permute.xlu2 %v5496_v50  ;;  %v573_v37 = vadd.f32 %v565_v59, %v439_v45  ;;  %v706_v35 = vadd.f32 %v698_v42, %v572_v1  ;;  %v1219_v21 = vperm.slane %v1211_v29, 0  ;;  %v1210_v45 = vrot.slane %v5579_v12, 2 }
 0x120   :  { %5205 = vset.pattern.permute.xlu1 %v5489_v49  ;;  %v966_v59 = vmul.f32 %v950_v32, %v909_v19  ;;  %v408_v42 = vrot.slane %v5552_v57, 4  ;;  %v810_v32 = vrot.slane %v5564_v0, 4 }
 0x121   :  { %v1049_v27 = vpop.permute.xlu2 %1048  ;;  %v707_v46 = vadd.f32 %v699_v22, %v573_v37  ;;  %v840_v17 = vadd.f32 %v832_v15, %v706_v35  ;;  %v1218_v25 = vperm.slane %v1210_v45, 0 }
 0x122   :  { %v1101_v60 = vmul.f32 %v1085_v28, %v1049_v27  ;;  %5229 = vset.pattern.permute.xlu0 %v5406_v30  ;;  %v416_v29 = vperm.slane %v408_v42, 0 }
 0x127   :  { %920 = vperm.xlu2 %5206, %v5522_v53  }
 0x128   :  { %792 = vperm.xlu1 %5205, %v5531_v54  }
 0x12a   :  { %v781_v6 = vpop.permute.xlu1 %780  ;;  %1206 = vperm.xlu0 %5229, %v5727_v38  }
 0x12b   :  { %v833_v24 = vmul.f32 %v817_v61, %v781_v6  ;;  %v974_v6 = vadd.f32 %v966_v59, %v840_v17 }
 0x12d   :  { %v841_v33 = vadd.f32 %v833_v24, %v707_v46 }
 0x12f   :  { %5208 = vset.pattern.permute.xlu2 %v5513_v52  ;;  %v975_v61 = vadd.f32 %v967_v20, %v841_v33  ;;  %v676_v33 = vrot.slane %v5562_v62, 4 }
 0x130   :  { %5207 = vset.pattern.permute.xlu1 %v5496_v50 }
 0x131   :  { %v1183_v48 = vpop.permute.xlu2 %1182  ;;  %v1109_v11 = vadd.f32 %v1101_v60, %v975_v61 }
 0x132   :  { %v1235_v63 = vmul.f32 %v1219_v21, %v1183_v48  ;;  %v684_v48 = vperm.slane %v676_v33, 0 }
 0x134   :  { %v1243_v37 = vadd.f32 %v1235_v63, %v1109_v11 }
 0x136   :  { %v1251_v19 = vmax.f32 %v1243_v37, 0.0  ;;  %v275_v37 = vrot.slane %v5550_v56, 5 }
 0x137   :  { %1054 = vperm.xlu2 %5208, %v5522_v53  }
 0x138   :  { %926 = vperm.xlu1 %5207, %v5531_v54  }
 0x13a   :  { %v1043_v34 = vpop.permute.xlu1 %1042 }
 0x13b   :  { %v1100_v3 = vmul.f32 %v1084_v41, %v1043_v34 }
 0x13d   :  { %v1108_v13 = vadd.f32 %v1100_v3, %v974_v6 }
 0x13f   :  { %5212 = vset.pattern.permute.xlu2 %v5406_v30 }
 0x140   :  { %5211 = vset.pattern.permute.xlu1 %v5406_v30 }
 0x147   :  { %1194 = vperm.xlu2 %5212, %v5531_v54   ;;  %v140_v54 = vrot.slane %v5548_v55, 4 }
 0x148   :  { %1188 = vperm.xlu1 %5211, %v5522_v53   ;;  %v251_v53 = vpop.permute.xlu2 %250 }
 0x149   :  { %v148_v23 = vperm.slane %v140_v54, 0 }
 0x14a   :  { %v1177_v10 = vpop.permute.xlu1 %1176 }
 0x14b   :  { %v1234_v14 = vmul.f32 %v1218_v25, %v1177_v10  ;;  %v164_v1 = vmul.f32 %v148_v23, %v5630_v47 }
 0x14d   :  { %v1242_v16 = vadd.f32 %v1234_v14, %v1108_v13  ;;  %v141_v13 = vrot.slane %v5548_v55, 5  ;;  %v283_v14 = vperm.slane %v275_v37, 0 }
 0x14f   :  { %v1250_v27 = vmax.f32 %v1242_v16, 0.0  ;;  %5214 = vset.pattern.permute.xlu2 %v5313_v5  ;;  %v149_v16 = vperm.slane %v141_v13, 0 }
 0x150   :  { %5213 = vset.pattern.permute.xlu1 %v5313_v5 }
 0x151   :  { %v5735_v18 = vpack.c.bf16 %v1251_v19, %v1250_v27  ;;  %v385_v51 = vpop.permute.xlu2 %384 }
 0x152   :  { %v432_v21 = vmul.f32 %v416_v29, %v385_v51  ;;  %v945_v51 = vrot.slane %v5570_v2, 5 }
 0x153   :  { %4348 = vmatmul.msk.bf16.gmra.mxu1 %vm63_vm0, %v5735_v18  ;;  %4376 = vmatmul.msk.bf16.gmra.mxu2 %vm63_vm0, %v5735_v18 }
 0x154   :  { %4404 = vmatmul.msk.bf16.gmra.mxu3 %vm63_vm0, %v5735_v18  ;;  %4432 = vmatmul.msk.bf16.gmra.mxu0 %vm63_vm0, %v5735_v18  ;;  %v953_v33 = vperm.slane %v945_v51, 0 }
 0x157   :  { %134 = vperm.xlu2 %5214, %v5727_v38  }
 0x158   :  { %127 = vperm.xlu1 %5213, %v5705_v26  }
 0x15a   :  { %v5756_v5 = vpop.permute.xlu1 %120 }
 0x15f   :  { %5216 = vset.pattern.permute.xlu2 %v5324_v8 }
 0x160   :  { %5215 = vset.pattern.permute.xlu1 %v5327_v9  ;;  %v274_v9 = vrot.slane %v5550_v56, 4 }
 0x161   :  { %v525_v10 = vpop.permute.xlu2 %524 }
 0x162   :  { %v282_v24 = vperm.slane %v274_v9, 0  ;;  %v165_v9 = vmul.f32 %v149_v16, %v5756_v5 }
 0x164   :  { %v298_v46 = vmul.f32 %v282_v24, %v251_v53  ;;  %v543_v53 = vrot.slane %v5556_v58, 5 }
 0x166   :  { %v306_v35 = vadd.f32 %v298_v46, %v164_v1  ;;  %v551_v24 = vperm.slane %v543_v53, 0 }
 0x167   :  { %396 = vperm.xlu2 %5216, %v5705_v26  }
 0x168   :  { %268 = vperm.xlu1 %5215, %v5727_v38   ;;  %v440_v59 = vadd.f32 %v432_v21, %v306_v35 }
 0x16a   :  { %v257_v22 = vpop.permute.xlu1 %256 }
 0x16b   :  { %v299_v54 = vmul.f32 %v283_v14, %v257_v22  ;;  %v567_v22 = vmul.f32 %v551_v24, %v525_v10 }
 0x16d   :  { %v307_v42 = vadd.f32 %v299_v54, %v165_v9 }
 0x16f   :  { %5218 = vset.pattern.permute.xlu2 %v5321_v7  ;;  %v542_v7 = vrot.slane %v5556_v58, 4 }
 0x170   :  { %5217 = vset.pattern.permute.xlu1 %v5324_v8 }
 0x171   :  { %v550_v28 = vperm.slane %v542_v7, 0  ;;  %v659_v19 = vpop.permute.xlu2 %658 }
 0x177   :  { %530 = vperm.xlu2 %5218, %v5705_v26  }
 0x178   :  { %402 = vperm.xlu1 %5217, %v5727_v38  }
 0x17a   :  { %v519_v20 = vpop.permute.xlu1 %518 }
 0x17b   :  { %v566_v47 = vmul.f32 %v550_v28, %v519_v20 }
 0x17c   :  { %v1289_v43 = vpop.f32.mrf.mxu1 }
 0x17d   :  { %1309 = vst.msk [vmem:[#allocation2] sm:$0xff] %vm63_vm0, %v1289_v43  ;;  %v574_v17 = vadd.f32 %v566_v47, %v440_v59  ;;  %v811_v43 = vrot.slane %v5564_v0, 5  ;;  %v1213_v59 = vrot.slane %v5579_v12, 5 }
 0x17e   :  { %v1496_v8 = vpop.f32.mrf.mxu0 }
 0x17f   :  { %5221 = vset.pattern.permute.xlu2 %v5445_v40  ;;  %1516 = vst.msk [vmem:[#allocation2 + $0x18] sm:$0xff] %vm63_vm0, %v1496_v8  ;;  %v1079_v8 = vrot.slane %v5573_v4, 5  ;;  %v819_v5 = vperm.slane %v811_v43, 0 }
 0x180   :  { %5220 = vset.pattern.permute.xlu1 %v5445_v40  ;;  %v818_v40 = vperm.slane %v810_v32, 0 }
 0x181   :  { %v921_v1 = vpop.permute.xlu2 %920 }
 0x182   :  { %v834_v61 = vmul.f32 %v818_v40, %v5683_v39  ;;  %v409_v39 = vrot.slane %v5552_v57, 5  ;;  %v944_v40 = vrot.slane %v5570_v2, 4 }
 0x183   :  { %v1358_v15 = vpop.f32.mrf.mxu2 }
 0x184   :  { %v1427_v34 = vpop.f32.mrf.mxu3  ;;  %1378 = vst.msk [vmem:[#allocation2 + $0x8] sm:$0xff] %vm63_vm0, %v1358_v15  ;;  %v1291_v41 = vpop.f32.mrf.mxu1  ;;  %v417_v27 = vperm.slane %v409_v39, 0 }
 0x185   :  { %1447 = vst.msk [vmem:[#allocation2 + $0x10] sm:$0xff] %vm63_vm0, %v1427_v34 }
 0x186   :  { %1310 = vst.msk [vmem:[#allocation2 + $0x48] sm:$0xff] %vm63_vm0, %v1291_v41  ;;  %v1498_v45 = vpop.f32.mrf.mxu0  ;;  %v433_v23 = vmul.f32 %v417_v27, %v5649_v31  ;;  %v1087_v31 = vperm.slane %v1079_v8, 0 }
 0x187   :  { %670 = vperm.xlu2 %5221, %v5727_v38   ;;  %1517 = vst.msk [vmem:[#allocation2 + $0x60] sm:$0xff] %vm63_vm0, %v1498_v45  ;;  %v1078_v45 = vrot.slane %v5573_v4, 4 }
 0x188   :  { %664 = vperm.xlu1 %5220, %v5705_v26   ;;  %v441_v29 = vadd.f32 %v433_v23, %v307_v42  ;;  %v1103_v34 = vmul.f32 %v1087_v31, %v5688_v44  ;;  %v1212_v44 = vrot.slane %v5579_v12, 4 }
 0x18a   :  { %v653_v60 = vpop.permute.xlu1 %652  ;;  %v575_v32 = vadd.f32 %v567_v22, %v441_v29  ;;  %v1220_v10 = vperm.slane %v1212_v44, 0  ;;  %v142_v22 = vrot.slane %v5548_v55, 6 }
 0x18b   :  { %v700_v63 = vmul.f32 %v684_v48, %v653_v60  ;;  %v1360_v3 = vpop.f32.mrf.mxu2  ;;  %v952_v60 = vperm.slane %v944_v40, 0  ;;  %v411_v40 = vrot.slane %v5552_v57, 7 }
 0x18c   :  { %v1429_v25 = vpop.f32.mrf.mxu3  ;;  %1379 = vst.msk [vmem:[#allocation2 + $0x50] sm:$0xff] %vm63_vm0, %v1360_v3  ;;  %v150_v31 = vperm.slane %v142_v22, 0 }
 0x18d   :  { %v708_v6 = vadd.f32 %v700_v63, %v574_v17  ;;  %1448 = vst.msk [vmem:[#allocation2 + $0x58] sm:$0xff] %vm63_vm0, %v1429_v25  ;;  %v1221_v17 = vperm.slane %v1213_v59, 0  ;;  %v968_v3 = vmul.f32 %v952_v60, %v921_v1  ;;  %v678_v60 = vrot.slane %v5562_v62, 6 }
 0x18f   :  { %v842_v11 = vadd.f32 %v834_v61, %v708_v6  ;;  %5223 = vset.pattern.permute.xlu2 %v5489_v49  ;;  %v1086_v61 = vperm.slane %v1078_v45, 0  ;;  %v5090_v45 = vld [vmem:[%s6606_s0 + $0xf8] sm:$0xff] }
 0x190   :  { %5222 = vset.pattern.permute.xlu1 %v5489_v49  ;;  %v677_v49 = vrot.slane %v5562_v62, 5  ;;  %1767 = vmatpush.bf16.msra.mxu0 %v5090_v45 }
 0x191   :  { %v1055_v41 = vpop.permute.xlu2 %1054  ;;  %v976_v37 = vadd.f32 %v968_v3, %v842_v11  ;;  %v5081_v3 = vld [vmem:[%s6606_s0 + $0xb0] sm:$0xff] }
 0x192   :  { %v685_v7 = vperm.slane %v677_v49, 0  ;;  %v1102_v25 = vmul.f32 %v1086_v61, %v1055_v41 }
 0x194   :  { %v701_v20 = vmul.f32 %v685_v7, %v659_v19  ;;  %v1110_v39 = vadd.f32 %v1102_v25, %v976_v37  ;;  %v5085_v25 = vld [vmem:[%s6606_s0 + $0xd0] sm:$0xff]  ;;  %v812_v37 = vrot.slane %v5564_v0, 6 }
 0x197   :  { %804 = vperm.xlu2 %5223, %v5727_v38  }
 0x198   :  { %798 = vperm.xlu1 %5222, %v5705_v26  }
 0x19a   :  { %v793_v46 = vpop.permute.xlu1 %792 }
 0x19b   :  { %v835_v28 = vmul.f32 %v819_v5, %v793_v46  ;;  %v276_v46 = vrot.slane %v5550_v56, 6  ;;  %v263_v5 = vpop.permute.xlu0 %262 }
 0x19d   :  { %v284_v51 = vperm.slane %v276_v46, 0 }
 0x19f   :  { %5226 = vset.pattern.permute.xlu2 %v5513_v52 }
 0x1a0   :  { %5225 = vset.pattern.permute.xlu1 %v5496_v50  ;;  %v709_v50 = vadd.f32 %v701_v20, %v575_v32  ;;  %v410_v20 = vrot.slane %v5552_v57, 6  ;;  %v277_v32 = vrot.slane %v5550_v56, 7  ;;  %v5082_v56 = vld [vmem:[%s6606_s0 + $0xb8] sm:$0xff]  ;;  %v5077_v57 = vld [vmem:[%s6606_s0 + $0x90] sm:$0xff] }
 0x1a1   :  { %v1195_v63 = vpop.permute.xlu2 %1194  ;;  %1629 = vmatpush.bf16.msrb.mxu2 %v5082_v56 }
 0x1a2   :  { %v843_v35 = vadd.f32 %v835_v28, %v709_v50  ;;  %v1237_v6 = vmul.f32 %v1221_v17, %v1195_v63  ;;  %v544_v50 = vrot.slane %v5556_v58, 6  ;;  %v285_v41 = vperm.slane %v277_v32, 0 }
 0x1a3   :  { %v537_v44 = vpop.permute.xlu0 %536  ;;  %v545_v63 = vrot.slane %v5556_v58, 7  ;;  %v5089_v58 = vld [vmem:[%s6606_s0 + $0xf0] sm:$0xff] }
 0x1a4   :  { %v552_v59 = vperm.slane %v544_v50, 0  ;;  %1768 = vmatpush.bf16.msra.mxu0 %v5089_v58  ;;  %v5083_v50 = vld [vmem:[%s6606_s0 + $0xc0] sm:$0xff] }
 0x1a5   :  { %1630 = vmatpush.bf16.msrb.mxu2 %v5081_v3 }
 0x1a7   :  { %1066 = vperm.xlu2 %5226, %v5705_v26  }
 0x1a8   :  { %938 = vperm.xlu1 %5225, %v5727_v38  }
 0x1aa   :  { %v927_v15 = vpop.permute.xlu1 %926 }
 0x1ab   :  { %v969_v21 = vmul.f32 %v953_v33, %v927_v15  ;;  %v143_v33 = vrot.slane %v5548_v55, 7  ;;  %v5078_v15 = vld [vmem:[%s6606_s0 + $0x98] sm:$0xff]  ;;  %v933_v46 = vpop.permute.xlu0 %932 }
 0x1ac   :  { %1560 = vmatpush.bf16.msrb.mxu1 %v5078_v15  ;;  %v5086_v55 = vld [vmem:[%s6606_s0 + $0xd8] sm:$0xff] }
 0x1ad   :  { %v977_v47 = vadd.f32 %v969_v21, %v843_v35  ;;  %v418_v35 = vperm.slane %v410_v20, 0  ;;  %1698 = vmatpush.bf16.msrb.mxu3 %v5086_v55  ;;  %v947_v20 = vrot.slane %v5570_v2, 7  ;;  %v1215_v55 = vrot.slane %v5579_v12, 7 }
 0x1af   :  { %v1111_v48 = vadd.f32 %v1103_v34, %v977_v47  ;;  %5228 = vset.pattern.permute.xlu2 %v5406_v30  ;;  %v300_v34 = vmul.f32 %v284_v51, %v263_v5  ;;  %v955_v45 = vperm.slane %v947_v20, 0 }
 0x1b0   :  { %5227 = vset.pattern.permute.xlu1 %v5513_v52  ;;  %1561 = vmatpush.bf16.msrb.mxu1 %v5077_v57 }
 0x1b1   :  { %v1245_v30 = vadd.f32 %v1237_v6, %v1111_v48  ;;  %v135_v24 = vpop.permute.xlu2 %134  ;;  %v151_v48 = vperm.slane %v143_v33, 0  ;;  %1699 = vmatpush.bf16.msrb.mxu3 %v5085_v25  ;;  %v5079_v33 = vld [vmem:[%s6606_s0 + $0xa0] sm:$0xff] }
 0x1b3   :  { %v1253_v16 = vmax.f32 %v1245_v30, 0.0  ;;  %v167_v30 = vmul.f32 %v151_v48, %v135_v24  ;;  %v820_v24 = vperm.slane %v812_v37, 0 }
 0x1b7   :  { %1200 = vperm.xlu2 %5228, %v5705_v26  }
 0x1b8   :  { %1072 = vperm.xlu1 %5227, %v5727_v38  }
 0x1ba   :  { %v1189_v13 = vpop.permute.xlu1 %1188 }
 0x1bb   :  { %v1236_v14 = vmul.f32 %v1220_v10, %v1189_v13  ;;  %v419_v10 = vperm.slane %v411_v40, 0  ;;  %v5076_v13 = vld [vmem:[%s6606_s0 + $0x88] sm:$0xff] }
 0x1bc   :  { %1562 = vmatpush.bf16.msrb.mxu1 %v5076_v13 }
 0x1bd   :  { %v1244_v52 = vadd.f32 %v1236_v14, %v1110_v39 }
 0x1bf   :  { %v1252_v19 = vmax.f32 %v1244_v52, 0.0 }
 0x1c1   :  { %v5807_v27 = vpack.c.bf16 %v1253_v16, %v1252_v19  ;;  %v397_v42 = vpop.permute.xlu2 %396  ;;  %v686_v16 = vperm.slane %v678_v60, 0 }
 0x1c2   :  { %v434_v61 = vmul.f32 %v418_v35, %v397_v42  ;;  %v5087_v35 = vld [vmem:[%s6606_s0 + $0xe0] sm:$0xff] }
 0x1c3   :  { %4349 = vmatmul.msk.bf16.gmra.mxu1 %vm63_vm0, %v5807_v27  ;;  %4377 = vmatmul.msk.bf16.gmra.mxu2 %vm63_vm0, %v5807_v27 }
 0x1c4   :  { %4405 = vmatmul.msk.bf16.gmra.mxu3 %vm63_vm0, %v5807_v27  ;;  %4433 = vmatmul.msk.bf16.gmra.mxu0 %vm63_vm0, %v5807_v27 }
 0x1ca   :  { %v128_v43 = vpop.permute.xlu1 %127 }
 0x1cb   :  { %v166_v21 = vmul.f32 %v150_v31, %v128_v43  ;;  %v1080_v31 = vrot.slane %v5573_v4, 6 }
 0x1cd   :  { %v308_v17 = vadd.f32 %v300_v34, %v166_v21  ;;  %v1088_v48 = vperm.slane %v1080_v31, 0 }
 0x1cf   :  { %v442_v19 = vadd.f32 %v434_v61, %v308_v17 }
 0x1d0   :  { %v1294_v26 = vpop.f32.mrf.mxu1 }
 0x1d1   :  { %1311 = vst.msk [vmem:[#allocation2 + $0x90] sm:$0xff] %vm63_vm0, %v1294_v26  ;;  %v1501_v38 = vpop.f32.mrf.mxu0  ;;  %v531_v8 = vpop.permute.xlu2 %530  ;;  %v553_v26 = vperm.slane %v545_v63, 0 }
 0x1d2   :  { %1518 = vst.msk [vmem:[#allocation2 + $0xa8] sm:$0xff] %vm63_vm0, %v1501_v38  ;;  %v568_v14 = vmul.f32 %v552_v59, %v531_v8  ;;  %v679_v38 = vrot.slane %v5562_v62, 7  ;;  %v5088_v62 = vld [vmem:[%s6606_s0 + $0xe8] sm:$0xff] }
 0x1d3   :  { %v569_v5 = vmul.f32 %v553_v26, %v537_v44  ;;  %1769 = vmatpush.bf16.msra.mxu0 %v5088_v62  ;;  %v5091_v62 = vld [vmem:[%s6606_s0 + $0x100] sm:$0xff] }
 0x1d4   :  { %v576_v43 = vadd.f32 %v568_v14, %v442_v19 }
 0x1d6   :  { %v1363_v11 = vpop.f32.mrf.mxu2 }
 0x1d7   :  { %1380 = vst.msk [vmem:[#allocation2 + $0x98] sm:$0xff] %vm63_vm0, %v1363_v11  ;;  %v1432_v53 = vpop.f32.mrf.mxu3  ;;  %v946_v11 = vrot.slane %v5570_v2, 6  ;;  %v1214_v2 = vrot.slane %v5579_v12, 6  ;;  %1770 = vmatpush.bf16.msra.mxu0 %v5087_v35 }
 0x1d8   :  { %1449 = vst.msk [vmem:[#allocation2 + $0xa0] sm:$0xff] %vm63_vm0, %v1432_v53  ;;  %v1296_v54 = vpop.f32.mrf.mxu1  ;;  %v5080_v53 = vld [vmem:[%s6606_s0 + $0xa8] sm:$0xff] }
 0x1d9   :  { %1312 = vst.msk [vmem:[#allocation2 + $0xd8] sm:$0xff] %vm63_vm0, %v1296_v54  ;;  %v1503_v9 = vpop.f32.mrf.mxu0  ;;  %v5084_v54 = vld [vmem:[%s6606_s0 + $0xc8] sm:$0xff]  ;;  %v954_v22 = vperm.slane %v946_v11, 0  ;;  %1631 = vmatpush.bf16.msrb.mxu2 %v5080_v53  ;;  %v1222_v61 = vperm.slane %v1214_v2, 0 }
 0x1da   :  { %1519 = vst.msk [vmem:[#allocation2 + $0xf0] sm:$0xff] %vm63_vm0, %v1503_v9  ;;  %v269_v7 = vpop.permute.xlu1 %268  ;;  %1700 = vmatpush.bf16.msrb.mxu3 %v5084_v54 }
 0x1db   :  { %v301_v6 = vmul.f32 %v285_v41, %v269_v7  ;;  %v970_v21 = vmul.f32 %v954_v22, %v933_v46  ;;  %v1081_v41 = vrot.slane %v5573_v4, 7  ;;  %v1223_v4 = vperm.slane %v1215_v55, 0 }
 0x1dd   :  { %v309_v9 = vadd.f32 %v301_v6, %v167_v30  ;;  %1632 = vmatpush.bf16.msrb.mxu2 %v5079_v33  ;;  %v1089_v44 = vperm.slane %v1081_v41, 0  ;;  %v1207_v6 = vpop.permute.xlu0 %1206 }
 0x1de   :  { %v1365_v49 = vpop.f32.mrf.mxu2  ;;  %1701 = vmatpush.bf16.msrb.mxu3 %v5083_v50  ;;  %v1239_v12 = vmul.f32 %v1223_v4, %v1207_v6 }
 0x1df   :  { %1381 = vst.msk [vmem:[#allocation2 + $0xe0] sm:$0xff] %vm63_vm0, %v1365_v49  ;;  %v1434_v23 = vpop.f32.mrf.mxu3  ;;  %v813_v49 = vrot.slane %v5564_v0, 7 }
 0x1e0   :  { %1450 = vst.msk [vmem:[#allocation2 + $0xe8] sm:$0xff] %vm63_vm0, %v1434_v23 }
 0x1e1   :  { %v5827_v29 = vpop.permute.xlu2 %670  ;;  %v821_v51 = vperm.slane %v813_v49, 0 }
 0x1ea   :  { %v403_v1 = vpop.permute.xlu1 %402 }
 0x1eb   :  { %v435_v52 = vmul.f32 %v419_v10, %v403_v1  ;;  %v687_v1 = vperm.slane %v679_v38, 0  ;;  %v5094_v38 = vld [vmem:[%s6606_s0 + $0x118] sm:$0xff] }
 0x1ed   :  { %v443_v7 = vadd.f32 %v435_v52, %v309_v9  ;;  %v703_v40 = vmul.f32 %v687_v1, %v5827_v29 }
 0x1ef   :  { %v577_v15 = vadd.f32 %v569_v5, %v443_v7 }
 0x1f1   :  { %v5837_v47 = vpop.permute.xlu2 %804  ;;  %v711_v60 = vadd.f32 %v703_v40, %v577_v15 }
 0x1f2   :  { %v837_v56 = vmul.f32 %v821_v51, %v5837_v47 }
 0x1f4   :  { %v845_v63 = vadd.f32 %v837_v56, %v711_v60 }
 0x1fa   :  { %v665_v28 = vpop.permute.xlu1 %664 }
 0x1fb   :  { %v702_v23 = vmul.f32 %v686_v16, %v665_v28  ;;  %v5075_v28 = vld [vmem:[%s6606_s0 + $0x80] sm:$0xff] }
 0x1fc   :  { %1563 = vmatpush.bf16.msrb.mxu1 %v5075_v28 }
 0x1fd   :  { %v710_v0 = vadd.f32 %v702_v23, %v576_v43  ;;  %v5093_v23 = vld [vmem:[%s6606_s0 + $0x110] sm:$0xff] }
 0x200   :  { %1836 = vmatpush.bf16.msra.mxu1 %v5094_v38  ;;  %v1871_v38 = vld [vmem:[#allocation2 + $0x10] sm:$0xff] }
 0x201   :  { %v1067_v42 = vpop.permute.xlu2 %1066 }
 0x202   :  { %v1104_v3 = vmul.f32 %v1088_v48, %v1067_v42 }
 0x204   :  { %1837 = vmatpush.bf16.msra.mxu1 %v5093_v23 }
 0x20a   :  { %v799_v39 = vpop.permute.xlu1 %798 }
 0x20b   :  { %v836_v8 = vmul.f32 %v820_v24, %v799_v39  ;;  %v5092_v24 = vld [vmem:[%s6606_s0 + $0x108] sm:$0xff] }
 0x20c   :  { %1838 = vmatpush.bf16.msra.mxu1 %v5092_v24  ;;  %v1872_v24 = vld [vmem:[#allocation2 + $0x18] sm:$0xff] }
 0x20d   :  { %v844_v34 = vadd.f32 %v836_v8, %v710_v0 }
 0x20f   :  { %v978_v57 = vadd.f32 %v970_v21, %v844_v34 }
 0x210   :  { %1839 = vmatpush.bf16.msra.mxu1 %v5091_v62 }
 0x211   :  { %v1201_v59 = vpop.permute.xlu2 %1200  ;;  %v1112_v10 = vadd.f32 %v1104_v3, %v978_v57 }
 0x212   :  { %v1238_v25 = vmul.f32 %v1222_v61, %v1201_v59 }
 0x214   :  { %v1246_v58 = vadd.f32 %v1238_v25, %v1112_v10 }
 0x216   :  { %v1254_v30 = vmax.f32 %v1246_v58, 0.0 }
 0x21a   :  { %v939_v32 = vpop.permute.xlu1 %938 }
 0x21b   :  { %v971_v17 = vmul.f32 %v955_v45, %v939_v32 }
 0x21d   :  { %v979_v47 = vadd.f32 %v971_v17, %v845_v63 }
 0x22a   :  { %v1073_v29 = vpop.permute.xlu1 %1072 }
 0x22b   :  { %v1105_v37 = vmul.f32 %v1089_v44, %v1073_v29 }
 0x22d   :  { %v1113_v13 = vadd.f32 %v1105_v37, %v979_v47 }
 0x22f   :  { %v1247_v39 = vadd.f32 %v1239_v12, %v1113_v13 }
 0x231   :  { %v1255_v14 = vmax.f32 %v1247_v39, 0.0 }
 0x233   :  { %v1267_v52 = vpack.c.bf16 %v1255_v14, %v1254_v30 }
 0x235   :  { %4350 = vmatmul.msk.bf16.gmra.mxu1 %vm63_vm0, %v1267_v52  ;;  %4378 = vmatmul.msk.bf16.gmra.mxu2 %vm63_vm0, %v1267_v52 }
 0x236   :  { %4406 = vmatmul.msk.bf16.gmra.mxu3 %vm63_vm0, %v1267_v52  ;;  %4434 = vmatmul.msk.bf16.gmra.mxu0 %vm63_vm0, %v1267_v52 }
 0x240   :  { %v1299_v16 = vpop.f32.mrf.mxu1 }
 0x241   :  { %1313 = vst.msk [vmem:[#allocation2 + $0x120] sm:$0xff] %vm63_vm0, %v1299_v16  ;;  %v1506_v19 = vpop.f32.mrf.mxu0 }
 0x242   :  { %1520 = vst.msk [vmem:[#allocation2 + $0x138] sm:$0xff] %vm63_vm0, %v1506_v19 }
 0x245   :  { %4459 = vmatmul.msk.bf16.vlgmr.msrb.gmra.mxu1 %vm63_vm0, %v5666_v36  ;;  %4487 = vmatmul.msk.bf16.vlgmr.msrb.gmra.mxu2 %vm63_vm0, %v5666_v36 }
 0x246   :  { %4515 = vmatmul.msk.bf16.vlgmr.msrb.gmra.mxu3 %vm63_vm0, %v5666_v36  ;;  %4543 = vmatmul.msk.bf16.vlgmr.msra.gmra.mxu0 %vm63_vm0, %v5666_v36  ;;  %v1368_v26 = vpop.f32.mrf.mxu2 }
 0x247   :  { %1382 = vst.msk [vmem:[#allocation2 + $0x128] sm:$0xff] %vm63_vm0, %v1368_v26  ;;  %v1437_v11 = vpop.f32.mrf.mxu3 }
 0x248   :  { %1451 = vst.msk [vmem:[#allocation2 + $0x130] sm:$0xff] %vm63_vm0, %v1437_v11  ;;  %v1301_v53 = vpop.f32.mrf.mxu1 }
 0x249   :  { %1314 = vst.msk [vmem:[#allocation2 + $0x168] sm:$0xff] %vm63_vm0, %v1301_v53  ;;  %v1508_v54 = vpop.f32.mrf.mxu0 }
 0x24a   :  { %1521 = vst.msk [vmem:[#allocation2 + $0x180] sm:$0xff] %vm63_vm0, %v1508_v54 }
 0x24e   :  { %v1370_v9 = vpop.f32.mrf.mxu2 }
 0x24f   :  { %1383 = vst.msk [vmem:[#allocation2 + $0x170] sm:$0xff] %vm63_vm0, %v1370_v9  ;;  %v1439_v49 = vpop.f32.mrf.mxu3 }
 0x250   :  { %1452 = vst.msk [vmem:[#allocation2 + $0x178] sm:$0xff] %vm63_vm0, %v1439_v49 }
 0x255   :  { %4460 = vmatmul.msk.bf16.gmra.mxu1 %vm63_vm0, %v5735_v18  ;;  %4488 = vmatmul.msk.bf16.gmra.mxu2 %vm63_vm0, %v5735_v18 }
 0x256   :  { %4516 = vmatmul.msk.bf16.gmra.mxu3 %vm63_vm0, %v5735_v18  ;;  %4544 = vmatmul.msk.bf16.gmra.mxu0 %vm63_vm0, %v5735_v18 }
 0x265   :  { %4461 = vmatmul.msk.bf16.gmra.mxu1 %vm63_vm0, %v5807_v27  ;;  %4489 = vmatmul.msk.bf16.gmra.mxu2 %vm63_vm0, %v5807_v27 }
 0x266   :  { %4517 = vmatmul.msk.bf16.gmra.mxu3 %vm63_vm0, %v5807_v27  ;;  %4545 = vmatmul.msk.bf16.gmra.mxu0 %vm63_vm0, %v5807_v27 }
 0x275   :  { %4462 = vmatmul.msk.bf16.gmra.mxu1 %vm63_vm0, %v1267_v52  ;;  %4490 = vmatmul.msk.bf16.gmra.mxu2 %vm63_vm0, %v1267_v52 }
 0x276   :  { %4518 = vmatmul.msk.bf16.gmra.mxu3 %vm63_vm0, %v1267_v52  ;;  %4546 = vmatmul.msk.bf16.gmra.mxu0 %vm63_vm0, %v1267_v52 }
 0x285   :  { %4571 = vmatmul.msk.bf16.vlgmr.msra.gmra.mxu1 %vm63_vm0, %v5666_v36 }
 0x295   :  { %4572 = vmatmul.msk.bf16.gmra.mxu1 %vm63_vm0, %v5735_v18 }
 0x2a5   :  { %4573 = vmatmul.msk.bf16.gmra.mxu1 %vm63_vm0, %v5807_v27 }
 0x2b2   :  { %v1304_v42 = vpop.f32.mrf.mxu1 }
 0x2b3   :  { %1315 = vst.msk [vmem:[#allocation2 + $0x1b0] sm:$0xff] %vm63_vm0, %v1304_v42  ;;  %v1511_v43 = vpop.f32.mrf.mxu0 }
 0x2b4   :  { %1522 = vst.msk [vmem:[#allocation2 + $0x1c8] sm:$0xff] %vm63_vm0, %v1511_v43 }
 0x2b5   :  { %4574 = vmatmul.msk.bf16.gmra.mxu1 %vm63_vm0, %v1267_v52 }
 0x2b8   :  { %v1373_v7 = vpop.f32.mrf.mxu2 }
 0x2b9   :  { %1384 = vst.msk [vmem:[#allocation2 + $0x1b8] sm:$0xff] %vm63_vm0, %v1373_v7  ;;  %v1442_v8 = vpop.f32.mrf.mxu3  ;;  %v1943_v7 = vpack.c.bf16 %v1871_v38, %v1871_v38 }
 0x2ba   :  { %1453 = vst.msk [vmem:[#allocation2 + $0x1c0] sm:$0xff] %vm63_vm0, %v1442_v8  ;;  %v1306_v36 = vpop.f32.mrf.mxu1 }
 0x2bb   :  { %1316 = vst.msk [vmem:[#allocation2 + $0x1f8] sm:$0xff] %vm63_vm0, %v1306_v36  ;;  %v1513_v18 = vpop.f32.mrf.mxu0  ;;  %v1870_v36 = vld [vmem:[#allocation2 + $0x8] sm:$0xff] }
 0x2bc   :  { %1523 = vst.msk [vmem:[#allocation2 + $0x210] sm:$0xff] %vm63_vm0, %v1513_v18 }
 0x2c0   :  { %v1375_v27 = vpop.f32.mrf.mxu2 }
 0x2c1   :  { %1385 = vst.msk [vmem:[#allocation2 + $0x200] sm:$0xff] %vm63_vm0, %v1375_v27  ;;  %v1444_v1 = vpop.f32.mrf.mxu3 }
 0x2c2   :  { %1454 = vst.msk [vmem:[#allocation2 + $0x208] sm:$0xff] %vm63_vm0, %v1444_v1  ;;  %v1565_v46 = vpop.f32.mrf.mxu1 }
 0x2c3   :  { %1585 = vst.msk [vmem:[#allocation2 + $0x20] sm:$0xff] %vm63_vm0, %v1565_v46  ;;  %v1772_v22 = vpop.f32.mrf.mxu0  ;;  %v1944_v46 = vpack.c.bf16 %v1872_v24, %v1872_v24 }
 0x2c4   :  { %1792 = vst.msk [vmem:[#allocation2 + $0x38] sm:$0xff] %vm63_vm0, %v1772_v22 }
 0x2c8   :  { %v1634_v5 = vpop.f32.mrf.mxu2 }
 0x2c9   :  { %1654 = vst.msk [vmem:[#allocation2 + $0x28] sm:$0xff] %vm63_vm0, %v1634_v5  ;;  %v1703_v51 = vpop.f32.mrf.mxu3 }
 0x2ca   :  { %1723 = vst.msk [vmem:[#allocation2 + $0x30] sm:$0xff] %vm63_vm0, %v1703_v51  ;;  %v1567_v0 = vpop.f32.mrf.mxu1  ;;  %v1873_v52 = vld [vmem:[#allocation2 + $0x20] sm:$0xff] }
 0x2cb   :  { %1586 = vst.msk [vmem:[#allocation2 + $0x68] sm:$0xff] %vm63_vm0, %v1567_v0  ;;  %v1774_v20 = vpop.f32.mrf.mxu0  ;;  %v1876_v12 = vld [vmem:[#allocation2 + $0x38] sm:$0xff]  ;;  %v1945_v9 = vpack.c.bf16 %v1873_v52, %v1873_v52  ;;  %v1869_v51 = vld [vmem:[#allocation2] sm:$0xff]  ;;  %v1942_v0 = vpack.c.bf16 %v1870_v36, %v1870_v36 }
 0x2cc   :  { %1793 = vst.msk [vmem:[#allocation2 + $0x80] sm:$0xff] %vm63_vm0, %v1774_v20  ;;  %v1948_v30 = vpack.c.bf16 %v1876_v12, %v1876_v12 }
 0x2cd   :  { %v2026_v1 = vunpack.c.l.b16 %v1945_v9  ;;  %v1889_v9 = vld [vmem:[#allocation2 + $0xa0] sm:$0xff] }
 0x2ce   :  { %v2029_v54 = vunpack.c.l.b16 %v1948_v30 }
 0x2d0   :  { %v1636_v31 = vpop.f32.mrf.mxu2  ;;  %v1874_v39 = vld [vmem:[#allocation2 + $0x28] sm:$0xff] }
 0x2d1   :  { %1655 = vst.msk [vmem:[#allocation2 + $0x70] sm:$0xff] %vm63_vm0, %v1636_v31  ;;  %v1705_v32 = vpop.f32.mrf.mxu3  ;;  %v1875_v29 = vld [vmem:[#allocation2 + $0x30] sm:$0xff]  ;;  %v1946_v19 = vpack.c.bf16 %v1874_v39, %v1874_v39 }
 0x2d2   :  { %1724 = vst.msk [vmem:[#allocation2 + $0x78] sm:$0xff] %vm63_vm0, %v1705_v32  ;;  %v1570_v28 = vpop.f32.mrf.mxu1  ;;  %v1947_v58 = vpack.c.bf16 %v1875_v29, %v1875_v29  ;;  %v1882_v20 = vld [vmem:[#allocation2 + $0x68] sm:$0xff]  ;;  %v2024_v32 = vunpack.c.l.b16 %v1943_v7 }
 0x2d3   :  { %1587 = vst.msk [vmem:[#allocation2 + $0xb0] sm:$0xff] %vm63_vm0, %v1570_v28  ;;  %v1777_v33 = vpop.f32.mrf.mxu0  ;;  %v1885_v62 = vld [vmem:[#allocation2 + $0x80] sm:$0xff]  ;;  %v2027_v43 = vunpack.c.l.b16 %v1946_v19  ;;  %v1890_v7 = vld [vmem:[#allocation2 + $0xa8] sm:$0xff] }
 0x2d4   :  { %1794 = vst.msk [vmem:[#allocation2 + $0xc8] sm:$0xff] %vm63_vm0, %v1777_v33  ;;  %v2028_v16 = vunpack.c.l.b16 %v1947_v58  ;;  %v1957_v22 = vpack.c.bf16 %v1885_v62, %v1885_v62 }
 0x2d5   :  { %v2033_v31 = vpack.c.b16 %v2027_v43, %v2026_v1  ;;  %v1961_v1 = vpack.c.bf16 %v1889_v9, %v1889_v9  ;;  %v1907_v9 = vld [vmem:[#allocation2 + $0x130] sm:$0xff] }
 0x2d6   :  { %v2034_v42 = vpack.c.b16 %v2029_v54, %v2028_v16  ;;  %v1256_v54 = vld [vmem:[%s6609_s3] sm:$0xf] }
 0x2d8   :  { %v1639_v50 = vpop.f32.mrf.mxu2  ;;  %v1883_v27 = vld [vmem:[#allocation2 + $0x70] sm:$0xff] }
 0x2d9   :  { %1656 = vst.msk [vmem:[#allocation2 + $0xb8] sm:$0xff] %vm63_vm0, %v1639_v50  ;;  %v1708_v15 = vpop.f32.mrf.mxu3  ;;  %v1884_v11 = vld [vmem:[#allocation2 + $0x78] sm:$0xff]  ;;  %v1955_v33 = vpack.c.bf16 %v1883_v27, %v1883_v27 }
 0x2da   :  { %1725 = vst.msk [vmem:[#allocation2 + $0xc0] sm:$0xff] %vm63_vm0, %v1708_v15  ;;  %v1572_v34 = vpop.f32.mrf.mxu1  ;;  %v1956_v8 = vpack.c.bf16 %v1884_v11, %v1884_v11  ;;  %v1880_v15 = vld [vmem:[#allocation2 + $0x58] sm:$0xff]  ;;  %v1891_v30 = vld [vmem:[#allocation2 + $0xb0] sm:$0xff] }
 0x2db   :  { %1588 = vst.msk [vmem:[#allocation2 + $0xf8] sm:$0xff] %vm63_vm0, %v1572_v34  ;;  %v1779_v2 = vpop.f32.mrf.mxu0 }
 0x2dc   :  { %1795 = vst.msk [vmem:[#allocation2 + $0x110] sm:$0xff] %vm63_vm0, %v1779_v2  ;;  %v2076_v28 = vunpack.c.l.b16 %v1956_v8  ;;  %v2025_v2 = vunpack.c.l.b16 %v1944_v46 }
 0x2e0   :  { %v1641_v35 = vpop.f32.mrf.mxu2  ;;  %v1892_v29 = vld [vmem:[#allocation2 + $0xb8] sm:$0xff] }
 0x2e1   :  { %1657 = vst.msk [vmem:[#allocation2 + $0x100] sm:$0xff] %vm63_vm0, %v1641_v35  ;;  %v1710_v21 = vpop.f32.mrf.mxu3  ;;  %v2077_v35 = vunpack.c.l.b16 %v1957_v22  ;;  %v1964_v16 = vpack.c.bf16 %v1892_v29, %v1892_v29 }
 0x2e2   :  { %1726 = vst.msk [vmem:[#allocation2 + $0x108] sm:$0xff] %vm63_vm0, %v1710_v21  ;;  %v1575_v41 = vpop.f32.mrf.mxu1  ;;  %v1941_v21 = vpack.c.bf16 %v1869_v51, %v1869_v51  ;;  %v1888_v51 = vld [vmem:[#allocation2 + $0x98] sm:$0xff] }
 0x2e3   :  { %1589 = vst.msk [vmem:[#allocation2 + $0x140] sm:$0xff] %vm63_vm0, %v1575_v41  ;;  %v1782_v40 = vpop.f32.mrf.mxu0  ;;  %v1954_v41 = vpack.c.bf16 %v1882_v20, %v1882_v20  ;;  %v1903_v62 = vld [vmem:[#allocation2 + $0x110] sm:$0xff] }
 0x2e4   :  { %1796 = vst.msk [vmem:[#allocation2 + $0x158] sm:$0xff] %vm63_vm0, %v1782_v40 }
 0x2e8   :  { %v1644_v56 = vpop.f32.mrf.mxu2  ;;  %v1901_v46 = vld [vmem:[#allocation2 + $0x100] sm:$0xff] }
 0x2e9   :  { %1658 = vst.msk [vmem:[#allocation2 + $0x148] sm:$0xff] %vm63_vm0, %v1644_v56  ;;  %v1713_v55 = vpop.f32.mrf.mxu3  ;;  %v1893_v56 = vld [vmem:[#allocation2 + $0xc0] sm:$0xff]  ;;  %v1902_v19 = vld [vmem:[#allocation2 + $0x108] sm:$0xff] }
 0x2ea   :  { %1727 = vst.msk [vmem:[#allocation2 + $0x150] sm:$0xff] %vm63_vm0, %v1713_v55  ;;  %v1577_v45 = vpop.f32.mrf.mxu1  ;;  %v2023_v55 = vunpack.c.l.b16 %v1942_v0  ;;  %v1974_v8 = vpack.c.bf16 %v1902_v19, %v1902_v19 }
 0x2eb   :  { %1590 = vst.msk [vmem:[#allocation2 + $0x188] sm:$0xff] %vm63_vm0, %v1577_v45  ;;  %v1784_v48 = vpop.f32.mrf.mxu0 }
 0x2ec   :  { %1797 = vst.msk [vmem:[#allocation2 + $0x1a0] sm:$0xff] %vm63_vm0, %v1784_v48  ;;  %v1881_v48 = vld [vmem:[#allocation2 + $0x60] sm:$0xff] }
 0x2f0   :  { %v1646_v59 = vpop.f32.mrf.mxu2 }
 0x2f1   :  { %1659 = vst.msk [vmem:[#allocation2 + $0x190] sm:$0xff] %vm63_vm0, %v1646_v59  ;;  %v1715_v60 = vpop.f32.mrf.mxu3  ;;  %v2032_v59 = vpack.c.b16 %v2025_v2, %v2024_v32  ;;  %v1900_v32 = vld [vmem:[#allocation2 + $0xf8] sm:$0xff] }
 0x2f2   :  { %1728 = vst.msk [vmem:[#allocation2 + $0x198] sm:$0xff] %vm63_vm0, %v1715_v60  ;;  %v1580_v57 = vpop.f32.mrf.mxu1  ;;  %v2082_v60 = vpack.c.b16 %v2077_v35, %v2076_v28  ;;  %v2118_v35 = vunpack.c.l.b16 %v1961_v1 }
 0x2f3   :  { %1591 = vst.msk [vmem:[#allocation2 + $0x1d0] sm:$0xff] %vm63_vm0, %v1580_v57  ;;  %v1787_v61 = vpop.f32.mrf.mxu0  ;;  %v2075_v57 = vunpack.c.l.b16 %v1955_v33  ;;  %v2168_v33 = vunpack.c.l.b16 %v1974_v8 }
 0x2f4   :  { %1798 = vst.msk [vmem:[#allocation2 + $0x1e8] sm:$0xff] %vm63_vm0, %v1787_v61  ;;  %v1952_v61 = vpack.c.bf16 %v1880_v15, %v1880_v15  ;;  %v1973_v15 = vpack.c.bf16 %v1901_v46, %v1901_v46 }
 0x2f8   :  { %v1649_v17 = vpop.f32.mrf.mxu2 }
 0x2f9   :  { %1660 = vst.msk [vmem:[#allocation2 + $0x1d8] sm:$0xff] %vm63_vm0, %v1649_v17  ;;  %v1718_v44 = vpop.f32.mrf.mxu3  ;;  %v1894_v17 = vld [vmem:[#allocation2 + $0xc8] sm:$0xff] }
 0x2fa   :  { %1729 = vst.msk [vmem:[#allocation2 + $0x1e0] sm:$0xff] %vm63_vm0, %v1718_v44  ;;  %v1582_v63 = vpop.f32.mrf.mxu1 }
 0x2fb   :  { %1592 = vst.msk [vmem:[#allocation2 + $0x218] sm:$0xff] %vm63_vm0, %v1582_v63  ;;  %v1789_v4 = vpop.f32.mrf.mxu0  ;;  %v1965_v63 = vpack.c.bf16 %v1893_v56, %v1893_v56 }
 0x2fc   :  { %1799 = vst.msk [vmem:[#allocation2 + $0x230] sm:$0xff] %vm63_vm0, %v1789_v4  ;;  %v1879_v4 = vld [vmem:[#allocation2 + $0x50] sm:$0xff] }
 0x2fd   :  { %v1951_v39 = vpack.c.bf16 %v1879_v4, %v1879_v4  ;;  %v2122_v52 = vunpack.c.l.b16 %v1965_v63  ;;  %v2167_v4 = vunpack.c.l.b16 %v1973_v15 }
 0x2ff   :  { %v2071_v43 = vunpack.c.l.b16 %v1951_v39 }
 0x300   :  { %v1651_v3 = vpop.f32.mrf.mxu2 }
 0x301   :  { %1661 = vst.msk [vmem:[#allocation2 + $0x220] sm:$0xff] %vm63_vm0, %v1651_v3  ;;  %v1720_v25 = vpop.f32.mrf.mxu3  ;;  %v2022_v3 = vunpack.c.l.b16 %v1941_v21  ;;  %v1960_v21 = vpack.c.bf16 %v1888_v51, %v1888_v51  ;;  %v1258_v51 = vld [vmem:[%s6609_s3 + $0x8] sm:$0xf] }
 0x302   :  { %1730 = vst.msk [vmem:[#allocation2 + $0x228] sm:$0xff] %vm63_vm0, %v1720_v25  ;;  %v1841_v6 = vpop.f32.mrf.mxu1  ;;  %v2074_v25 = vunpack.c.l.b16 %v1954_v41  ;;  %v1898_v41 = vld [vmem:[#allocation2 + $0xe8] sm:$0xff] }
 0x303   :  { %1861 = vst.msk [vmem:[#allocation2 + $0x40] sm:$0xff] %vm63_vm0, %v1841_v6  ;;  %v1953_v6 = vpack.c.bf16 %v1881_v48, %v1881_v48  ;;  %v2031_v12 = vpack.c.b16 %v2023_v55, %v2022_v3  ;;  %v1257_v55 = vld [vmem:[%s6609_s3 + $0x4] sm:$0xf]  ;;  %v1972_v48 = vpack.c.bf16 %v1900_v32, %v1900_v32  ;;  %v1970_v3 = vpack.c.bf16 %v1898_v41, %v1898_v41 }
 0x304   :  { %v2081_v58 = vpack.c.b16 %v2075_v57, %v2074_v25 }
 0x305   :  { %v2073_v38 = vunpack.c.l.b16 %v1953_v6  ;;  %v1897_v6 = vld [vmem:[#allocation2 + $0xe0] sm:$0xff] }
 0x30a   :  { %v1843_v10 = vpop.f32.mrf.mxu1  ;;  %v1877_v47 = vld [vmem:[#allocation2 + $0x40] sm:$0xff] }
 0x30b   :  { %1862 = vst.msk [vmem:[#allocation2 + $0x88] sm:$0xff] %vm63_vm0, %v1843_v10  ;;  %v1949_v37 = vpack.c.bf16 %v1877_v47, %v1877_v47  ;;  %v1966_v47 = vpack.c.bf16 %v1894_v17, %v1894_v17  ;;  %v1899_v17 = vld [vmem:[#allocation2 + $0xf0] sm:$0xff] }
 0x30d   :  { %v2030_v13 = vunpack.c.l.b16 %v1949_v37  ;;  %v1878_v37 = vld [vmem:[#allocation2 + $0x48] sm:$0xff] }
 0x30e   :  { %v1950_v11 = vpack.c.bf16 %v1878_v37, %v1878_v37  ;;  %v1910_v37 = vld [vmem:[#allocation2 + $0x148] sm:$0xff] }
 0x30f   :  { %v2035_v14 = vpack.c.b16 %v2030_v13, %v2030_v13  ;;  %v2072_v13 = vunpack.c.l.b16 %v1952_v61 }
 0x310   :  { %v2070_v22 = vunpack.c.l.b16 %v1950_v11  ;;  %v1982_v11 = vpack.c.bf16 %v1910_v37, %v1910_v37 }
 0x311   :  { %v2046_v26 = vsel %vm2044_vm1, %v2035_v14, 0 }
 0x312   :  { %v1846_v53 = vpop.f32.mrf.mxu1  ;;  %2051 = vmatpush.bf16.msra.mxu2 %v2046_v26  ;;  %v1886_v49 = vld [vmem:[#allocation2 + $0x88] sm:$0xff]  ;;  %v2079_v28 = vpack.c.b16 %v2071_v43, %v2070_v22  ;;  %v2213_v46 = vunpack.c.l.b16 %v1982_v11  ;;  %v1979_v22 = vpack.c.bf16 %v1907_v9, %v1907_v9 }
 0x313   :  { %1863 = vst.msk [vmem:[#allocation2 + $0xd0] sm:$0xff] %vm63_vm0, %v1846_v53  ;;  %v1958_v23 = vpack.c.bf16 %v1886_v49, %v1886_v49  ;;  %v2123_v49 = vunpack.c.l.b16 %v1966_v47 }
 0x314   :  { %v2210_v41 = vunpack.c.l.b16 %v1979_v22 }
 0x315   :  { %v2078_v18 = vunpack.c.l.b16 %v1958_v23  ;;  %v1963_v23 = vpack.c.bf16 %v1891_v30, %v1891_v30  ;;  %v2128_v36 = vpack.c.b16 %v2123_v49, %v2122_v52  ;;  %v1969_v52 = vpack.c.bf16 %v1897_v6, %v1897_v6  ;;  %v1930_v6 = vld [vmem:[#allocation2 + $0x1e8] sm:$0xff] }
 0x316   :  { %2052 = vmatpush.bf16.msra.mxu2 %v2034_v42  ;;  %v2080_v42 = vpack.c.b16 %v2073_v38, %v2072_v13 }
 0x317   :  { %v2083_v5 = vpack.c.b16 %v2078_v18, %v2078_v18  ;;  %v2121_v18 = vunpack.c.l.b16 %v1964_v16  ;;  %v2120_v0 = vunpack.c.l.b16 %v1963_v23  ;;  %v1909_v16 = vld [vmem:[#allocation2 + $0x140] sm:$0xff]  ;;  %v2163_v8 = vunpack.c.l.b16 %v1969_v52 }
 0x318   :  { %v2002_v52 = vpack.c.bf16 %v1930_v6, %v1930_v6 }
 0x319   :  { %v2092_v50 = vsel %vm2044_vm1, %v2083_v5, 0  ;;  %v1975_v5 = vpack.c.bf16 %v1903_v62, %v1903_v62 }
 0x31a   :  { %v1848_v34 = vpop.f32.mrf.mxu1  ;;  %2053 = vmatpush.bf16.msra.mxu2 %v2033_v31  ;;  %2097 = vmatpush.bf16.msra.mxu3 %v2092_v50  ;;  %v1895_v40 = vld [vmem:[#allocation2 + $0xd0] sm:$0xff]  ;;  %v1962_v31 = vpack.c.bf16 %v1890_v7, %v1890_v7  ;;  %v1920_v7 = vld [vmem:[#allocation2 + $0x198] sm:$0xff] }
 0x31b   :  { %1864 = vst.msk [vmem:[#allocation2 + $0x118] sm:$0xff] %vm63_vm0, %v1848_v34  ;;  %v1967_v45 = vpack.c.bf16 %v1895_v40, %v1895_v40  ;;  %v1887_v50 = vld [vmem:[#allocation2 + $0x90] sm:$0xff]  ;;  %v2127_v34 = vpack.c.b16 %v2121_v18, %v2120_v0  ;;  %v1908_v18 = vld [vmem:[#allocation2 + $0x138] sm:$0xff] }
 0x31c   :  { %v1911_v40 = vld [vmem:[#allocation2 + $0x150] sm:$0xff]  ;;  %v1959_v57 = vpack.c.bf16 %v1887_v50, %v1887_v50 }
 0x31d   :  { %v2124_v44 = vunpack.c.l.b16 %v1967_v45  ;;  %v2169_v45 = vunpack.c.l.b16 %v1975_v5  ;;  %v1983_v25 = vpack.c.bf16 %v1911_v40, %v1911_v40  ;;  %v1921_v5 = vld [vmem:[#allocation2 + $0x1a0] sm:$0xff]  ;;  %v1919_v50 = vld [vmem:[#allocation2 + $0x190] sm:$0xff] }
 0x31e   :  { %2054 = vmatpush.bf16.msra.mxu2 %v2032_v59  ;;  %2098 = vmatpush.bf16.msra.mxu3 %v2082_v60  ;;  %v2119_v60 = vunpack.c.l.b16 %v1962_v31  ;;  %v2116_v39 = vunpack.c.l.b16 %v1959_v57  ;;  %v1906_v31 = vld [vmem:[#allocation2 + $0x128] sm:$0xff] }
 0x31f   :  { %v2129_v10 = vpack.c.b16 %v2124_v44, %v2124_v44  ;;  %v1912_v44 = vld [vmem:[#allocation2 + $0x158] sm:$0xff]  ;;  %v2174_v63 = vpack.c.b16 %v2169_v45, %v2168_v33  ;;  %v2214_v38 = vunpack.c.l.b16 %v1983_v25  ;;  %v1980_v33 = vpack.c.bf16 %v1908_v18, %v1908_v18  ;;  %v1259_v57 = vld [vmem:[%s6609_s3 + $0xc] sm:$0xf] }
 0x320   :  { %v2126_v29 = vpack.c.b16 %v2119_v60, %v2118_v35  ;;  %v1984_v13 = vpack.c.bf16 %v1912_v44, %v1912_v44  ;;  %v1978_v40 = vpack.c.bf16 %v1906_v31, %v1906_v31  ;;  %v2307_v18 = vunpack.c.l.b16 %v2002_v52  ;;  %v5097_v52 = vld [vmem:[%s6606_s0 + $0x10] sm:$0xff] }
 0x321   :  { %v2138_v14 = vsel %vm2044_vm1, %v2129_v10, 0  ;;  %v2117_v10 = vunpack.c.l.b16 %v1960_v21 }
 0x322   :  { %v1851_v26 = vpop.f32.mrf.mxu1  ;;  %2055 = vmatpush.bf16.msra.mxu2 %v2031_v12  ;;  %2099 = vmatpush.bf16.msra.mxu3 %v2081_v58  ;;  %v1904_v53 = vld [vmem:[#allocation2 + $0x118] sm:$0xff]  ;;  %v2166_v12 = vunpack.c.l.b16 %v1972_v48  ;;  %v1971_v58 = vpack.c.bf16 %v1899_v17, %v1899_v17  ;;  %v1991_v48 = vpack.c.bf16 %v1919_v50, %v1919_v50 }
 0x323   :  { %1865 = vst.msk [vmem:[#allocation2 + $0x160] sm:$0xff] %vm63_vm0, %v1851_v26  ;;  %2143 = vmatpush.bf16.msrb.mxu0 %v2138_v14  ;;  %v1976_v24 = vpack.c.bf16 %v1904_v53, %v1904_v53  ;;  %v1896_v14 = vld [vmem:[#allocation2 + $0xd8] sm:$0xff]  ;;  %v2164_v26 = vunpack.c.l.b16 %v1970_v3  ;;  %v2125_v53 = vpack.c.b16 %v2117_v10, %v2116_v39  ;;  %v2209_v10 = vunpack.c.l.b16 %v1978_v40 }
 0x324   :  { %v2173_v19 = vpack.c.b16 %v2167_v4, %v2166_v12  ;;  %v2165_v23 = vunpack.c.l.b16 %v1971_v58  ;;  %v1968_v62 = vpack.c.bf16 %v1896_v14, %v1896_v14  ;;  %v2259_v58 = vunpack.c.l.b16 %v1991_v48  ;;  %v1924_v50 = vld [vmem:[#allocation2 + $0x1b8] sm:$0xff]  ;;  %v1923_v48 = vld [vmem:[#allocation2 + $0x1b0] sm:$0xff] }
 0x325   :  { %v2170_v27 = vunpack.c.l.b16 %v1976_v24  ;;  %4575 = vmatmul.msk.bf16.vlgmr.msra.gmra.mxu2 %vm2040_vm2, %v1256_v54  ;;  %v2215_v24 = vunpack.c.l.b16 %v1984_v13 }
 0x326   :  { %2100 = vmatpush.bf16.msra.mxu3 %v2080_v42  ;;  %v1981_v42 = vpack.c.bf16 %v1909_v16, %v1909_v16  ;;  %v2162_v32 = vunpack.c.l.b16 %v1968_v62  ;;  %v1915_v16 = vld [vmem:[#allocation2 + $0x170] sm:$0xff] }
 0x327   :  { %2144 = vmatpush.bf16.msrb.mxu0 %v2128_v36  ;;  %v2175_v20 = vpack.c.b16 %v2170_v27, %v2170_v27  ;;  %v2172_v27 = vpack.c.b16 %v2165_v23, %v2164_v26  ;;  %v2220_v1 = vpack.c.b16 %v2215_v24, %v2214_v38  ;;  %v5109_v24 = vld [vmem:[%s6606_s0 + $0x70] sm:$0xff] }
 0x328   :  { %v2171_v35 = vpack.c.b16 %v2163_v8, %v2162_v32  ;;  %v1925_v8 = vld [vmem:[#allocation2 + $0x1c0] sm:$0xff] }
 0x329   :  { %v2184_v2 = vsel %vm2044_vm1, %v2175_v20, 0  ;;  %v1992_v20 = vpack.c.bf16 %v1920_v7, %v1920_v7  ;;  %v1987_v7 = vpack.c.bf16 %v1915_v16, %v1915_v16  ;;  %v1933_v16 = vld [vmem:[#allocation2 + $0x200] sm:$0xff] }
 0x32a   :  { %v1853_v56 = vpop.f32.mrf.mxu1  ;;  %2101 = vmatpush.bf16.msra.mxu3 %v2079_v28  ;;  %2189 = vmatpush.bf16.msrb.mxu2 %v2184_v2  ;;  %v1913_v59 = vld [vmem:[#allocation2 + $0x160] sm:$0xff]  ;;  %v2212_v28 = vunpack.c.l.b16 %v1981_v42 }
 0x32b   :  { %1866 = vst.msk [vmem:[#allocation2 + $0x1a8] sm:$0xff] %vm63_vm0, %v1853_v56  ;;  %2145 = vmatpush.bf16.msrb.mxu0 %v2127_v34  ;;  %v1985_v61 = vpack.c.bf16 %v1913_v59, %v1913_v59  ;;  %v1993_v34 = vpack.c.bf16 %v1921_v5, %v1921_v5  ;;  %v1905_v2 = vld [vmem:[#allocation2 + $0x120] sm:$0xff]  ;;  %v1918_v56 = vld [vmem:[#allocation2 + $0x188] sm:$0xff]  ;;  %v2260_v45 = vunpack.c.l.b16 %v1992_v20  ;;  %v1939_v20 = vld [vmem:[#allocation2 + $0x230] sm:$0xff] }
 0x32c   :  { %v2219_v21 = vpack.c.b16 %v2213_v46, %v2212_v28  ;;  %v1929_v59 = vld [vmem:[#allocation2 + $0x1e0] sm:$0xff]  ;;  %v1977_v17 = vpack.c.bf16 %v1905_v2, %v1905_v2  ;;  %v1990_v3 = vpack.c.bf16 %v1918_v56, %v1918_v56  ;;  %v1260_v46 = vld [vmem:[%s6609_s3 + $0x10] sm:$0xf]  ;;  %v1997_v28 = vpack.c.bf16 %v1925_v8, %v1925_v8 }
 0x32d   :  { %4576 = vmatmul.msk.bf16.vlgmr.msra.gmra.mxu3 %vm2040_vm2, %v1257_v55  ;;  %v2216_v47 = vunpack.c.l.b16 %v1985_v61  ;;  %v2211_v61 = vunpack.c.l.b16 %v1980_v33  ;;  %v2261_v4 = vunpack.c.l.b16 %v1993_v34  ;;  %v2001_v37 = vpack.c.bf16 %v1929_v59, %v1929_v59 }
 0x32e   :  { %2190 = vmatpush.bf16.msrb.mxu2 %v2174_v63  ;;  %v1916_v63 = vld [vmem:[#allocation2 + $0x178] sm:$0xff]  ;;  %v2208_v14 = vunpack.c.l.b16 %v1977_v17  ;;  %v2258_v26 = vunpack.c.l.b16 %v1990_v3  ;;  %v2255_v2 = vunpack.c.l.b16 %v1987_v7  ;;  %v2011_v56 = vpack.c.bf16 %v1939_v20, %v1939_v20  ;;  %v5101_v7 = vld [vmem:[%s6606_s0 + $0x30] sm:$0xff]  ;;  %v5099_v20 = vld [vmem:[%s6606_s0 + $0x20] sm:$0xff] }
 0x32f   :  { %2146 = vmatpush.bf16.msrb.mxu0 %v2126_v29  ;;  %v2221_v30 = vpack.c.b16 %v2216_v47, %v2216_v47  ;;  %v2218_v29 = vpack.c.b16 %v2211_v61, %v2210_v41  ;;  %v1917_v47 = vld [vmem:[#allocation2 + $0x180] sm:$0xff]  ;;  %v2266_v12 = vpack.c.b16 %v2261_v4, %v2260_v45  ;;  %v1988_v39 = vpack.c.bf16 %v1916_v63, %v1916_v63  ;;  %v5098_v63 = vld [vmem:[%s6606_s0 + $0x18] sm:$0xff] }
 0x330   :  { %v1989_v11 = vpack.c.bf16 %v1917_v47, %v1917_v47  ;;  %v2306_v9 = vunpack.c.l.b16 %v2001_v37  ;;  %v2265_v62 = vpack.c.b16 %v2259_v58, %v2258_v26  ;;  %v1996_v59 = vpack.c.bf16 %v1924_v50, %v1924_v50 }
 0x331   :  { %v2230_v54 = vsel %vm2044_vm1, %v2221_v30, 0  ;;  %v1928_v30 = vld [vmem:[#allocation2 + $0x1d8] sm:$0xff]  ;;  %v2302_v61 = vunpack.c.l.b16 %v1997_v28 }
 0x332   :  { %v1856_v49 = vpop.f32.mrf.mxu1  ;;  %2191 = vmatpush.bf16.msrb.mxu2 %v2173_v19  ;;  %2235 = vmatpush.bf16.msrb.mxu3 %v2230_v54  ;;  %v1922_v43 = vld [vmem:[#allocation2 + $0x1a8] sm:$0xff]  ;;  %v5110_v19 = vld [vmem:[%s6606_s0 + $0x78] sm:$0xff]  ;;  %v2217_v54 = vpack.c.b16 %v2209_v10, %v2208_v14  ;;  %v2000_v23 = vpack.c.bf16 %v1928_v30, %v1928_v30  ;;  %v2257_v22 = vunpack.c.l.b16 %v1989_v11  ;;  %v2312_v31 = vpack.c.b16 %v2307_v18, %v2306_v9  ;;  %v1261_v30 = vld [vmem:[%s6609_s3 + $0x14] sm:$0xf] }
 0x333   :  { %1867 = vst.msk [vmem:[#allocation2 + $0x1f0] sm:$0xff] %vm63_vm0, %v1856_v49  ;;  %2147 = vmatpush.bf16.msrb.mxu0 %v2125_v53  ;;  %v1994_v36 = vpack.c.bf16 %v1922_v43, %v1922_v43  ;;  %v1927_v53 = vld [vmem:[#allocation2 + $0x1d0] sm:$0xff]  ;;  %v1914_v49 = vld [vmem:[#allocation2 + $0x168] sm:$0xff]  ;;  %2658 = vmatpush.bf16.msrb.mxu1 %v5110_v19  ;;  %v2256_v43 = vunpack.c.l.b16 %v1988_v39  ;;  %v1995_v10 = vpack.c.bf16 %v1923_v48, %v1923_v48  ;;  %v2301_v37 = vunpack.c.l.b16 %v1996_v59  ;;  %v1932_v11 = vld [vmem:[#allocation2 + $0x1f8] sm:$0xff] }
 0x334   :  { %v1986_v5 = vpack.c.bf16 %v1914_v49, %v1914_v49  ;;  %v2305_v32 = vunpack.c.l.b16 %v2000_v23  ;;  %v2005_v23 = vpack.c.bf16 %v1933_v16, %v1933_v16  ;;  %v5114_v48 = vld [vmem:[%s6606_s0 + $0x98] sm:$0xff] }
 0x335   :  { %v2262_v0 = vunpack.c.l.b16 %v1994_v36  ;;  %v1938_v36 = vld [vmem:[#allocation2 + $0x228] sm:$0xff]  ;;  %v2264_v34 = vpack.c.b16 %v2257_v22, %v2256_v43  ;;  %v2300_v19 = vunpack.c.l.b16 %v1995_v10  ;;  %v1262_v43 = vld [vmem:[%s6609_s3 + $0x18] sm:$0xf]  ;;  %v1263_v22 = vld [vmem:[%s6609_s3 + $0x1c] sm:$0xf] }
 0x336   :  { %2192 = vmatpush.bf16.msrb.mxu2 %v2172_v27  ;;  %2236 = vmatpush.bf16.msrb.mxu3 %v2220_v1  ;;  %v1999_v27 = vpack.c.bf16 %v1927_v53, %v1927_v53  ;;  %v2010_v33 = vpack.c.bf16 %v1938_v36, %v1938_v36  ;;  %v5102_v53 = vld [vmem:[%s6606_s0 + $0x38] sm:$0xff]  ;;  %v2347_v36 = vunpack.c.l.b16 %v2005_v23  ;;  %v5120_v10 = vld [vmem:[%s6606_s0 + $0xc8] sm:$0xff]  ;;  %v5129_v23 = vld [vmem:[%s6606_s0 + $0x110] sm:$0xff] }
 0x337   :  { %v2267_v15 = vpack.c.b16 %v2262_v0, %v2262_v0  ;;  %4577 = vmatmul.msk.bf16.vlgmr.msrb.gmra.mxu0 %vm2040_vm2, %v1258_v51  ;;  %v1926_v0 = vld [vmem:[#allocation2 + $0x1c8] sm:$0xff]  ;;  %2659 = vmatpush.bf16.msrb.mxu1 %v5109_v24  ;;  %v5118_v59 = vld [vmem:[%s6606_s0 + $0xb8] sm:$0xff] }
 0x338   :  { %v2304_v41 = vunpack.c.l.b16 %v1999_v27  ;;  %v1998_v40 = vpack.c.bf16 %v1926_v0, %v1926_v0  ;;  %v2352_v17 = vunpack.c.l.b16 %v2010_v33  ;;  %v5096_v24 = vld [vmem:[%s6606_s0 + $0x8] sm:$0xff]  ;;  %v5106_v27 = vld [vmem:[%s6606_s0 + $0x58] sm:$0xff]  ;;  %v5095_v0 = vld [vmem:[%s6606_s0] sm:$0xff] }
 0x339   :  { %v2276_v55 = vsel %vm2044_vm1, %v2267_v15, 0  ;;  %v5108_v15 = vld [vmem:[%s6606_s0 + $0x68] sm:$0xff] }
 0x33a   :  { %v1858_v60 = vpop.f32.mrf.mxu1  ;;  %2193 = vmatpush.bf16.msrb.mxu2 %v2171_v35  ;;  %2237 = vmatpush.bf16.msrb.mxu3 %v2219_v21  ;;  %v1931_v44 = vld [vmem:[#allocation2 + $0x1f0] sm:$0xff]  ;;  %v1937_v21 = vld [vmem:[#allocation2 + $0x220] sm:$0xff]  ;;  %v2303_v6 = vunpack.c.l.b16 %v1998_v40 }
 0x33b   :  { %1868 = vst.msk [vmem:[#allocation2 + $0x238] sm:$0xff] %vm63_vm0, %v1858_v60  ;;  %2281 = vmatpush.bf16.msra.mxu0 %v2276_v55  ;;  %v2003_v25 = vpack.c.bf16 %v1931_v44, %v1931_v44  ;;  %v2254_v55 = vunpack.c.l.b16 %v1986_v5  ;;  %v1936_v60 = vld [vmem:[#allocation2 + $0x218] sm:$0xff]  ;;  %v2009_v44 = vpack.c.bf16 %v1937_v21, %v1937_v21  ;;  %2660 = vmatpush.bf16.msrb.mxu1 %v5108_v15  ;;  %v5105_v5 = vld [vmem:[%s6606_s0 + $0x50] sm:$0xff] }
 0x33c   :  { %v2008_v47 = vpack.c.bf16 %v1936_v60, %v1936_v60  ;;  %v2310_v58 = vpack.c.b16 %v2303_v6, %v2302_v61  ;;  %v5122_v60 = vld [vmem:[%s6606_s0 + $0xd8] sm:$0xff]  ;;  %v5113_v61 = vld [vmem:[%s6606_s0 + $0x90] sm:$0xff] }
 0x33d   :  { %4578 = vmatmul.msk.bf16.vlgmr.msrb.gmra.mxu2 %vm2040_vm2, %v1259_v57  ;;  %v2308_v13 = vunpack.c.l.b16 %v2003_v25  ;;  %v2311_v57 = vpack.c.b16 %v2305_v32, %v2304_v41  ;;  %v2263_v4 = vpack.c.b16 %v2255_v2, %v2254_v55  ;;  %v1934_v25 = vld [vmem:[#allocation2 + $0x208] sm:$0xff]  ;;  %v2351_v39 = vunpack.c.l.b16 %v2009_v44  ;;  %v5107_v32 = vld [vmem:[%s6606_s0 + $0x60] sm:$0xff] }
 0x33e   :  { %2238 = vmatpush.bf16.msrb.mxu3 %v2218_v29  ;;  %v2353_v29 = vunpack.c.l.b16 %v2011_v56  ;;  %v2006_v14 = vpack.c.bf16 %v1934_v25, %v1934_v25  ;;  %v2350_v26 = vunpack.c.l.b16 %v2008_v47  ;;  %v5112_v25 = vld [vmem:[%s6606_s0 + $0x88] sm:$0xff] }
 0x33f   :  { %2282 = vmatpush.bf16.msra.mxu0 %v2266_v12  ;;  %v2313_v38 = vpack.c.b16 %v2308_v13, %v2308_v13  ;;  %v1935_v12 = vld [vmem:[#allocation2 + $0x210] sm:$0xff]  ;;  %2661 = vmatpush.bf16.msrb.mxu1 %v5107_v32 }
 0x340   :  { %v2358_v13 = vpack.c.b16 %v2353_v29, %v2352_v17  ;;  %v2357_v9 = vpack.c.b16 %v2351_v39, %v2350_v26  ;;  %v2348_v49 = vunpack.c.l.b16 %v2006_v14  ;;  %v5116_v29 = vld [vmem:[%s6606_s0 + $0xa8] sm:$0xff]  ;;  %v5115_v39 = vld [vmem:[%s6606_s0 + $0xa0] sm:$0xff] }
 0x341   :  { %v2322_v42 = vsel %vm2044_vm1, %v2313_v38, 0  ;;  %v2007_v38 = vpack.c.bf16 %v1935_v12, %v1935_v12  ;;  %v5124_v12 = vld [vmem:[%s6606_s0 + $0xe8] sm:$0xff] }
 0x342   :  { %2239 = vmatpush.bf16.msrb.mxu3 %v2217_v54  ;;  %2327 = vmatpush.bf16.msra.mxu2 %v2322_v42  ;;  %v1940_v1 = vld [vmem:[#allocation2 + $0x238] sm:$0xff]  ;;  %v2309_v54 = vpack.c.b16 %v2301_v37, %v2300_v19  ;;  %v2004_v42 = vpack.c.bf16 %v1932_v11, %v1932_v11 }
 0x343   :  { %2283 = vmatpush.bf16.msra.mxu0 %v2265_v62  ;;  %v2012_v51 = vpack.c.bf16 %v1940_v1, %v1940_v1  ;;  %v2349_v62 = vunpack.c.l.b16 %v2007_v38  ;;  %v5100_v1 = vld [vmem:[%s6606_s0 + $0x28] sm:$0xff] }
 0x344   :  { %v2346_v18 = vunpack.c.l.b16 %v2004_v42 }
 0x345   :  { %v2354_v35 = vunpack.c.l.b16 %v2012_v51  ;;  %4579 = vmatmul.msk.bf16.vlgmr.msrb.gmra.mxu3 %vm2040_vm2, %v1260_v46  ;;  %v2356_v8 = vpack.c.b16 %v2349_v62, %v2348_v49  ;;  %v5104_v51 = vld [vmem:[%s6606_s0 + $0x48] sm:$0xff]  ;;  %v5130_v49 = vld [vmem:[%s6606_s0 + $0x118] sm:$0xff]  ;;  %v5127_v62 = vld [vmem:[%s6606_s0 + $0x100] sm:$0xff] }
 0x346   :  { %2328 = vmatpush.bf16.msra.mxu2 %v2312_v31  ;;  %v2355_v46 = vpack.c.b16 %v2347_v36, %v2346_v18  ;;  %v5103_v31 = vld [vmem:[%s6606_s0 + $0x40] sm:$0xff] }
 0x347   :  { %2284 = vmatpush.bf16.msra.mxu0 %v2264_v34  ;;  %v2359_v45 = vpack.c.b16 %v2354_v35, %v2354_v35 }
 0x349   :  { %v2368_v3 = vsel %vm2044_vm1, %v2359_v45, 0 }
 0x34a   :  { %2329 = vmatpush.bf16.msra.mxu2 %v2311_v57  ;;  %2373 = vmatpush.bf16.msra.mxu3 %v2368_v3  ;;  %v5126_v57 = vld [vmem:[%s6606_s0 + $0xf8] sm:$0xff]  ;;  %v5125_v3 = vld [vmem:[%s6606_s0 + $0xf0] sm:$0xff] }
 0x34b   :  { %2285 = vmatpush.bf16.msra.mxu0 %v2263_v4  ;;  %v5121_v4 = vld [vmem:[%s6606_s0 + $0xd0] sm:$0xff]  ;;  %2934 = vmatpush.bf16.msra.mxu1 %v5126_v57 }
 0x34e   :  { %2330 = vmatpush.bf16.msra.mxu2 %v2310_v58  ;;  %2374 = vmatpush.bf16.msra.mxu3 %v2358_v13  ;;  %v5111_v58 = vld [vmem:[%s6606_s0 + $0x80] sm:$0xff] }
 0x34f   :  { %2451 = vmatpush.bf16.msrb.mxu0 %v5098_v63  ;;  %v5117_v63 = vld [vmem:[%s6606_s0 + $0xb0] sm:$0xff]  ;;  %2935 = vmatpush.bf16.msra.mxu1 %v5125_v3 }
 0x350   :  { %4580 = vmatmul.msk.bf16.vlgmr.msra.gmra.mxu0 %vm2040_vm2, %v1261_v30  ;;  %v5119_v30 = vld [vmem:[%s6606_s0 + $0xc0] sm:$0xff] }
 0x352   :  { %2331 = vmatpush.bf16.msra.mxu2 %v2309_v54  ;;  %2375 = vmatpush.bf16.msra.mxu3 %v2357_v9 }
 0x353   :  { %2452 = vmatpush.bf16.msrb.mxu0 %v5097_v52  ;;  %2936 = vmatpush.bf16.msra.mxu1 %v5124_v12  ;;  %v5123_v52 = vld [vmem:[%s6606_s0 + $0xe0] sm:$0xff] }
 0x355   :  { %4581 = vmatmul.msk.bf16.vlgmr.msra.gmra.mxu2 %vm2040_vm2, %v1262_v43 }
 0x356   :  { %2520 = vmatpush.bf16.msrb.mxu2 %v5102_v53  ;;  %2376 = vmatpush.bf16.msra.mxu3 %v2356_v8 }
 0x357   :  { %2453 = vmatpush.bf16.msrb.mxu0 %v5096_v24  ;;  %2937 = vmatpush.bf16.msra.mxu1 %v5123_v52  ;;  %v5128_v24 = vld [vmem:[%s6606_s0 + $0x108] sm:$0xff]  ;;  %s4121_s0 = sshll.u32 %s6613_s7, 4  ;;  %s4122_s0 = int_to_ptr.hbm [resolvable:$true] %s4121_s0 }
 0x35a   :  { %2521 = vmatpush.bf16.msrb.mxu2 %v5101_v7  ;;  %2377 = vmatpush.bf16.msra.mxu3 %v2355_v46 }
 0x35b   :  { %2454 = vmatpush.bf16.msrb.mxu0 %v5095_v0 }
 0x35d   :  { %4582 = vmatmul.msk.bf16.vlgmr.msra.gmra.mxu3 %vm2040_vm2, %v1263_v22 }
 0x35e   :  { %2589 = vmatpush.bf16.msrb.mxu3 %v5106_v27  ;;  %2522 = vmatpush.bf16.msrb.mxu2 %v5100_v1 }
 0x35f   :  { %2727 = vmatpush.bf16.msra.mxu0 %v5114_v48 }
 0x362   :  { %2590 = vmatpush.bf16.msrb.mxu3 %v5105_v5  ;;  %2523 = vmatpush.bf16.msrb.mxu2 %v5099_v20 }
 0x363   :  { %2728 = vmatpush.bf16.msra.mxu0 %v5113_v61 }
 0x366   :  { %2591 = vmatpush.bf16.msrb.mxu3 %v5104_v51  ;;  %2796 = vmatpush.bf16.msra.mxu2 %v5118_v59 }
 0x367   :  { %2729 = vmatpush.bf16.msra.mxu0 %v5112_v25 }
 0x36a   :  { %2592 = vmatpush.bf16.msrb.mxu3 %v5103_v31  ;;  %2797 = vmatpush.bf16.msra.mxu2 %v5117_v63 }
 0x36b   :  { %2730 = vmatpush.bf16.msra.mxu0 %v5111_v58 }
 0x36e   :  { %2865 = vmatpush.bf16.msra.mxu3 %v5122_v60  ;;  %2798 = vmatpush.bf16.msra.mxu2 %v5116_v29 }
 0x372   :  { %2866 = vmatpush.bf16.msra.mxu3 %v5121_v4  ;;  %2799 = vmatpush.bf16.msra.mxu2 %v5115_v39 }
 0x376   :  { %2867 = vmatpush.bf16.msra.mxu3 %v5120_v10 }
 0x37a   :  { %2868 = vmatpush.bf16.msra.mxu3 %v5119_v30 }
 0x3a8   :  { %v2057_v28 = vpop.f32.mrf.mxu2 }
 0x3a9   :  { %v2383_v33 = vmax.f32 %v2057_v28, 0.0 }
 0x3b0   :  { %v2103_v50 = vpop.f32.mrf.mxu3  ;;  %v2059_v15 = vpop.f32.mrf.mxu2 }
 0x3b1   :  { %v2384_v34 = vmax.f32 %v2103_v50, 0.0 }
 0x3b3   :  { %v6092_v2 = vpack.c.bf16 %v2384_v34, %v2383_v33 }
 0x3b4   :  { %v2149_v35 = vpop.f32.mrf.mxu0 }
 0x3b5   :  { %4599 = vmatmul.msk.bf16.vlgmr.msrb.gmra.mxu0 %vm63_vm0, %v6092_v2  ;;  %4627 = vmatmul.msk.bf16.vlgmr.msrb.gmra.mxu2 %vm63_vm0, %v6092_v2  ;;  %v2385_v40 = vmax.f32 %v2149_v35, 0.0 }
 0x3b6   :  { %4655 = vmatmul.msk.bf16.vlgmr.msrb.gmra.mxu3 %vm63_vm0, %v6092_v2  ;;  %4683 = vmatmul.msk.bf16.vlgmr.msrb.gmra.mxu1 %vm63_vm0, %v6092_v2 }
 0x3b7   :  { %3003 = vmatpush.bf16.msrb.mxu0 %v5130_v49 }
 0x3b8   :  { %v2105_v21 = vpop.f32.mrf.mxu3 }
 0x3bb   :  { %3004 = vmatpush.bf16.msrb.mxu0 %v5129_v23 }
 0x3bc   :  { %v2151_v41 = vpop.f32.mrf.mxu0 }
 0x3bf   :  { %3005 = vmatpush.bf16.msrb.mxu0 %v5128_v24 }
 0x3c0   :  { %v2195_v56 = vpop.f32.mrf.mxu2 }
 0x3c1   :  { %v2386_v55 = vmax.f32 %v2195_v56, 0.0 }
 0x3c3   :  { %v6102_v45 = vpack.c.bf16 %v2386_v55, %v2385_v40  ;;  %3006 = vmatpush.bf16.msrb.mxu0 %v5127_v62 }
 0x3c5   :  { %4600 = vmatmul.msk.bf16.gmra.mxu0 %vm63_vm0, %v6102_v45  ;;  %4628 = vmatmul.msk.bf16.gmra.mxu2 %vm63_vm0, %v6102_v45 }
 0x3c6   :  { %4656 = vmatmul.msk.bf16.gmra.mxu3 %vm63_vm0, %v6102_v45  ;;  %4684 = vmatmul.msk.bf16.gmra.mxu1 %vm63_vm0, %v6102_v45 }
 0x3c8   :  { %v2197_v17 = vpop.f32.mrf.mxu2  ;;  %v2241_v44 = vpop.f32.mrf.mxu3 }
 0x3c9   :  { %v2387_v47 = vmax.f32 %v2241_v44, 0.0 }
 0x3cd   :  { %v2287_v6 = vpop.f32.mrf.mxu0 }
 0x3ce   :  { %v2388_v37 = vmax.f32 %v2287_v6, 0.0 }
 0x3d0   :  { %v2243_v13 = vpop.f32.mrf.mxu3  ;;  %v6157_v14 = vpack.c.bf16 %v2388_v37, %v2387_v47 }
 0x3d5   :  { %v2289_v16 = vpop.f32.mrf.mxu0  ;;  %4601 = vmatmul.msk.bf16.gmra.mxu0 %vm63_vm0, %v6157_v14  ;;  %4629 = vmatmul.msk.bf16.gmra.mxu2 %vm63_vm0, %v6157_v14 }
 0x3d6   :  { %4657 = vmatmul.msk.bf16.gmra.mxu3 %vm63_vm0, %v6157_v14  ;;  %4685 = vmatmul.msk.bf16.gmra.mxu1 %vm63_vm0, %v6157_v14 }
 0x3d8   :  { %v2333_v19 = vpop.f32.mrf.mxu2 }
 0x3d9   :  { %v2389_v26 = vmax.f32 %v2333_v19, 0.0 }
 0x3e0   :  { %v2379_v38 = vpop.f32.mrf.mxu3  ;;  %v2335_v11 = vpop.f32.mrf.mxu2 }
 0x3e1   :  { %v2390_v53 = vmax.f32 %v2379_v38, 0.0 }
 0x3e3   :  { %v6170_v54 = vpack.c.bf16 %v2390_v53, %v2389_v26 }
 0x3e5   :  { %4602 = vmatmul.msk.bf16.gmra.mxu0 %vm63_vm0, %v6170_v54  ;;  %4630 = vmatmul.msk.bf16.gmra.mxu2 %vm63_vm0, %v6170_v54 }
 0x3e6   :  { %4658 = vmatmul.msk.bf16.gmra.mxu3 %vm63_vm0, %v6170_v54  ;;  %4686 = vmatmul.msk.bf16.gmra.mxu1 %vm63_vm0, %v6170_v54 }
 0x3e8   :  { %v2381_v9 = vpop.f32.mrf.mxu3 }
 0x3f5   :  { %4711 = vmatmul.msk.bf16.vlgmr.msra.gmra.mxu0 %vm63_vm0, %v6092_v2  ;;  %4739 = vmatmul.msk.bf16.vlgmr.msra.gmra.mxu2 %vm63_vm0, %v6092_v2 }
 0x3f6   :  { %4767 = vmatmul.msk.bf16.vlgmr.msra.gmra.mxu3 %vm63_vm0, %v6092_v2  ;;  %4795 = vmatmul.msk.bf16.vlgmr.msra.gmra.mxu1 %vm63_vm0, %v6092_v2 }
 0x405   :  { %4712 = vmatmul.msk.bf16.gmra.mxu0 %vm63_vm0, %v6102_v45  ;;  %4740 = vmatmul.msk.bf16.gmra.mxu2 %vm63_vm0, %v6102_v45 }
 0x406   :  { %4768 = vmatmul.msk.bf16.gmra.mxu3 %vm63_vm0, %v6102_v45  ;;  %4796 = vmatmul.msk.bf16.gmra.mxu1 %vm63_vm0, %v6102_v45 }
 0x415   :  { %4713 = vmatmul.msk.bf16.gmra.mxu0 %vm63_vm0, %v6157_v14  ;;  %4741 = vmatmul.msk.bf16.gmra.mxu2 %vm63_vm0, %v6157_v14 }
 0x416   :  { %4769 = vmatmul.msk.bf16.gmra.mxu3 %vm63_vm0, %v6157_v14  ;;  %4797 = vmatmul.msk.bf16.gmra.mxu1 %vm63_vm0, %v6157_v14 }
 0x425   :  { %4714 = vmatmul.msk.bf16.gmra.mxu0 %vm63_vm0, %v6170_v54  ;;  %4742 = vmatmul.msk.bf16.gmra.mxu2 %vm63_vm0, %v6170_v54 }
 0x426   :  { %4770 = vmatmul.msk.bf16.gmra.mxu3 %vm63_vm0, %v6170_v54  ;;  %4798 = vmatmul.msk.bf16.gmra.mxu1 %vm63_vm0, %v6170_v54 }
 0x432   :  { %v2456_v42 = vpop.f32.mrf.mxu0 }
 0x433   :  { %2476 = vst.msk [vmem:[#allocation2] sm:$0xff] %vm63_vm0, %v2456_v42  ;;  %v2663_v43 = vpop.f32.mrf.mxu1 }
 0x434   :  { %2683 = vst.msk [vmem:[#allocation2 + $0x18] sm:$0xff] %vm63_vm0, %v2663_v43 }
 0x435   :  { %4823 = vmatmul.msk.bf16.vlgmr.msrb.gmra.mxu0 %vm63_vm0, %v6092_v2 }
 0x438   :  { %v2525_v7 = vpop.f32.mrf.mxu2 }
 0x439   :  { %2545 = vst.msk [vmem:[#allocation2 + $0x8] sm:$0xff] %vm63_vm0, %v2525_v7  ;;  %v2594_v8 = vpop.f32.mrf.mxu3 }
 0x43a   :  { %2614 = vst.msk [vmem:[#allocation2 + $0x10] sm:$0xff] %vm63_vm0, %v2594_v8  ;;  %v2458_v36 = vpop.f32.mrf.mxu0 }
 0x43b   :  { %2477 = vst.msk [vmem:[#allocation2 + $0x48] sm:$0xff] %vm63_vm0, %v2458_v36  ;;  %v2665_v18 = vpop.f32.mrf.mxu1 }
 0x43c   :  { %2684 = vst.msk [vmem:[#allocation2 + $0x60] sm:$0xff] %vm63_vm0, %v2665_v18 }
 0x440   :  { %v2527_v27 = vpop.f32.mrf.mxu2 }
 0x441   :  { %2546 = vst.msk [vmem:[#allocation2 + $0x50] sm:$0xff] %vm63_vm0, %v2527_v27  ;;  %v2596_v1 = vpop.f32.mrf.mxu3 }
 0x442   :  { %2615 = vst.msk [vmem:[#allocation2 + $0x58] sm:$0xff] %vm63_vm0, %v2596_v1  ;;  %v2461_v46 = vpop.f32.mrf.mxu0 }
 0x443   :  { %2478 = vst.msk [vmem:[#allocation2 + $0x90] sm:$0xff] %vm63_vm0, %v2461_v46  ;;  %v2668_v22 = vpop.f32.mrf.mxu1 }
 0x444   :  { %2685 = vst.msk [vmem:[#allocation2 + $0xa8] sm:$0xff] %vm63_vm0, %v2668_v22 }
 0x445   :  { %4824 = vmatmul.msk.bf16.gmra.mxu0 %vm63_vm0, %v6102_v45 }
 0x448   :  { %v2530_v5 = vpop.f32.mrf.mxu2 }
 0x449   :  { %2547 = vst.msk [vmem:[#allocation2 + $0x98] sm:$0xff] %vm63_vm0, %v2530_v5  ;;  %v2599_v51 = vpop.f32.mrf.mxu3 }
 0x44a   :  { %2616 = vst.msk [vmem:[#allocation2 + $0xa0] sm:$0xff] %vm63_vm0, %v2599_v51  ;;  %v2463_v0 = vpop.f32.mrf.mxu0 }
 0x44b   :  { %2479 = vst.msk [vmem:[#allocation2 + $0xd8] sm:$0xff] %vm63_vm0, %v2463_v0  ;;  %v2670_v20 = vpop.f32.mrf.mxu1 }
 0x44c   :  { %2686 = vst.msk [vmem:[#allocation2 + $0xf0] sm:$0xff] %vm63_vm0, %v2670_v20 }
 0x450   :  { %v2532_v31 = vpop.f32.mrf.mxu2 }
 0x451   :  { %2548 = vst.msk [vmem:[#allocation2 + $0xe0] sm:$0xff] %vm63_vm0, %v2532_v31  ;;  %v2601_v32 = vpop.f32.mrf.mxu3 }
 0x452   :  { %2617 = vst.msk [vmem:[#allocation2 + $0xe8] sm:$0xff] %vm63_vm0, %v2601_v32  ;;  %v2466_v28 = vpop.f32.mrf.mxu0  ;;  %v3038_v32 = vld [vmem:[#allocation2 + $0x10] sm:$0xff] }
 0x453   :  { %2480 = vst.msk [vmem:[#allocation2 + $0x120] sm:$0xff] %vm63_vm0, %v2466_v28  ;;  %v2673_v33 = vpop.f32.mrf.mxu1 }
 0x454   :  { %2687 = vst.msk [vmem:[#allocation2 + $0x138] sm:$0xff] %vm63_vm0, %v2673_v33 }
 0x455   :  { %4825 = vmatmul.msk.bf16.gmra.mxu0 %vm63_vm0, %v6157_v14 }
 0x458   :  { %v2535_v50 = vpop.f32.mrf.mxu2 }
 0x459   :  { %2549 = vst.msk [vmem:[#allocation2 + $0x128] sm:$0xff] %vm63_vm0, %v2535_v50  ;;  %v2604_v15 = vpop.f32.mrf.mxu3 }
 0x45a   :  { %2618 = vst.msk [vmem:[#allocation2 + $0x130] sm:$0xff] %vm63_vm0, %v2604_v15  ;;  %v2468_v34 = vpop.f32.mrf.mxu0 }
 0x45b   :  { %2481 = vst.msk [vmem:[#allocation2 + $0x168] sm:$0xff] %vm63_vm0, %v2468_v34  ;;  %v2675_v2 = vpop.f32.mrf.mxu1 }
 0x45c   :  { %2688 = vst.msk [vmem:[#allocation2 + $0x180] sm:$0xff] %vm63_vm0, %v2675_v2 }
 0x460   :  { %v2537_v35 = vpop.f32.mrf.mxu2 }
 0x461   :  { %2550 = vst.msk [vmem:[#allocation2 + $0x170] sm:$0xff] %vm63_vm0, %v2537_v35  ;;  %v2606_v21 = vpop.f32.mrf.mxu3  ;;  %v3039_v35 = vld [vmem:[#allocation2 + $0x18] sm:$0xff] }
 0x462   :  { %2619 = vst.msk [vmem:[#allocation2 + $0x178] sm:$0xff] %vm63_vm0, %v2606_v21  ;;  %v2471_v41 = vpop.f32.mrf.mxu0 }
 0x463   :  { %2482 = vst.msk [vmem:[#allocation2 + $0x1b0] sm:$0xff] %vm63_vm0, %v2471_v41  ;;  %v2678_v40 = vpop.f32.mrf.mxu1 }
 0x464   :  { %2689 = vst.msk [vmem:[#allocation2 + $0x1c8] sm:$0xff] %vm63_vm0, %v2678_v40 }
 0x465   :  { %4826 = vmatmul.msk.bf16.gmra.mxu0 %vm63_vm0, %v6170_v54 }
 0x468   :  { %v2540_v56 = vpop.f32.mrf.mxu2 }
 0x469   :  { %2551 = vst.msk [vmem:[#allocation2 + $0x1b8] sm:$0xff] %vm63_vm0, %v2540_v56  ;;  %v2609_v55 = vpop.f32.mrf.mxu3  ;;  %v3110_v56 = vpack.c.bf16 %v3038_v32, %v3038_v32 }
 0x46a   :  { %2620 = vst.msk [vmem:[#allocation2 + $0x1c0] sm:$0xff] %vm63_vm0, %v2609_v55  ;;  %v2473_v45 = vpop.f32.mrf.mxu0 }
 0x46b   :  { %2483 = vst.msk [vmem:[#allocation2 + $0x1f8] sm:$0xff] %vm63_vm0, %v2473_v45  ;;  %v2680_v48 = vpop.f32.mrf.mxu1  ;;  %v3037_v45 = vld [vmem:[#allocation2 + $0x8] sm:$0xff] }
 0x46c   :  { %2690 = vst.msk [vmem:[#allocation2 + $0x210] sm:$0xff] %vm63_vm0, %v2680_v48 }
 0x470   :  { %v2542_v59 = vpop.f32.mrf.mxu2 }
 0x471   :  { %2552 = vst.msk [vmem:[#allocation2 + $0x200] sm:$0xff] %vm63_vm0, %v2542_v59  ;;  %v2611_v60 = vpop.f32.mrf.mxu3 }
 0x472   :  { %2621 = vst.msk [vmem:[#allocation2 + $0x208] sm:$0xff] %vm63_vm0, %v2611_v60  ;;  %v2732_v57 = vpop.f32.mrf.mxu0 }
 0x473   :  { %2752 = vst.msk [vmem:[#allocation2 + $0x20] sm:$0xff] %vm63_vm0, %v2732_v57  ;;  %v2939_v61 = vpop.f32.mrf.mxu1  ;;  %v3111_v57 = vpack.c.bf16 %v3039_v35, %v3039_v35 }
 0x474   :  { %2959 = vst.msk [vmem:[#allocation2 + $0x38] sm:$0xff] %vm63_vm0, %v2939_v61 }
 0x478   :  { %v2801_v17 = vpop.f32.mrf.mxu2 }
 0x479   :  { %2821 = vst.msk [vmem:[#allocation2 + $0x28] sm:$0xff] %vm63_vm0, %v2801_v17  ;;  %v2870_v44 = vpop.f32.mrf.mxu3 }
 0x47a   :  { %2890 = vst.msk [vmem:[#allocation2 + $0x30] sm:$0xff] %vm63_vm0, %v2870_v44  ;;  %v2734_v63 = vpop.f32.mrf.mxu0  ;;  %v3040_v51 = vld [vmem:[#allocation2 + $0x20] sm:$0xff] }
 0x47b   :  { %2753 = vst.msk [vmem:[#allocation2 + $0x68] sm:$0xff] %vm63_vm0, %v2734_v63  ;;  %v2941_v4 = vpop.f32.mrf.mxu1  ;;  %v3043_v18 = vld [vmem:[#allocation2 + $0x38] sm:$0xff]  ;;  %v3112_v15 = vpack.c.bf16 %v3040_v51, %v3040_v51  ;;  %v3036_v44 = vld [vmem:[#allocation2] sm:$0xff]  ;;  %v3109_v63 = vpack.c.bf16 %v3037_v45, %v3037_v45 }
 0x47c   :  { %2960 = vst.msk [vmem:[#allocation2 + $0x80] sm:$0xff] %vm63_vm0, %v2941_v4  ;;  %v3115_v22 = vpack.c.bf16 %v3043_v18, %v3043_v18 }
 0x47d   :  { %v3193_v60 = vunpack.c.l.b16 %v3112_v15  ;;  %v2391_v15 = vld [vmem:[%s6610_s4] sm:$0xf] }
 0x47e   :  { %v3196_v50 = vunpack.c.l.b16 %v3115_v22 }
 0x480   :  { %v2803_v3 = vpop.f32.mrf.mxu2  ;;  %v3041_v46 = vld [vmem:[#allocation2 + $0x28] sm:$0xff] }
 0x481   :  { %2822 = vst.msk [vmem:[#allocation2 + $0x70] sm:$0xff] %vm63_vm0, %v2803_v3  ;;  %v2872_v25 = vpop.f32.mrf.mxu3  ;;  %v3042_v43 = vld [vmem:[#allocation2 + $0x30] sm:$0xff]  ;;  %v3113_v20 = vpack.c.bf16 %v3041_v46, %v3041_v46 }
 0x482   :  { %2891 = vst.msk [vmem:[#allocation2 + $0x78] sm:$0xff] %vm63_vm0, %v2872_v25  ;;  %v2737_v6 = vpop.f32.mrf.mxu0  ;;  %v3114_v27 = vpack.c.bf16 %v3042_v43, %v3042_v43  ;;  %v3049_v4 = vld [vmem:[#allocation2 + $0x68] sm:$0xff]  ;;  %v3191_v25 = vunpack.c.l.b16 %v3110_v56 }
 0x483   :  { %2754 = vst.msk [vmem:[#allocation2 + $0xb0] sm:$0xff] %vm63_vm0, %v2737_v6  ;;  %v2944_v29 = vpop.f32.mrf.mxu1  ;;  %v3052_v21 = vld [vmem:[#allocation2 + $0x80] sm:$0xff]  ;;  %v3194_v40 = vunpack.c.l.b16 %v3113_v20  ;;  %v3057_v56 = vld [vmem:[#allocation2 + $0xa8] sm:$0xff] }
 0x484   :  { %2961 = vst.msk [vmem:[#allocation2 + $0xc8] sm:$0xff] %vm63_vm0, %v2944_v29  ;;  %v3195_v0 = vunpack.c.l.b16 %v3114_v27  ;;  %v3124_v61 = vpack.c.bf16 %v3052_v21, %v3052_v21 }
 0x485   :  { %v3200_v3 = vpack.c.b16 %v3194_v40, %v3193_v60 }
 0x486   :  { %v3201_v41 = vpack.c.b16 %v3196_v50, %v3195_v0  ;;  %v3056_v50 = vld [vmem:[#allocation2 + $0xa0] sm:$0xff] }
 0x487   :  { %v3128_v60 = vpack.c.bf16 %v3056_v50, %v3056_v50 }
 0x488   :  { %v2806_v10 = vpop.f32.mrf.mxu2  ;;  %v3050_v59 = vld [vmem:[#allocation2 + $0x70] sm:$0xff] }
 0x489   :  { %2823 = vst.msk [vmem:[#allocation2 + $0xb8] sm:$0xff] %vm63_vm0, %v2806_v10  ;;  %v2875_v47 = vpop.f32.mrf.mxu3  ;;  %v3051_v28 = vld [vmem:[#allocation2 + $0x78] sm:$0xff]  ;;  %v3122_v29 = vpack.c.bf16 %v3050_v59, %v3050_v59 }
 0x48a   :  { %2892 = vst.msk [vmem:[#allocation2 + $0xc0] sm:$0xff] %vm63_vm0, %v2875_v47  ;;  %v2739_v37 = vpop.f32.mrf.mxu0  ;;  %v3123_v55 = vpack.c.bf16 %v3051_v28, %v3051_v28  ;;  %v3047_v47 = vld [vmem:[#allocation2 + $0x58] sm:$0xff]  ;;  %v3058_v22 = vld [vmem:[#allocation2 + $0xb0] sm:$0xff] }
 0x48b   :  { %2755 = vst.msk [vmem:[#allocation2 + $0xf8] sm:$0xff] %vm63_vm0, %v2739_v37  ;;  %v2946_v12 = vpop.f32.mrf.mxu1 }
 0x48c   :  { %2962 = vst.msk [vmem:[#allocation2 + $0x110] sm:$0xff] %vm63_vm0, %v2946_v12  ;;  %v3241_v6 = vunpack.c.l.b16 %v3123_v55  ;;  %v3192_v12 = vunpack.c.l.b16 %v3111_v57 }
 0x490   :  { %v2808_v58 = vpop.f32.mrf.mxu2  ;;  %v3059_v43 = vld [vmem:[#allocation2 + $0xb8] sm:$0xff] }
 0x491   :  { %2824 = vst.msk [vmem:[#allocation2 + $0x100] sm:$0xff] %vm63_vm0, %v2808_v58  ;;  %v2877_v13 = vpop.f32.mrf.mxu3  ;;  %v3242_v58 = vunpack.c.l.b16 %v3124_v61  ;;  %v3131_v0 = vpack.c.bf16 %v3059_v43, %v3059_v43 }
 0x492   :  { %2893 = vst.msk [vmem:[#allocation2 + $0x108] sm:$0xff] %vm63_vm0, %v2877_v13  ;;  %v2742_v39 = vpop.f32.mrf.mxu0  ;;  %v3108_v13 = vpack.c.bf16 %v3036_v44, %v3036_v44  ;;  %v3055_v44 = vld [vmem:[#allocation2 + $0x98] sm:$0xff] }
 0x493   :  { %2756 = vst.msk [vmem:[#allocation2 + $0x140] sm:$0xff] %vm63_vm0, %v2742_v39  ;;  %v2949_v30 = vpop.f32.mrf.mxu1  ;;  %v3121_v39 = vpack.c.bf16 %v3049_v4, %v3049_v4  ;;  %v3070_v21 = vld [vmem:[#allocation2 + $0x110] sm:$0xff] }
 0x494   :  { %2963 = vst.msk [vmem:[#allocation2 + $0x158] sm:$0xff] %vm63_vm0, %v2949_v30 }
 0x498   :  { %v2811_v14 = vpop.f32.mrf.mxu2  ;;  %v3068_v57 = vld [vmem:[#allocation2 + $0x100] sm:$0xff] }
 0x499   :  { %2825 = vst.msk [vmem:[#allocation2 + $0x148] sm:$0xff] %vm63_vm0, %v2811_v14  ;;  %v2880_v52 = vpop.f32.mrf.mxu3  ;;  %v3060_v14 = vld [vmem:[#allocation2 + $0xc0] sm:$0xff]  ;;  %v3069_v20 = vld [vmem:[#allocation2 + $0x108] sm:$0xff] }
 0x49a   :  { %2894 = vst.msk [vmem:[#allocation2 + $0x150] sm:$0xff] %vm63_vm0, %v2880_v52  ;;  %v2744_v16 = vpop.f32.mrf.mxu0  ;;  %v3190_v52 = vunpack.c.l.b16 %v3109_v63  ;;  %v3141_v55 = vpack.c.bf16 %v3069_v20, %v3069_v20 }
 0x49b   :  { %2757 = vst.msk [vmem:[#allocation2 + $0x188] sm:$0xff] %vm63_vm0, %v2744_v16  ;;  %v2951_v19 = vpop.f32.mrf.mxu1 }
 0x49c   :  { %2964 = vst.msk [vmem:[#allocation2 + $0x1a0] sm:$0xff] %vm63_vm0, %v2951_v19  ;;  %v3048_v19 = vld [vmem:[#allocation2 + $0x60] sm:$0xff] }
 0x4a0   :  { %v2813_v26 = vpop.f32.mrf.mxu2 }
 0x4a1   :  { %2826 = vst.msk [vmem:[#allocation2 + $0x190] sm:$0xff] %vm63_vm0, %v2813_v26  ;;  %v2882_v38 = vpop.f32.mrf.mxu3  ;;  %v3199_v26 = vpack.c.b16 %v3192_v12, %v3191_v25  ;;  %v3067_v25 = vld [vmem:[#allocation2 + $0xf8] sm:$0xff] }
 0x4a2   :  { %2895 = vst.msk [vmem:[#allocation2 + $0x198] sm:$0xff] %vm63_vm0, %v2882_v38  ;;  %v2747_v11 = vpop.f32.mrf.mxu0  ;;  %v3247_v38 = vpack.c.b16 %v3242_v58, %v3241_v6  ;;  %v3283_v58 = vunpack.c.l.b16 %v3128_v60 }
 0x4a3   :  { %2758 = vst.msk [vmem:[#allocation2 + $0x1d0] sm:$0xff] %vm63_vm0, %v2747_v11  ;;  %v2954_v53 = vpop.f32.mrf.mxu1  ;;  %v3240_v11 = vunpack.c.l.b16 %v3122_v29  ;;  %v3333_v29 = vunpack.c.l.b16 %v3141_v55 }
 0x4a4   :  { %2965 = vst.msk [vmem:[#allocation2 + $0x1e8] sm:$0xff] %vm63_vm0, %v2954_v53  ;;  %v3119_v53 = vpack.c.bf16 %v3047_v47, %v3047_v47  ;;  %v3140_v47 = vpack.c.bf16 %v3068_v57, %v3068_v57 }
 0x4a8   :  { %v2816_v54 = vpop.f32.mrf.mxu2 }
 0x4a9   :  { %2827 = vst.msk [vmem:[#allocation2 + $0x1d8] sm:$0xff] %vm63_vm0, %v2816_v54  ;;  %v2885_v9 = vpop.f32.mrf.mxu3  ;;  %v3061_v54 = vld [vmem:[#allocation2 + $0xc8] sm:$0xff] }
 0x4aa   :  { %2896 = vst.msk [vmem:[#allocation2 + $0x1e0] sm:$0xff] %vm63_vm0, %v2885_v9  ;;  %v2749_v49 = vpop.f32.mrf.mxu0 }
 0x4ab   :  { %2759 = vst.msk [vmem:[#allocation2 + $0x218] sm:$0xff] %vm63_vm0, %v2749_v49  ;;  %v2956_v23 = vpop.f32.mrf.mxu1  ;;  %v3132_v49 = vpack.c.bf16 %v3060_v14, %v3060_v14 }
 0x4ac   :  { %2966 = vst.msk [vmem:[#allocation2 + $0x230] sm:$0xff] %vm63_vm0, %v2956_v23  ;;  %v3046_v23 = vld [vmem:[#allocation2 + $0x50] sm:$0xff] }
 0x4ad   :  { %v3118_v46 = vpack.c.bf16 %v3046_v23, %v3046_v23  ;;  %v3287_v51 = vunpack.c.l.b16 %v3132_v49  ;;  %v3332_v23 = vunpack.c.l.b16 %v3140_v47 }
 0x4af   :  { %v3236_v40 = vunpack.c.l.b16 %v3118_v46 }
 0x4b0   :  { %v2818_v24 = vpop.f32.mrf.mxu2 }
 0x4b1   :  { %2828 = vst.msk [vmem:[#allocation2 + $0x220] sm:$0xff] %vm63_vm0, %v2818_v24  ;;  %v2887_v62 = vpop.f32.mrf.mxu3  ;;  %v3189_v24 = vunpack.c.l.b16 %v3108_v13  ;;  %v3127_v13 = vpack.c.bf16 %v3055_v44, %v3055_v44  ;;  %v2393_v44 = vld [vmem:[%s6610_s4 + $0x8] sm:$0xf] }
 0x4b2   :  { %2897 = vst.msk [vmem:[#allocation2 + $0x228] sm:$0xff] %vm63_vm0, %v2887_v62  ;;  %v3008_v42 = vpop.f32.mrf.mxu0  ;;  %v3239_v62 = vunpack.c.l.b16 %v3121_v39  ;;  %v3065_v39 = vld [vmem:[#allocation2 + $0xe8] sm:$0xff] }
 0x4b3   :  { %3028 = vst.msk [vmem:[#allocation2 + $0x40] sm:$0xff] %vm63_vm0, %v3008_v42  ;;  %v3120_v42 = vpack.c.bf16 %v3048_v19, %v3048_v19  ;;  %v3198_v18 = vpack.c.b16 %v3190_v52, %v3189_v24  ;;  %v3137_v24 = vpack.c.bf16 %v3065_v39, %v3065_v39 }
 0x4b4   :  { %v3246_v27 = vpack.c.b16 %v3240_v11, %v3239_v62 }
 0x4b5   :  { %v3238_v32 = vunpack.c.l.b16 %v3120_v42  ;;  %v3064_v42 = vld [vmem:[#allocation2 + $0xe0] sm:$0xff] }
 0x4ba   :  { %v3010_v7 = vpop.f32.mrf.mxu0  ;;  %v3044_v8 = vld [vmem:[#allocation2 + $0x40] sm:$0xff] }
 0x4bb   :  { %3029 = vst.msk [vmem:[#allocation2 + $0x88] sm:$0xff] %vm63_vm0, %v3010_v7  ;;  %v3116_v36 = vpack.c.bf16 %v3044_v8, %v3044_v8  ;;  %v3133_v8 = vpack.c.bf16 %v3061_v54, %v3061_v54  ;;  %v3066_v54 = vld [vmem:[#allocation2 + $0xf0] sm:$0xff] }
 0x4bd   :  { %v3197_v1 = vunpack.c.l.b16 %v3116_v36  ;;  %v3045_v36 = vld [vmem:[#allocation2 + $0x48] sm:$0xff] }
 0x4be   :  { %v3117_v28 = vpack.c.bf16 %v3045_v36, %v3045_v36  ;;  %v3077_v36 = vld [vmem:[#allocation2 + $0x148] sm:$0xff] }
 0x4bf   :  { %v3202_v5 = vpack.c.b16 %v3197_v1, %v3197_v1  ;;  %v3237_v1 = vunpack.c.l.b16 %v3119_v53 }
 0x4c0   :  { %v3235_v61 = vunpack.c.l.b16 %v3117_v28  ;;  %v3149_v28 = vpack.c.bf16 %v3077_v36, %v3077_v36 }
 0x4c1   :  { %v3211_v31 = vsel %vm2044_vm1, %v3202_v5, 0 }
 0x4c2   :  { %v3013_v33 = vpop.f32.mrf.mxu0  ;;  %3216 = vmatpush.bf16.msrb.mxu2 %v3211_v31  ;;  %v3053_v34 = vld [vmem:[#allocation2 + $0x88] sm:$0xff]  ;;  %v3244_v6 = vpack.c.b16 %v3236_v40, %v3235_v61  ;;  %v3378_v57 = vunpack.c.l.b16 %v3149_v28  ;;  %v3094_v28 = vld [vmem:[#allocation2 + $0x1d0] sm:$0xff] }
 0x4c3   :  { %3030 = vst.msk [vmem:[#allocation2 + $0xd0] sm:$0xff] %vm63_vm0, %v3013_v33  ;;  %v3125_v2 = vpack.c.bf16 %v3053_v34, %v3053_v34  ;;  %v3288_v34 = vunpack.c.l.b16 %v3133_v8 }
 0x4c5   :  { %v3243_v48 = vunpack.c.l.b16 %v3125_v2  ;;  %v3130_v2 = vpack.c.bf16 %v3058_v22, %v3058_v22  ;;  %v3293_v45 = vpack.c.b16 %v3288_v34, %v3287_v51  ;;  %v3136_v51 = vpack.c.bf16 %v3064_v42, %v3064_v42  ;;  %v3097_v42 = vld [vmem:[#allocation2 + $0x1e8] sm:$0xff] }
 0x4c6   :  { %3217 = vmatpush.bf16.msrb.mxu2 %v3201_v41  ;;  %v3245_v41 = vpack.c.b16 %v3238_v32, %v3237_v1 }
 0x4c7   :  { %v3248_v17 = vpack.c.b16 %v3243_v48, %v3243_v48  ;;  %v3286_v48 = vunpack.c.l.b16 %v3131_v0  ;;  %v3285_v63 = vunpack.c.l.b16 %v3130_v2  ;;  %v3076_v0 = vld [vmem:[#allocation2 + $0x140] sm:$0xff]  ;;  %v3328_v55 = vunpack.c.l.b16 %v3136_v51 }
 0x4c8   :  { %v3169_v51 = vpack.c.bf16 %v3097_v42, %v3097_v42 }
 0x4c9   :  { %v3257_v10 = vsel %vm2044_vm1, %v3248_v17, 0  ;;  %v3142_v17 = vpack.c.bf16 %v3070_v21, %v3070_v21 }
 0x4ca   :  { %v3015_v37 = vpop.f32.mrf.mxu0  ;;  %3218 = vmatpush.bf16.msrb.mxu2 %v3200_v3  ;;  %3262 = vmatpush.bf16.msrb.mxu3 %v3257_v10  ;;  %v3062_v30 = vld [vmem:[#allocation2 + $0xd0] sm:$0xff]  ;;  %v3129_v3 = vpack.c.bf16 %v3057_v56, %v3057_v56  ;;  %v3087_v56 = vld [vmem:[#allocation2 + $0x198] sm:$0xff] }
 0x4cb   :  { %3031 = vst.msk [vmem:[#allocation2 + $0x118] sm:$0xff] %vm63_vm0, %v3015_v37  ;;  %v3134_v16 = vpack.c.bf16 %v3062_v30, %v3062_v30  ;;  %v3054_v10 = vld [vmem:[#allocation2 + $0x90] sm:$0xff]  ;;  %v3292_v37 = vpack.c.b16 %v3286_v48, %v3285_v63  ;;  %v3334_v52 = vunpack.c.l.b16 %v3142_v17  ;;  %v3075_v48 = vld [vmem:[#allocation2 + $0x138] sm:$0xff]  ;;  %v3088_v17 = vld [vmem:[#allocation2 + $0x1a0] sm:$0xff] }
 0x4cc   :  { %v3078_v30 = vld [vmem:[#allocation2 + $0x150] sm:$0xff]  ;;  %v3126_v11 = vpack.c.bf16 %v3054_v10, %v3054_v10 }
 0x4cd   :  { %v3289_v9 = vunpack.c.l.b16 %v3134_v16  ;;  %v3139_v16 = vpack.c.bf16 %v3067_v25, %v3067_v25  ;;  %v3339_v49 = vpack.c.b16 %v3334_v52, %v3333_v29  ;;  %v3150_v62 = vpack.c.bf16 %v3078_v30, %v3078_v30  ;;  %v3086_v10 = vld [vmem:[#allocation2 + $0x190] sm:$0xff] }
 0x4ce   :  { %3219 = vmatpush.bf16.msrb.mxu2 %v3199_v26  ;;  %3263 = vmatpush.bf16.msrb.mxu3 %v3247_v38  ;;  %v2392_v26 = vld [vmem:[%s6610_s4 + $0x4] sm:$0xf]  ;;  %v3284_v38 = vunpack.c.l.b16 %v3129_v3  ;;  %v3281_v46 = vunpack.c.l.b16 %v3126_v11  ;;  %v3073_v3 = vld [vmem:[#allocation2 + $0x128] sm:$0xff]  ;;  %v3147_v29 = vpack.c.bf16 %v3075_v48, %v3075_v48 }
 0x4cf   :  { %v3294_v7 = vpack.c.b16 %v3289_v9, %v3289_v9  ;;  %v3079_v9 = vld [vmem:[#allocation2 + $0x158] sm:$0xff]  ;;  %v3379_v32 = vunpack.c.l.b16 %v3150_v62  ;;  %v3145_v30 = vpack.c.bf16 %v3073_v3, %v3073_v3 }
 0x4d0   :  { %v3291_v43 = vpack.c.b16 %v3284_v38, %v3283_v58  ;;  %v3151_v1 = vpack.c.bf16 %v3079_v9, %v3079_v9  ;;  %v3376_v11 = vunpack.c.l.b16 %v3147_v29  ;;  %v3083_v9 = vld [vmem:[#allocation2 + $0x178] sm:$0xff] }
 0x4d1   :  { %v3303_v5 = vsel %vm2044_vm1, %v3294_v7, 0  ;;  %v3282_v7 = vunpack.c.l.b16 %v3127_v13 }
 0x4d2   :  { %v3018_v31 = vpop.f32.mrf.mxu0  ;;  %3220 = vmatpush.bf16.msrb.mxu2 %v3198_v18  ;;  %3264 = vmatpush.bf16.msrb.mxu3 %v3246_v27  ;;  %v3071_v33 = vld [vmem:[#allocation2 + $0x118] sm:$0xff]  ;;  %v3331_v18 = vunpack.c.l.b16 %v3139_v16  ;;  %v3138_v27 = vpack.c.bf16 %v3066_v54, %v3066_v54 }
 0x4d3   :  { %3032 = vst.msk [vmem:[#allocation2 + $0x160] sm:$0xff] %vm63_vm0, %v3018_v31  ;;  %3308 = vmatpush.bf16.msrb.mxu1 %v3303_v5  ;;  %v3143_v35 = vpack.c.bf16 %v3071_v33, %v3071_v33  ;;  %v3063_v5 = vld [vmem:[#allocation2 + $0xd8] sm:$0xff]  ;;  %v3329_v31 = vunpack.c.l.b16 %v3137_v24  ;;  %v3290_v33 = vpack.c.b16 %v3282_v7, %v3281_v46  ;;  %v3374_v7 = vunpack.c.l.b16 %v3145_v30 }
 0x4d4   :  { %v3338_v20 = vpack.c.b16 %v3332_v23, %v3331_v18  ;;  %v3330_v2 = vunpack.c.l.b16 %v3138_v27  ;;  %v3135_v21 = vpack.c.bf16 %v3063_v5, %v3063_v5  ;;  %v3155_v46 = vpack.c.bf16 %v3083_v9, %v3083_v9  ;;  %v3101_v9 = vld [vmem:[#allocation2 + $0x208] sm:$0xff] }
 0x4d5   :  { %v3335_v59 = vunpack.c.l.b16 %v3143_v35  ;;  %4827 = vmatmul.msk.bf16.vlgmr.msrb.gmra.mxu2 %vm2040_vm2, %v2391_v15  ;;  %v3074_v15 = vld [vmem:[#allocation2 + $0x130] sm:$0xff]  ;;  %v3380_v35 = vunpack.c.l.b16 %v3151_v1 }
 0x4d6   :  { %3265 = vmatpush.bf16.msrb.mxu3 %v3245_v41  ;;  %v3148_v41 = vpack.c.bf16 %v3076_v0, %v3076_v0  ;;  %v3146_v61 = vpack.c.bf16 %v3074_v15, %v3074_v15  ;;  %v3327_v25 = vunpack.c.l.b16 %v3135_v21  ;;  %v3082_v0 = vld [vmem:[#allocation2 + $0x170] sm:$0xff]  ;;  %v3081_v15 = vld [vmem:[#allocation2 + $0x168] sm:$0xff]  ;;  %v3421_v21 = vunpack.c.l.b16 %v3155_v46 }
 0x4d7   :  { %3309 = vmatpush.bf16.msrb.mxu1 %v3293_v45  ;;  %v3340_v4 = vpack.c.b16 %v3335_v59, %v3335_v59  ;;  %v3337_v59 = vpack.c.b16 %v3330_v2, %v3329_v31  ;;  %v3385_v60 = vpack.c.b16 %v3380_v35, %v3379_v32 }
 0x4d8   :  { %v3336_v58 = vpack.c.b16 %v3328_v55, %v3327_v25  ;;  %v3375_v39 = vunpack.c.l.b16 %v3146_v61  ;;  %v3472_v55 = vunpack.c.l.b16 %v3169_v51  ;;  %v3099_v51 = vld [vmem:[#allocation2 + $0x1f8] sm:$0xff] }
 0x4d9   :  { %v3349_v12 = vsel %vm2044_vm1, %v3340_v4, 0  ;;  %v3159_v4 = vpack.c.bf16 %v3087_v56, %v3087_v56  ;;  %v3105_v56 = vld [vmem:[#allocation2 + $0x228] sm:$0xff] }
 0x4da   :  { %v3020_v14 = vpop.f32.mrf.mxu0  ;;  %3266 = vmatpush.bf16.msrb.mxu3 %v3244_v6  ;;  %3354 = vmatpush.bf16.msra.mxu2 %v3349_v12  ;;  %v3080_v19 = vld [vmem:[#allocation2 + $0x160] sm:$0xff]  ;;  %v3377_v6 = vunpack.c.l.b16 %v3148_v41  ;;  %v3154_v41 = vpack.c.bf16 %v3082_v0, %v3082_v0  ;;  %v3177_v25 = vpack.c.bf16 %v3105_v56, %v3105_v56 }
 0x4db   :  { %3033 = vst.msk [vmem:[#allocation2 + $0x1a8] sm:$0xff] %vm63_vm0, %v3020_v14  ;;  %3310 = vmatpush.bf16.msrb.mxu1 %v3292_v37  ;;  %v3152_v53 = vpack.c.bf16 %v3080_v19, %v3080_v19  ;;  %v3160_v37 = vpack.c.bf16 %v3088_v17, %v3088_v17  ;;  %v3072_v12 = vld [vmem:[#allocation2 + $0x120] sm:$0xff]  ;;  %v3085_v14 = vld [vmem:[#allocation2 + $0x188] sm:$0xff]  ;;  %v3425_v16 = vunpack.c.l.b16 %v3159_v4  ;;  %v3158_v19 = vpack.c.bf16 %v3086_v10, %v3086_v10 }
 0x4dc   :  { %v3384_v13 = vpack.c.b16 %v3378_v57, %v3377_v6  ;;  %v3157_v24 = vpack.c.bf16 %v3085_v14, %v3085_v14  ;;  %v3153_v57 = vpack.c.bf16 %v3081_v15, %v3081_v15  ;;  %v3093_v17 = vld [vmem:[#allocation2 + $0x1c8] sm:$0xff]  ;;  %v3091_v6 = vld [vmem:[#allocation2 + $0x1b8] sm:$0xff]  ;;  %v3420_v10 = vunpack.c.l.b16 %v3154_v41  ;;  %v3090_v14 = vld [vmem:[#allocation2 + $0x1b0] sm:$0xff] }
 0x4dd   :  { %v3381_v8 = vunpack.c.l.b16 %v3152_v53  ;;  %4828 = vmatmul.msk.bf16.vlgmr.msrb.gmra.mxu3 %vm2040_vm2, %v2392_v26  ;;  %v3096_v26 = vld [vmem:[#allocation2 + $0x1e0] sm:$0xff]  ;;  %v3144_v53 = vpack.c.bf16 %v3072_v12, %v3072_v12  ;;  %v3426_v23 = vunpack.c.l.b16 %v3160_v37  ;;  %v3424_v27 = vunpack.c.l.b16 %v3158_v19 }
 0x4de   :  { %3355 = vmatpush.bf16.msra.mxu2 %v3339_v49  ;;  %v2394_v49 = vld [vmem:[%s6610_s4 + $0xc] sm:$0xf]  ;;  %v3168_v36 = vpack.c.bf16 %v3096_v26, %v3096_v26  ;;  %v3104_v37 = vld [vmem:[#allocation2 + $0x220] sm:$0xff] }
 0x4df   :  { %3311 = vmatpush.bf16.msrb.mxu1 %v3291_v43  ;;  %v3386_v22 = vpack.c.b16 %v3381_v8, %v3381_v8  ;;  %v3383_v43 = vpack.c.b16 %v3376_v11, %v3375_v39  ;;  %v3084_v8 = vld [vmem:[#allocation2 + $0x180] sm:$0xff]  ;;  %v3431_v18 = vpack.c.b16 %v3426_v23, %v3425_v16  ;;  %v3373_v5 = vunpack.c.l.b16 %v3144_v53  ;;  %v3103_v16 = vld [vmem:[#allocation2 + $0x218] sm:$0xff] }
 0x4e0   :  { %v3156_v32 = vpack.c.bf16 %v3084_v8, %v3084_v8  ;;  %v3419_v39 = vunpack.c.l.b16 %v3153_v57  ;;  %v3176_v11 = vpack.c.bf16 %v3104_v37, %v3104_v37  ;;  %v5135_v37 = vld [vmem:[%s6611_s5 + $0x20] sm:$0xff] }
 0x4e1   :  { %v3395_v50 = vsel %vm2044_vm1, %v3386_v22, 0  ;;  %v3095_v22 = vld [vmem:[#allocation2 + $0x1d8] sm:$0xff] }
 0x4e2   :  { %v3023_v34 = vpop.f32.mrf.mxu0  ;;  %3356 = vmatpush.bf16.msra.mxu2 %v3338_v20  ;;  %3400 = vmatpush.bf16.msra.mxu3 %v3395_v50  ;;  %v3089_v40 = vld [vmem:[#allocation2 + $0x1a8] sm:$0xff]  ;;  %v3423_v20 = vunpack.c.l.b16 %v3157_v24  ;;  %v3471_v50 = vunpack.c.l.b16 %v3168_v36  ;;  %v3428_v53 = vpack.c.b16 %v3420_v10, %v3419_v39  ;;  %v3162_v24 = vpack.c.bf16 %v3090_v14, %v3090_v14  ;;  %v5139_v39 = vld [vmem:[%s6611_s5 + $0x40] sm:$0xff] }
 0x4e3   :  { %3034 = vst.msk [vmem:[#allocation2 + $0x1f0] sm:$0xff] %vm63_vm0, %v3023_v34  ;;  %3312 = vmatpush.bf16.msrb.mxu1 %v3290_v33  ;;  %v3161_v45 = vpack.c.bf16 %v3089_v40, %v3089_v40  ;;  %v3382_v33 = vpack.c.b16 %v3374_v7, %v3373_v5  ;;  %v3167_v34 = vpack.c.bf16 %v3095_v22, %v3095_v22  ;;  %v3092_v40 = vld [vmem:[#allocation2 + $0x1c0] sm:$0xff]  ;;  %v3516_v36 = vunpack.c.l.b16 %v3176_v11  ;;  %v5144_v10 = vld [vmem:[%s6611_s5 + $0x68] sm:$0xff]  ;;  %v5154_v11 = vld [vmem:[%s6611_s5 + $0xb8] sm:$0xff] }
 0x4e4   :  { %v3430_v2 = vpack.c.b16 %v3424_v27, %v3423_v20  ;;  %v3164_v3 = vpack.c.bf16 %v3092_v40, %v3092_v40  ;;  %v2396_v27 = vld [vmem:[%s6610_s4 + $0x14] sm:$0xf]  ;;  %v3465_v46 = vunpack.c.l.b16 %v3162_v24 }
 0x4e5   :  { %v3427_v63 = vunpack.c.l.b16 %v3161_v45  ;;  %v3166_v45 = vpack.c.bf16 %v3094_v28, %v3094_v28  ;;  %v3470_v4 = vunpack.c.l.b16 %v3167_v34 }
 0x4e6   :  { %3357 = vmatpush.bf16.msra.mxu2 %v3337_v59  ;;  %3401 = vmatpush.bf16.msra.mxu3 %v3385_v60  ;;  %v2395_v59 = vld [vmem:[%s6610_s4 + $0x10] sm:$0xf]  ;;  %v3422_v60 = vunpack.c.l.b16 %v3156_v32  ;;  %v3467_v26 = vunpack.c.l.b16 %v3164_v3 }
 0x4e7   :  { %v3432_v47 = vpack.c.b16 %v3427_v63, %v3427_v63  ;;  %4829 = vmatmul.msk.bf16.vlgmr.msrb.gmra.mxu1 %vm2040_vm2, %v2393_v44  ;;  %v3106_v44 = vld [vmem:[#allocation2 + $0x230] sm:$0xff]  ;;  %v3477_v63 = vpack.c.b16 %v3472_v55, %v3471_v50  ;;  %v3469_v12 = vunpack.c.l.b16 %v3166_v45  ;;  %v2397_v50 = vld [vmem:[%s6610_s4 + $0x18] sm:$0xf] }
 0x4e8   :  { %v3429_v29 = vpack.c.b16 %v3422_v60, %v3421_v21  ;;  %v2398_v21 = vld [vmem:[%s6610_s4 + $0x1c] sm:$0xf]  ;;  %v5145_v3 = vld [vmem:[%s6611_s5 + $0x70] sm:$0xff] }
 0x4e9   :  { %v3441_v52 = vsel %vm2044_vm1, %v3432_v47, 0  ;;  %v3476_v19 = vpack.c.b16 %v3470_v4, %v3469_v12  ;;  %v5134_v55 = vld [vmem:[%s6611_s5 + $0x18] sm:$0xff]  ;;  %v5141_v4 = vld [vmem:[%s6611_s5 + $0x50] sm:$0xff] }
 0x4ea   :  { %v3025_v38 = vpop.f32.mrf.mxu0  ;;  %3358 = vmatpush.bf16.msra.mxu2 %v3336_v58  ;;  %3402 = vmatpush.bf16.msra.mxu3 %v3384_v13  ;;  %v3098_v54 = vld [vmem:[#allocation2 + $0x1f0] sm:$0xff]  ;;  %v3165_v58 = vpack.c.bf16 %v3093_v17, %v3093_v17  ;;  %v3178_v13 = vpack.c.bf16 %v3106_v44, %v3106_v44  ;;  %v5138_v45 = vld [vmem:[%s6611_s5 + $0x38] sm:$0xff] }
 0x4eb   :  { %3035 = vst.msk [vmem:[#allocation2 + $0x238] sm:$0xff] %vm63_vm0, %v3025_v38  ;;  %3446 = vmatpush.bf16.msra.mxu1 %v3441_v52  ;;  %v3170_v62 = vpack.c.bf16 %v3098_v54, %v3098_v54  ;;  %v3163_v52 = vpack.c.bf16 %v3091_v6, %v3091_v6  ;;  %v3517_v38 = vunpack.c.l.b16 %v3177_v25  ;;  %v5133_v44 = vld [vmem:[%s6611_s5 + $0x10] sm:$0xff]  ;;  %v5132_v25 = vld [vmem:[%s6611_s5 + $0x8] sm:$0xff] }
 0x4ec   :  { %v3518_v23 = vunpack.c.l.b16 %v3178_v13  ;;  %v5136_v6 = vld [vmem:[%s6611_s5 + $0x28] sm:$0xff] }
 0x4ed   :  { %v3473_v1 = vunpack.c.l.b16 %v3170_v62  ;;  %4830 = vmatmul.msk.bf16.vlgmr.msra.gmra.mxu2 %vm2040_vm2, %v2394_v49  ;;  %v3468_v49 = vunpack.c.l.b16 %v3165_v58  ;;  %v3175_v62 = vpack.c.bf16 %v3103_v16, %v3103_v16  ;;  %v3466_v42 = vunpack.c.l.b16 %v3163_v52 }
 0x4ee   :  { %3403 = vmatpush.bf16.msra.mxu3 %v3383_v43  ;;  %v3102_v43 = vld [vmem:[#allocation2 + $0x210] sm:$0xff]  ;;  %v3523_v8 = vpack.c.b16 %v3518_v23, %v3517_v38  ;;  %v5150_v38 = vld [vmem:[%s6611_s5 + $0x98] sm:$0xff] }
 0x4ef   :  { %3447 = vmatpush.bf16.msra.mxu1 %v3431_v18  ;;  %v3478_v31 = vpack.c.b16 %v3473_v1, %v3473_v1  ;;  %v3475_v7 = vpack.c.b16 %v3468_v49, %v3467_v26  ;;  %v3173_v18 = vpack.c.bf16 %v3101_v9, %v3101_v9  ;;  %v3100_v1 = vld [vmem:[#allocation2 + $0x200] sm:$0xff]  ;;  %v3515_v22 = vunpack.c.l.b16 %v3175_v62  ;;  %v5149_v9 = vld [vmem:[%s6611_s5 + $0x90] sm:$0xff] }
 0x4f0   :  { %v3174_v5 = vpack.c.bf16 %v3102_v43, %v3102_v43  ;;  %v3474_v0 = vpack.c.b16 %v3466_v42, %v3465_v46  ;;  %v3172_v32 = vpack.c.bf16 %v3100_v1, %v3100_v1  ;;  %v5153_v49 = vld [vmem:[%s6611_s5 + $0xb0] sm:$0xff] }
 0x4f1   :  { %v3487_v35 = vsel %vm2044_vm1, %v3478_v31, 0  ;;  %v3522_v20 = vpack.c.b16 %v3516_v36, %v3515_v22  ;;  %v3513_v31 = vunpack.c.l.b16 %v3173_v18  ;;  %v5157_v43 = vld [vmem:[%s6611_s5 + $0xd0] sm:$0xff]  ;;  %v5148_v18 = vld [vmem:[%s6611_s5 + $0x88] sm:$0xff] }
 0x4f2   :  { %3404 = vmatpush.bf16.msra.mxu3 %v3382_v33  ;;  %3492 = vmatpush.bf16.msrb.mxu2 %v3487_v35  ;;  %v3107_v48 = vld [vmem:[#allocation2 + $0x238] sm:$0xff]  ;;  %v3514_v28 = vunpack.c.l.b16 %v3174_v5  ;;  %v3171_v33 = vpack.c.bf16 %v3099_v51, %v3099_v51  ;;  %v3512_v34 = vunpack.c.l.b16 %v3172_v32  ;;  %v5156_v51 = vld [vmem:[%s6611_s5 + $0xc8] sm:$0xff] }
 0x4f3   :  { %3448 = vmatpush.bf16.msra.mxu1 %v3430_v2  ;;  %v3179_v61 = vpack.c.bf16 %v3107_v48, %v3107_v48  ;;  %v5142_v48 = vld [vmem:[%s6611_s5 + $0x58] sm:$0xff] }
 0x4f4   :  { %v3521_v15 = vpack.c.b16 %v3514_v28, %v3513_v31  ;;  %v3511_v2 = vunpack.c.l.b16 %v3171_v33 }
 0x4f5   :  { %v3519_v47 = vunpack.c.l.b16 %v3179_v61  ;;  %4831 = vmatmul.msk.bf16.vlgmr.msra.gmra.mxu3 %vm2040_vm2, %v2395_v59  ;;  %v5146_v59 = vld [vmem:[%s6611_s5 + $0x78] sm:$0xff] }
 0x4f6   :  { %3493 = vmatpush.bf16.msrb.mxu2 %v3477_v63  ;;  %v3520_v35 = vpack.c.b16 %v3512_v34, %v3511_v2  ;;  %3841 = vmatpush.bf16.msra.mxu0 %v5146_v59  ;;  %v5137_v63 = vld [vmem:[%s6611_s5 + $0x30] sm:$0xff] }
 0x4f7   :  { %3449 = vmatpush.bf16.msra.mxu1 %v3429_v29  ;;  %v3524_v30 = vpack.c.b16 %v3519_v47, %v3519_v47  ;;  %v5140_v29 = vld [vmem:[%s6611_s5 + $0x48] sm:$0xff]  ;;  %v5131_v47 = vld [vmem:[%s6611_s5] sm:$0xff] }
 0x4f9   :  { %v3533_v54 = vsel %vm2044_vm1, %v3524_v30, 0  ;;  %v5143_v30 = vld [vmem:[%s6611_s5 + $0x60] sm:$0xff] }
 0x4fa   :  { %3494 = vmatpush.bf16.msrb.mxu2 %v3476_v19  ;;  %3538 = vmatpush.bf16.msrb.mxu3 %v3533_v54  ;;  %v5162_v54 = vld [vmem:[%s6611_s5 + $0xf8] sm:$0xff] }
 0x4fb   :  { %3450 = vmatpush.bf16.msra.mxu1 %v3428_v53  ;;  %3842 = vmatpush.bf16.msra.mxu0 %v5145_v3  ;;  %v5158_v53 = vld [vmem:[%s6611_s5 + $0xd8] sm:$0xff] }
 0x4fe   :  { %3495 = vmatpush.bf16.msrb.mxu2 %v3475_v7  ;;  %3539 = vmatpush.bf16.msrb.mxu3 %v3523_v8  ;;  %v5161_v7 = vld [vmem:[%s6611_s5 + $0xf0] sm:$0xff] }
 0x4ff   :  { %4832 = vmatmul.msk.bf16.vlgmr.msra.gmra.mxu1 %vm2040_vm2, %v2396_v27  ;;  %3843 = vmatpush.bf16.msra.mxu0 %v5144_v10  ;;  %v5152_v27 = vld [vmem:[%s6611_s5 + $0xa8] sm:$0xff] }
 0x500   :  { %3646 = vmatpush.bf16.msrb.mxu1 %v5134_v55  ;;  %v5151_v55 = vld [vmem:[%s6611_s5 + $0xa0] sm:$0xff] }
 0x502   :  { %3496 = vmatpush.bf16.msrb.mxu2 %v3474_v0  ;;  %3540 = vmatpush.bf16.msrb.mxu3 %v3522_v20  ;;  %v5160_v0 = vld [vmem:[%s6611_s5 + $0xe8] sm:$0xff] }
 0x503   :  { %3844 = vmatpush.bf16.msra.mxu0 %v5143_v30 }
 0x504   :  { %3647 = vmatpush.bf16.msrb.mxu1 %v5133_v44 }
 0x505   :  { %4833 = vmatmul.msk.bf16.vlgmr.msrb.gmra.mxu2 %vm2040_vm2, %v2397_v50 }
 0x506   :  { %3541 = vmatpush.bf16.msrb.mxu3 %v3521_v15  ;;  %3711 = vmatpush.bf16.msra.mxu2 %v5138_v45 }
 0x507   :  { %4101 = vmatpush.bf16.msrb.mxu0 %v5162_v54 }
 0x508   :  { %3648 = vmatpush.bf16.msrb.mxu1 %v5132_v25 }
 0x50a   :  { %3542 = vmatpush.bf16.msrb.mxu3 %v3520_v35  ;;  %3712 = vmatpush.bf16.msra.mxu2 %v5137_v63 }
 0x50b   :  { %4102 = vmatpush.bf16.msrb.mxu0 %v5161_v7 }
 0x50c   :  { %3649 = vmatpush.bf16.msrb.mxu1 %v5131_v47 }
 0x50d   :  { %4834 = vmatmul.msk.bf16.vlgmr.msrb.gmra.mxu3 %vm2040_vm2, %v2398_v21 }
 0x50e   :  { %3776 = vmatpush.bf16.msra.mxu3 %v5142_v48  ;;  %3713 = vmatpush.bf16.msra.mxu2 %v5136_v6 }
 0x50f   :  { %4103 = vmatpush.bf16.msrb.mxu0 %v5160_v0 }
 0x510   :  { %3906 = vmatpush.bf16.msra.mxu1 %v5150_v38 }
 0x512   :  { %3777 = vmatpush.bf16.msra.mxu3 %v5141_v4  ;;  %3714 = vmatpush.bf16.msra.mxu2 %v5135_v37 }
 0x514   :  { %3907 = vmatpush.bf16.msra.mxu1 %v5149_v9 }
 0x516   :  { %3778 = vmatpush.bf16.msra.mxu3 %v5140_v29  ;;  %3971 = vmatpush.bf16.msrb.mxu2 %v5154_v11 }
 0x518   :  { %3908 = vmatpush.bf16.msra.mxu1 %v5148_v18 }
 0x51a   :  { %3779 = vmatpush.bf16.msra.mxu3 %v5139_v39  ;;  %3972 = vmatpush.bf16.msrb.mxu2 %v5153_v49 }
 0x51e   :  { %4036 = vmatpush.bf16.msrb.mxu3 %v5158_v53  ;;  %3973 = vmatpush.bf16.msrb.mxu2 %v5152_v27 }
 0x522   :  { %4037 = vmatpush.bf16.msrb.mxu3 %v5157_v43  ;;  %3974 = vmatpush.bf16.msrb.mxu2 %v5151_v55 }
 0x526   :  { %4038 = vmatpush.bf16.msrb.mxu3 %v5156_v51 }
 0x558   :  { %v3222_v41 = vpop.f32.mrf.mxu2 }
 0x559   :  { %v3548_v12 = vmax.f32 %v3222_v41, 0.0 }
 0x55b   :  { %v3561_v52 = vpack.c.bf16 %v3548_v12, %v3548_v12 }
 0x55d   :  { %v6412_v23 = vunpack.c.l.b16 %v3561_v52 }
 0x55f   :  { %v3665_v1 = vrot.slane %v6412_v23, 1  ;;  %v3730_v46 = vrot.slane %v6412_v23, 2  ;;  %v3795_v31 = vrot.slane %v6412_v23, 3  ;;  %v3860_v32 = vrot.slane %v6412_v23, 4 }
 0x560   :  { %v3268_v40 = vpop.f32.mrf.mxu3  ;;  %v3224_v56 = vpop.f32.mrf.mxu2  ;;  %v3925_v50 = vrot.slane %v6412_v23, 5  ;;  %v3990_v15 = vrot.slane %v6412_v23, 6  ;;  %v4055_v35 = vrot.slane %v6412_v23, 7 }
 0x561   :  { %v3549_v14 = vmax.f32 %v3268_v40, 0.0  ;;  %v5147_v56 = vld [vmem:[%s6611_s5 + $0x80] sm:$0xff] }
 0x562   :  { %3909 = vmatpush.bf16.msra.mxu1 %v5147_v56 }
 0x563   :  { %v3562_v26 = vpack.c.bf16 %v3549_v14, %v3549_v14 }
 0x564   :  { %v3314_v60 = vpop.f32.mrf.mxu1 }
 0x565   :  { %v3550_v16 = vmax.f32 %v3314_v60, 0.0  ;;  %v6420_v8 = vunpack.c.l.b16 %v3562_v26 }
 0x567   :  { %v3563_v24 = vpack.c.bf16 %v3550_v16, %v3550_v16  ;;  %v3593_v28 = vrot.slane %v6420_v8, 7  ;;  %v3796_v34 = vrot.slane %v6420_v8, 2  ;;  %v3731_v21 = vrot.slane %v6420_v8, 1 }
 0x568   :  { %v3270_v57 = vpop.f32.mrf.mxu3  ;;  %v3861_v41 = vrot.slane %v6420_v8, 3  ;;  %v3926_v40 = vrot.slane %v6420_v8, 4  ;;  %v3991_v45 = vrot.slane %v6420_v8, 5  ;;  %v3666_v25 = vsel %vm3594_vm3, %v6420_v8, %v3665_v1 }
 0x569   :  { %v6430_v22 = vunpack.c.l.b16 %v3563_v24  ;;  %v5155_v57 = vld [vmem:[%s6611_s5 + $0xc0] sm:$0xff]  ;;  %v3595_v63 = vsel %vm3594_vm3, %v3593_v28, %v6412_v23  ;;  %v3797_v29 = vsel %vm3594_vm3, %v3796_v34, %v3795_v31  ;;  %v4056_v10 = vrot.slane %v6420_v8, 6 }
 0x56a   :  { %v3732_v47 = vsel %vm3594_vm3, %v3731_v21, %v3730_v46  ;;  %v6477_v37 = vsel %vm3594_vm3, %v3861_v41, %v3860_v32  ;;  %v6480_v12 = vsel %vm3594_vm3, %v3926_v40, %v3925_v50  ;;  %4039 = vmatpush.bf16.msrb.mxu3 %v5155_v57  ;;  %v6485_v30 = vsel %vm3594_vm3, %v3991_v45, %v3990_v15 }
 0x56b   :  { %v3596_v60 = vrot.slane %v6430_v22, 6  ;;  %v3798_v4 = vrot.slane %v6430_v22, 1  ;;  %v3667_v6 = vrot.slane %v6430_v22, 7  ;;  %v3733_v11 = vsel %vm3597_vm4, %v6430_v22, %v3732_v47 }
 0x56c   :  { %v3316_v61 = vpop.f32.mrf.mxu1  ;;  %v3863_v53 = vrot.slane %v6430_v22, 2  ;;  %v3928_v24 = vrot.slane %v6430_v22, 3  ;;  %v4058_v40 = vrot.slane %v6430_v22, 5 }
 0x56d   :  { %v5159_v61 = vld [vmem:[%s6611_s5 + $0xe0] sm:$0xff]  ;;  %v3668_v38 = vsel %vm3597_vm4, %v3667_v6, %v3666_v25 }
 0x56e   :  { %4104 = vmatpush.bf16.msrb.mxu0 %v5159_v61 }
 0x570   :  { %v3360_v17 = vpop.f32.mrf.mxu2 }
 0x571   :  { %v3551_v62 = vmax.f32 %v3360_v17, 0.0 }
 0x573   :  { %v3564_v5 = vpack.c.bf16 %v3551_v62, %v3551_v62 }
 0x575   :  { %v6456_v48 = vunpack.c.l.b16 %v3564_v5 }
 0x577   :  { %v3599_v39 = vrot.slane %v6456_v48, 5  ;;  %v3669_v52 = vrot.slane %v6456_v48, 6  ;;  %v3734_v16 = vrot.slane %v6456_v48, 7 }
 0x578   :  { %v3406_v58 = vpop.f32.mrf.mxu3  ;;  %v3362_v13 = vpop.f32.mrf.mxu2 }
 0x579   :  { %v3552_v36 = vmax.f32 %v3406_v58, 0.0  ;;  %v3598_v13 = vsel %vm3597_vm4, %v3596_v60, %v3595_v63  ;;  %v3670_v46 = vsel %vm3600_vm5, %v3669_v52, %v3668_v38  ;;  %v3735_v5 = vsel %vm3600_vm5, %v3734_v16, %v3733_v11 }
 0x57a   :  { %v3601_v43 = vsel %vm3600_vm5, %v3599_v39, %v3598_v13  ;;  %v3864_v16 = vsel %vm3597_vm4, %v3863_v53, %v6477_v37  ;;  %v3865_v38 = vrot.slane %v6456_v48, 1  ;;  %v3929_v11 = vsel %vm3597_vm4, %v3928_v24, %v6480_v12 }
 0x57b   :  { %v3565_v33 = vpack.c.bf16 %v3552_v36, %v3552_v36  ;;  %v3993_v36 = vrot.slane %v6430_v22, 4 }
 0x57c   :  { %v6392_v19 = vpop.f32.mrf.mxu1  ;;  %v3866_v53 = vsel %vm3600_vm5, %v3865_v38, %v3864_v16 }
 0x57d   :  { %v3553_v2 = vmax.f32 %v6392_v19, 0.0  ;;  %v6465_v17 = vunpack.c.l.b16 %v3565_v33  ;;  %v3799_v19 = vsel %vm3597_vm4, %v3798_v4, %v3797_v29  ;;  %v3994_v8 = vsel %vm3597_vm4, %v3993_v36, %v6485_v30 }
 0x57e   :  { %v3800_v7 = vsel %vm3600_vm5, %v6456_v48, %v3799_v19  ;;  %v4057_v19 = vsel %vm3594_vm3, %v4056_v10, %v4055_v35  ;;  %v4060_v10 = vrot.slane %v6456_v48, 4 }
 0x57f   :  { %v3566_v3 = vpack.c.bf16 %v3553_v2, %v3553_v2  ;;  %v3602_v14 = vrot.slane %v6465_v17, 4  ;;  %v3671_v54 = vrot.slane %v6465_v17, 5  ;;  %v3736_v9 = vrot.slane %v6465_v17, 6 }
 0x580   :  { %v3408_v42 = vpop.f32.mrf.mxu3  ;;  %v3801_v49 = vrot.slane %v6465_v17, 7  ;;  %v3932_v23 = vrot.slane %v6465_v17, 1  ;;  %v3997_v35 = vrot.slane %v6465_v17, 2  ;;  %v4059_v37 = vsel %vm3597_vm4, %v4058_v40, %v4057_v19 }
 0x581   :  { %v6491_v26 = vunpack.c.l.b16 %v3566_v3  ;;  %v3604_v1 = vsel %vm3603_vm6, %v3602_v14, %v3601_v43  ;;  %v3672_v28 = vsel %vm3603_vm6, %v3671_v54, %v3670_v46  ;;  %v3737_v33 = vsel %vm3603_vm6, %v3736_v9, %v3735_v5 }
 0x582   :  { %v3802_v50 = vsel %vm3603_vm6, %v3801_v49, %v3800_v7  ;;  %v3930_v54 = vrot.slane %v6456_v48, 2  ;;  %v3995_v9 = vrot.slane %v6456_v48, 3  ;;  %v4062_v12 = vrot.slane %v6465_v17, 3 }
 0x583   :  { %v3605_v51 = vrot.slane %v6491_v26, 3  ;;  %v3673_v0 = vrot.slane %v6491_v26, 4  ;;  %v3803_v31 = vrot.slane %v6491_v26, 6  ;;  %v4061_v7 = vsel %vm3600_vm5, %v4060_v10, %v4059_v37 }
 0x584   :  { %v3454_v20 = vpop.f32.mrf.mxu1  ;;  %v3931_v49 = vsel %vm3600_vm5, %v3930_v54, %v3929_v11  ;;  %v3996_v24 = vsel %vm3600_vm5, %v3995_v9, %v3994_v8  ;;  %v4063_v5 = vsel %vm3603_vm6, %v4062_v12, %v4061_v7 }
 0x585   :  { %v3738_v20 = vrot.slane %v6491_v26, 5  ;;  %v3607_v56 = vsel %vm3606_vm7, %v3605_v51, %v3604_v1  ;;  %v3674_v55 = vsel %vm3606_vm7, %v3673_v0, %v3672_v28  ;;  %v3933_v43 = vsel %vm3603_vm6, %v3932_v23, %v3931_v49 }
 0x586   :  { %v3998_v30 = vsel %vm3603_vm6, %v3997_v35, %v3996_v24  ;;  %v3867_v0 = vsel %vm3603_vm6, %v6465_v17, %v3866_v53 }
 0x587   :  { %v3739_v45 = vsel %vm3606_vm7, %v3738_v20, %v3737_v33 }
 0x588   :  { %v3498_v59 = vpop.f32.mrf.mxu2 }
 0x589   :  { %v3554_v44 = vmax.f32 %v3498_v59, 0.0  ;;  %v3804_v59 = vsel %vm3606_vm7, %v3803_v31, %v3802_v50 }
 0x58b   :  { %v3567_v58 = vpack.c.bf16 %v3554_v44, %v3554_v44 }
 0x58d   :  { %v6501_v62 = vunpack.c.l.b16 %v3567_v58 }
 0x58f   :  { %v3608_v15 = vrot.slane %v6501_v62, 2  ;;  %v3675_v34 = vrot.slane %v6501_v62, 3  ;;  %v3740_v2 = vrot.slane %v6501_v62, 4  ;;  %v3805_v21 = vrot.slane %v6501_v62, 5 }
 0x590   :  { %v3544_v42 = vpop.f32.mrf.mxu3  ;;  %v3500_v18 = vpop.f32.mrf.mxu2  ;;  %v3870_v48 = vrot.slane %v6501_v62, 6  ;;  %v3935_v36 = vrot.slane %v6501_v62, 7  ;;  %v4066_v51 = vrot.slane %v6501_v62, 1 }
 0x591   :  { %v3555_v27 = vmax.f32 %v3544_v42, 0.0  ;;  %v3610_v63 = vsel %vm3609_vm8, %v3608_v15, %v3607_v56  ;;  %v3676_v22 = vsel %vm3609_vm8, %v3675_v34, %v3674_v55  ;;  %v3741_v4 = vsel %vm3609_vm8, %v3740_v2, %v3739_v45 }
 0x592   :  { %v3806_v3 = vsel %vm3609_vm8, %v3805_v21, %v3804_v59  ;;  %v3868_v42 = vrot.slane %v6491_v26, 7  ;;  %v3999_v18 = vrot.slane %v6491_v26, 1 }
 0x593   :  { %v3568_v32 = vpack.c.bf16 %v3555_v27, %v3555_v27  ;;  %v4064_v27 = vrot.slane %v6491_v26, 2 }
 0x594   :  { %v3869_v31 = vsel %vm3606_vm7, %v3868_v42, %v3867_v0  ;;  %v4000_v50 = vsel %vm3606_vm7, %v3999_v18, %v3998_v30 }
 0x595   :  { %v6521_v41 = vunpack.c.l.b16 %v3568_v32  ;;  %v3934_v32 = vsel %vm3606_vm7, %v6491_v26, %v3933_v43  ;;  %v3871_v28 = vsel %vm3609_vm8, %v3870_v48, %v3869_v31  ;;  %v4065_v15 = vsel %vm3606_vm7, %v4064_v27, %v4063_v5 }
 0x596   :  { %v3936_v33 = vsel %vm3609_vm8, %v3935_v36, %v3934_v32  ;;  %v4001_v17 = vsel %vm3609_vm8, %v6501_v62, %v4000_v50  ;;  %v4067_v21 = vsel %vm3609_vm8, %v4066_v51, %v4065_v15 }
 0x597   :  { %v3611_v60 = vrot.slane %v6521_v41, 1  ;;  %v3677_v57 = vrot.slane %v6521_v41, 2  ;;  %v3742_v61 = vrot.slane %v6521_v41, 3  ;;  %v3807_v44 = vrot.slane %v6521_v41, 4 }
 0x598   :  { %v3546_v25 = vpop.f32.mrf.mxu3  ;;  %v3872_v1 = vrot.slane %v6521_v41, 5  ;;  %v3937_v46 = vrot.slane %v6521_v41, 6  ;;  %v4002_v20 = vrot.slane %v6521_v41, 7  ;;  %v4068_v26 = vsel %vm3612_vm9, %v6521_v41, %v4067_v21 }
 0x599   :  { %v3613_v6 = vsel %vm3612_vm9, %v3611_v60, %v3610_v63  ;;  %v3678_v29 = vsel %vm3612_vm9, %v3677_v57, %v3676_v22  ;;  %v3743_v47 = vsel %vm3612_vm9, %v3742_v61, %v3741_v4  ;;  %v3808_v58 = vsel %vm3612_vm9, %v3807_v44, %v3806_v3  ;;  %v5230_v57 = vld [vmem:[%s6612_s6] ss:$0 sm:$0xff]  ;;  %s5257_s6 = smov [#allocation3]  }
 0x59a   :  { %v3614_v13 = vpack.c.b16 %v3613_v6, %v3613_v6  ;;  %v3679_v39 = vpack.c.b16 %v3678_v29, %v3678_v29  ;;  %v3744_v14 = vpack.c.b16 %v3743_v47, %v3743_v47  ;;  %v3809_v52 = vpack.c.b16 %v3808_v58, %v3808_v58  ;;  %s4119_s24 = sshll.u32 %s5257_s6, 4  ;;  %s4120_s24 = int_to_ptr.vmem [resolvable:$true] %s4119_s24 }
 0x59b   :  { %v3873_v34 = vsel %vm3612_vm9, %v3872_v1, %v3871_v28  ;;  %v3938_v2 = vsel %vm3612_vm9, %v3937_v46, %v3936_v33  ;;  %v4003_v40 = vsel %vm3612_vm9, %v4002_v20, %v4001_v17  ;;  %v4069_v59 = vpack.c.b16 %v4068_v26, %v4068_v26 }
 0x59c   :  { %4851 = vmatmul.msk.bf16.vlgmr.msrb.gmra.mxu1 %vm63_vm0, %v3614_v13  ;;  %4876 = vmatmul.msk.bf16.vlgmr.msra.gmra.mxu2 %vm63_vm0, %v3679_v39  ;;  %v3874_v56 = vpack.c.b16 %v3873_v34, %v3873_v34  ;;  %v3939_v55 = vpack.c.b16 %v3938_v2, %v3938_v2  ;;  %v4004_v45 = vpack.c.b16 %v4003_v40, %v4003_v40 }
 0x59d   :  { %4901 = vmatmul.msk.bf16.vlgmr.msra.gmra.mxu3 %vm63_vm0, %v3744_v14  ;;  %4926 = vmatmul.msk.bf16.vlgmr.msra.gmra.mxu0 %vm63_vm0, %v3809_v52 }
 0x5ac   :  { %4951 = vmatmul.msk.bf16.vlgmr.msra.gmra.mxu1 %vm63_vm0, %v3874_v56  ;;  %4976 = vmatmul.msk.bf16.vlgmr.msrb.gmra.mxu2 %vm63_vm0, %v3939_v55 }
 0x5ad   :  { %5001 = vmatmul.msk.bf16.vlgmr.msrb.gmra.mxu3 %vm63_vm0, %v4004_v45  ;;  %5026 = vmatmul.msk.bf16.vlgmr.msrb.gmra.mxu0 %vm63_vm0, %v4069_v59 }
 0x619   :  { %v3651_v62 = vpop.f32.mrf.mxu1 }
 0x61a   :  { %v3846_v60 = vpop.f32.mrf.mxu0  ;;  %v3655_v63 = vadd.f32 %v5230_v57, %v3651_v62 }
 0x61f   :  { %v3716_v61 = vpop.f32.mrf.mxu2 }
 0x620   :  { %v3781_v41 = vpop.f32.mrf.mxu3  ;;  %v3720_v4 = vadd.f32 %v3716_v61, %v3655_v63 }
 0x621   :  { %v3653_v44 = vpop.f32.mrf.mxu1 }
 0x622   :  { %v3848_v22 = vpop.f32.mrf.mxu0  ;;  %v3785_v25 = vadd.f32 %v3781_v41, %v3720_v4 }
 0x624   :  { %v3850_v58 = vadd.f32 %v3846_v60, %v3785_v25 }
 0x627   :  { %v3718_v3 = vpop.f32.mrf.mxu2 }
 0x628   :  { %v3783_v6 = vpop.f32.mrf.mxu3 }
 0x629   :  { %v3911_v29 = vpop.f32.mrf.mxu1 }
 0x62a   :  { %v4106_v47 = vpop.f32.mrf.mxu0  ;;  %v3915_v13 = vadd.f32 %v3911_v29, %v3850_v58 }
 0x62f   :  { %v3976_v39 = vpop.f32.mrf.mxu2 }
 0x630   :  { %v3980_v14 = vadd.f32 %v3976_v39, %v3915_v13  ;;  %v4041_v52 = vpop.f32.mrf.mxu3 }
 0x631   :  { %v3913_v16 = vpop.f32.mrf.mxu1 }
 0x632   :  { %v4045_v19 = vadd.f32 %v4041_v52, %v3980_v14  ;;  %v4108_v38 = vpop.f32.mrf.mxu0 }
 0x634   :  { %v4110_v11 = vadd.f32 %v4106_v47, %v4045_v19 }
 0x636   :  { %v4111_v54 = vmax.f32 %v4110_v11, 0.0 }
 0x637   :  { %v3978_v9 = vpop.f32.mrf.mxu2 }
 0x638   :  { %v4043_v23 = vpop.f32.mrf.mxu3  ;;  %4113 = vst.msk [vmem:[#allocation3] sm:$0xff] %vm4112_vm10, %v4111_v54 }
 0x639   :  { %4124 = dma.vmem_to_hbm [thread:$0]  %s4120_s24, 128, %s4122_s0, [#allocation4]  }
 0x63a   :  { %5255 = dma.done.wait [#allocation4], 128  }
 0x63b   :  { %5256 = vsyncadd [#allocation4], 4294967168 }
 0x63c   :  { %4129 = vsyncpa [#allocation4], 1 }

</bundles_post_ra>
